<compile_context>
chip_gen: v7x
topology: tpu7x:2x2x1
jax: 0.10.0
libtpu: 0.0.40
codegen_flags: <defaults>
</compile_context>

<pallas_src>
import numpy as np
import jax
import jax.numpy as jnp
from jax import lax
from jax.experimental import pallas as pl
from jax.experimental.pallas import tpu as pltpu

# ---------------- configuration (small, TPU-friendly) ----------------
NUM_CLASSES  = 10
SAMPLE_RATE  = 16000
N_FFT        = 256
HOP          = 128
N_FILTERS    = 64          # n_linear_filters
BASE_FILTERS = 32          # matchbox['base_filters']
HIDDEN       = 32          # hidden_dim
BATCH        = 2
WAVE_LEN     = 1920        # -> T = 1 + WAVE_LEN // HOP = 16 frames (center=True)
F_BINS       = N_FFT // 2 + 1          # 129
T_FRAMES     = 1 + WAVE_LEN // HOP     # 16
N_DFT        = 2 * F_BINS - 2          # 256 (zero sin columns dropped)


def _sig(x):
    return 1.0 / (1.0 + jnp.exp(-x))


# ------------- triangular filterbank (numpy port of the torch helper) -------------
def create_triangular_filterbank_hz(num_filters, n_fft, sample_rate,
                                    min_freq_hz=0.0, max_freq_hz=None):
    if max_freq_hz is None:
        max_freq_hz = sample_rate / 2.0
    stft_freqs = np.linspace(0.0, sample_rate / 2.0, n_fft // 2 + 1)
    points = np.linspace(min_freq_hz, max_freq_hz, num_filters + 2)
    fb = np.zeros((num_filters, n_fft // 2 + 1), np.float32)
    for i in range(num_filters):
        left, center, right = points[i], points[i + 1], points[i + 2]
        rising = (stft_freqs >= left) & (stft_freqs <= center)
        if center > left:
            fb[i, rising] = (stft_freqs[rising] - left) / (center - left)
        elif center == left and rising.sum() > 0:
            fb[i, rising] = 1.0
        falling = (stft_freqs > center) & (stft_freqs <= right)
        if right > center:
            fb[i, falling] = (right - stft_freqs[falling]) / (right - center)
    return fb


# --------------------------- Pallas kernel ---------------------------
def _kernel(frames_ref, wdft_ref, fbT2_ref, phiW_ref, phib_ref,
            wih_ref, bihF_ref, whh_ref, bhn_ref,
            combW_ref, combb_ref, attw2_ref, attb2_ref,
            fcW_ref, fcb_ref, out_ref):
    f32 = jnp.float32
    T, H, NF = T_FRAMES, HIDDEN, N_FILTERS
    B = frames_ref.shape[0] // T          # rows are TIME-MAJOR: row = t*B + b

    frames = frames_ref[...]                                                # (T*B, 256)

    # Fused power-STFT + triangular filterbank (Hann baked into wdft):
    #   feat = (re^2 + im^2) @ fbT  ==  (spec*spec) @ [fbT ; fbT_im]
    spec = jnp.dot(frames, wdft_ref[...], preferred_element_type=f32)       # (T*B, 256)
    feat = jnp.dot(spec * spec, fbT2_ref[...], preferred_element_type=f32)  # (T*B, NF)

    # per-utterance normalization (mean/unbiased-std over (time,freq), +1e-5), vectorized
    n_el = T * NF
    utt = lax.broadcasted_iota(jnp.int32, (B * T, 1), 0) % B                # utterance id per row
    row_sum = jnp.sum(feat, axis=-1, keepdims=True)                         # (T*B, 1) lane reduce
    mean_col = jnp.zeros((B * T, 1), f32)
    for b in range(B):
        mask = utt == b
        m_b = jnp.sum(jnp.where(mask, row_sum, 0.0), axis=0, keepdims=True) / n_el
        mean_col = jnp.where(mask, m_b, mean_col)
    centered = feat - mean_col
    row_sq = jnp.sum(centered * centered, axis=-1, keepdims=True)           # (T*B, 1)
    inv_col = jnp.zeros((B * T, 1), f32)
    for b in range(B):
        mask = utt == b
        v_b = jnp.sum(jnp.where(mask, row_sq, 0.0), axis=0, keepdims=True) / (n_el - 1)
        inv_col = jnp.where(mask, 1.0 / (jnp.sqrt(v_b) + 1e-5), inv_col)
    featn = centered * inv_col                                              # (T*B, NF)

    # phi (MatchboxNetSkip stand-in): pointwise conv + ReLU
    hphi = jnp.maximum(
        jnp.dot(featn, phiW_ref[...], preferred_element_type=f32) + phib_ref[...],
        0.0)                                                                # (T*B, BF)

    # GRU (batch_first, single layer, h0 = 0); gate order (r, z, n).
    # b_hh[:, :2H] is pre-folded into bihF; b_hn stays inside the n-gate.
    x_gates = jnp.dot(hphi, wih_ref[...], preferred_element_type=f32) + bihF_ref[...]  # (T*B, 3H)
    w_hh = whh_ref[...]                                                     # (H, 3H)
    b_hn = jnp.broadcast_to(bhn_ref[...], (B, H))                           # hoisted broadcast

    h = jnp.zeros((B, H), f32)
    hs = []
    for t in range(T):                                                      # fully unrolled, T=16
        xg = x_gates[t * B:(t + 1) * B, :]                                  # contiguous static slice
        hg = jnp.dot(h, w_hh, preferred_element_type=f32)                   # (B, 3H)
        rz = _sig(xg[:, :2 * H] + hg[:, :2 * H])                            # one fused sigmoid (r|z)
        r = rz[:, :H]
        z = rz[:, H:]
        n = jnp.tanh(xg[:, 2 * H:] + r * (hg[:, 2 * H:] + b_hn))
        h = (1.0 - z) * n + z * h
        hs.append(h)
    gru_tm = jnp.concatenate(hs, axis=0)                                    # (T*B, H) time-major

    # fused projection + pre-tanh attention hidden: one (H, 2H) matmul
    pe = jnp.dot(gru_tm, combW_ref[...], preferred_element_type=f32) + combb_ref[...]  # (T*B, 2H)
    proj = pe[:, :H]
    e = jnp.tanh(pe[:, H:])
    # attention scores on the VPU (no N=1 MXU matmul)
    scores = jnp.sum(e * attw2_ref[...], axis=-1, keepdims=True) + attb2_ref[...]      # (T*B, 1)

    # per-utterance softmax pooling over time (mask-selected, time-major rows)
    ctxs = []
    for b in range(B):
        mask = utt == b
        s_m = jnp.where(mask, scores, -jnp.inf)
        m = jnp.max(s_m, axis=0, keepdims=True)                             # (1, 1)
        w = jnp.where(mask, jnp.exp(scores - m), 0.0)                       # (T*B, 1)
        denom = jnp.sum(w, axis=0, keepdims=True)                           # (1, 1)
        ctxs.append(jnp.sum(w * proj, axis=0, keepdims=True) / denom)       # (1, H)
    ctx = jnp.concatenate(ctxs, axis=0)                                     # (B, H)

    # classifier
    out_ref[...] = jnp.dot(ctx, fcW_ref[...], preferred_element_type=f32) + fcb_ref[...]


def improved_phi_gru_att(x_wave, p):
    """Full forward; framing / layout / weight-folds are cheap XLA glue,
    everything else runs in one Pallas kernel invocation."""
    B = x_wave.shape[0]
    H = HIDDEN
    pad = N_FFT // 2
    xp = jnp.pad(x_wave, ((0, 0), (pad, pad)), mode='reflect')       # torch center=True
    if N_FFT == 2 * HOP and xp.shape[1] % HOP == 0:
        # frame t = concat(chunk[t], chunk[t+1]) -- no gather needed.
        n_chunks = xp.shape[1] // HOP
        chunks = xp.reshape(B, n_chunks, HOP)
        frames = jnp.concatenate(
            [chunks[:, :T_FRAMES, :], chunks[:, 1:T_FRAMES + 1, :]], axis=-1)
    else:
        idx = np.arange(T_FRAMES)[:, None] * HOP + np.arange(N_FFT)[None, :]
        frames = xp[:, idx]
    # TIME-MAJOR layout: row = t*B + b (reorder done here, not on the kernel critical path)
    frames_tm = jnp.transpose(frames, (1, 0, 2)).reshape(T_FRAMES * B, N_FFT).astype(jnp.float32)

    # --- tiny one-time weight folds (legal, exact up to f32 reassociation) ---
    # fold the r/z part of b_hh into b_ih; keep the n-gate hidden bias separate
    b_ihF = p['b_ih'].at[:, :2 * H].add(p['b_hh'][:, :2 * H])        # (1, 3H)
    b_hn = p['b_hh'][:, 2 * H:]                                      # (1, H)
    # fuse projection and projection@attW1 into one (H, 2H) weight
    combW = jnp.concatenate([p['projW'], p['projW'] @ p['attW1']], axis=1)          # (H, 2H)
    combb = jnp.concatenate([p['projb'], p['projb'] @ p['attW1'] + p['attb1']], axis=1)
    attw2 = p['attW2'].T                                             # (1, H) row for VPU reduce

    weights = [p['wdft'], p['fbT2'], p['phiW'], p['phib'],
               p['w_ih'], b_ihF, p['w_hh'], b_hn,
               combW, combb, attw2, p['attb2'], p['fcW'], p['fcb']]

    def full2d(a):
        return pl.BlockSpec(a.shape, lambda i: (0, 0))

    in_specs = [full2d(frames_tm)] + [full2d(w) for w in weights]

    out = pl.pallas_call(
        _kernel,
        out_shape=jax.ShapeDtypeStruct((B, NUM_CLASSES), jnp.float32),
        grid_spec=pltpu.PrefetchScalarGridSpec(
            num_scalar_prefetch=0,
            grid=(1,),
            in_specs=in_specs,
            out_specs=pl.BlockSpec((B, NUM_CLASSES), lambda i: (0, 0)),
        ),
        compiler_params=pltpu.CompilerParams(dimension_semantics=("arbitrary",)),
    )(frames_tm, *weights)
    return out


# --------------------------- pure-JAX reference ---------------------------
def reference_forward(x_wave, p):
    B = x_wave.shape[0]
    pad = N_FFT // 2
    xp = jnp.pad(x_wave, ((0, 0), (pad, pad)), mode='reflect')
    idx = np.arange(T_FRAMES)[:, None] * HOP + np.arange(N_FFT)[None, :]
    frames = xp[:, idx]                                            # (B, T, n_fft)
    spec = frames @ p['wdft']                                      # (B, T, 2F-2)
    feat = (spec * spec) @ p['fbT2']                               # (B, T, n_filters)
    mean = feat.mean(axis=(1, 2), keepdims=True)
    nel = T_FRAMES * N_FILTERS
    var = jnp.sum((feat - mean) ** 2, axis=(1, 2), keepdims=True) / (nel - 1)
    std = jnp.sqrt(var) + 1e-5
    featn = (feat - mean) / std
    hphi = jnp.maximum(featn @ p['phiW'] + p['phib'][0], 0.0)      # (B, T, BF)

    x_gates = hphi @ p['w_ih'] + p['b_ih'][0]                      # (B, T, 3H)
    H = HIDDEN

    def step(h, xg):                                               # xg: (B, 3H)
        hg = h @ p['w_hh'] + p['b_hh'][0]
        r = _sig(xg[:, :H] + hg[:, :H])
        z = _sig(xg[:, H:2 * H] + hg[:, H:2 * H])
        n = jnp.tanh(xg[:, 2 * H:] + r * hg[:, 2 * H:])
        h_new = (1.0 - z) * n + z * h
        return h_new, h_new

    h0 = jnp.zeros((B, H), jnp.float32)
    _, outs = lax.scan(step, h0, jnp.swapaxes(x_gates, 0, 1))
    gru_out = jnp.swapaxes(outs, 0, 1)                             # (B, T, H)

    proj = gru_out @ p['projW'] + p['projb'][0]
    e = jnp.tanh(proj @ p['attW1'] + p['attb1'][0])
    scores = e @ p['attW2'] + p['attb2'][0]                        # (B, T, 1)
    wts = jax.nn.softmax(scores, axis=1)
    ctx = jnp.sum(wts * proj, axis=1)                              # (B, H)
    return ctx @ p['fcW'] + p['fcb'][0]


# --------------------------- deterministic params ---------------------------
def init_params(key):
    keys = jax.random.split(key, 12)
    s = 0.1

    fb = create_triangular_filterbank_hz(N_FILTERS, N_FFT, SAMPLE_RATE, 0.0, None)  # (64, 129)
    n = np.arange(N_FFT)
    k = np.arange(F_BINS)
    hann = 0.5 - 0.5 * np.cos(2.0 * np.pi * n / N_FFT)             # periodic Hann
    ang = 2.0 * np.pi * np.outer(n, k) / N_FFT
    wcos = (hann[:, None] * np.cos(ang)).astype(np.float32)        # (n_fft, 129)
    wsin = (hann[:, None] * (-np.sin(ang))).astype(np.float32)     # (n_fft, 129)
    # drop the identically-zero sin columns (DC k=0, Nyquist k=128) -> width 256
    wdft = np.concatenate([wcos, wsin[:, 1:F_BINS - 1]], axis=1)   # (n_fft, 256)
    fbT = fb.T.astype(np.float32)                                  # (129, n_filters)
    fbT2 = np.concatenate([fbT, fbT[1:F_BINS - 1, :]], axis=0)     # (256, n_filters)
    assert wdft.shape[1] == N_DFT and fbT2.shape[0] == N_DFT

    def nrm(kk, shape):
        return jax.random.normal(kk, shape, jnp.float32) * s

    return dict(
        wdft=jnp.asarray(wdft), fbT2=jnp.asarray(fbT2),
        phiW=nrm(keys[0], (N_FILTERS, BASE_FILTERS)),
        phib=nrm(keys[1], (1, BASE_FILTERS)),
        w_ih=nrm(keys[2], (BASE_FILTERS, 3 * HIDDEN)),             # fused (r|z|n)
        w_hh=nrm(keys[3], (HIDDEN, 3 * HIDDEN)),
        b_ih=nrm(keys[4], (1, 3 * HIDDEN)),
        b_hh=nrm(keys[5], (1, 3 * HIDDEN)),
        projW=nrm(keys[6], (HIDDEN, HIDDEN)),
        projb=nrm(keys[7], (1, HIDDEN)),
        attW1=nrm(keys[8], (HIDDEN, HIDDEN)),
        attb1=nrm(keys[9], (1, HIDDEN)),
        attW2=nrm(keys[10], (HIDDEN, 1)),
        attb2=jnp.zeros((1, 1), jnp.float32),
        fcW=nrm(keys[11], (HIDDEN, NUM_CLASSES)),
        fcb=jnp.zeros((1, NUM_CLASSES), jnp.float32),
    )


if __name__ == "__main__":
    key = jax.random.PRNGKey(0)
    kx, kp = jax.random.split(key)
    x = jax.random.normal(kx, (BATCH, WAVE_LEN), jnp.float32)
    params = init_params(kp)

    out = jax.block_until_ready(improved_phi_gru_att(x, params))
    assert out.shape == (BATCH, NUM_CLASSES)

    ref = jax.block_until_ready(reference_forward(x, params))
    np.testing.assert_allclose(np.asarray(out), np.asarray(ref), rtol=2e-2, atol=2e-2)

    print("KERNEL_OK")
</pallas_src>

<mosaic_0001>
module attributes {stable_mosaic.version = 11 : i64} {
  func.func @_kernel(%arg0: i32, %arg1: memref<32x256xf32, #tpu.memory_space<vmem>>, %arg2: memref<256x256xf32, #tpu.memory_space<vmem>>, %arg3: memref<256x64xf32, #tpu.memory_space<vmem>>, %arg4: memref<64x32xf32, #tpu.memory_space<vmem>>, %arg5: memref<1x32xf32, #tpu.memory_space<vmem>>, %arg6: memref<32x96xf32, #tpu.memory_space<vmem>>, %arg7: memref<1x96xf32, #tpu.memory_space<vmem>>, %arg8: memref<32x96xf32, #tpu.memory_space<vmem>>, %arg9: memref<1x32xf32, #tpu.memory_space<vmem>>, %arg10: memref<32x64xf32, #tpu.memory_space<vmem>>, %arg11: memref<1x64xf32, #tpu.memory_space<vmem>>, %arg12: memref<1x32xf32, #tpu.memory_space<vmem>>, %arg13: memref<1x1xf32, #tpu.memory_space<vmem>>, %arg14: memref<32x10xf32, #tpu.memory_space<vmem>>, %arg15: memref<1x10xf32, #tpu.memory_space<vmem>>, %arg16: memref<2x10xf32, #tpu.memory_space<vmem>>) attributes {dimension_semantics = [#tpu.dimension_semantics<arbitrary>], iteration_bounds = array<i64: 1>, scalar_prefetch = 0 : i64, scratch_operands = 0 : i64, tpu.core_type = #tpu.core_type<tc>, window_params = [{pipeline_mode = #tpu.pipeline_mode<synchronous>, transform_indices = @transform_0, window_bounds = array<i64: 32, 256>}, {pipeline_mode = #tpu.pipeline_mode<synchronous>, transform_indices = @transform_1, window_bounds = array<i64: 256, 256>}, {pipeline_mode = #tpu.pipeline_mode<synchronous>, transform_indices = @transform_2, window_bounds = array<i64: 256, 64>}, {pipeline_mode = #tpu.pipeline_mode<synchronous>, transform_indices = @transform_3, window_bounds = array<i64: 64, 32>}, {pipeline_mode = #tpu.pipeline_mode<synchronous>, transform_indices = @transform_4, window_bounds = array<i64: 1, 32>}, {pipeline_mode = #tpu.pipeline_mode<synchronous>, transform_indices = @transform_5, window_bounds = array<i64: 32, 96>}, {pipeline_mode = #tpu.pipeline_mode<synchronous>, transform_indices = @transform_6, window_bounds = array<i64: 1, 96>}, {pipeline_mode = #tpu.pipeline_mode<synchronous>, transform_indices = @transform_7, window_bounds = array<i64: 32, 96>}, {pipeline_mode = #tpu.pipeline_mode<synchronous>, transform_indices = @transform_8, window_bounds = array<i64: 1, 32>}, {pipeline_mode = #tpu.pipeline_mode<synchronous>, transform_indices = @transform_9, window_bounds = array<i64: 32, 64>}, {pipeline_mode = #tpu.pipeline_mode<synchronous>, transform_indices = @transform_10, window_bounds = array<i64: 1, 64>}, {pipeline_mode = #tpu.pipeline_mode<synchronous>, transform_indices = @transform_11, window_bounds = array<i64: 1, 32>}, {pipeline_mode = #tpu.pipeline_mode<synchronous>, transform_indices = @transform_12, window_bounds = array<i64: 1, 1>}, {pipeline_mode = #tpu.pipeline_mode<synchronous>, transform_indices = @transform_13, window_bounds = array<i64: 32, 10>}, {pipeline_mode = #tpu.pipeline_mode<synchronous>, transform_indices = @transform_14, window_bounds = array<i64: 1, 10>}, {pipeline_mode = #tpu.pipeline_mode<synchronous>, transform_indices = @transform_15, window_bounds = array<i64: 2, 10>}]} {
    %c0 = arith.constant 0 : index
    %c0_0 = arith.constant 0 : index
    %0 = vector.load %arg1[%c0, %c0_0] : memref<32x256xf32, #tpu.memory_space<vmem>>, vector<32x256xf32>
    %c0_1 = arith.constant 0 : index
    %c0_2 = arith.constant 0 : index
    %1 = vector.load %arg2[%c0_1, %c0_2] : memref<256x256xf32, #tpu.memory_space<vmem>>, vector<256x256xf32>
    %cst = arith.constant dense<0.000000e+00> : vector<32x256xf32>
    %2 = tpu.matmul %0, %1, %cst {dimension_numbers = #tpu.dot_dimension_numbers<[1], [0], [0], [1], [0, 0, 1, 1], [], []>} : vector<32x256xf32>, vector<256x256xf32>, vector<32x256xf32> -> vector<32x256xf32>
    %3 = arith.mulf %2, %2 : vector<32x256xf32>
    %c0_3 = arith.constant 0 : index
    %c0_4 = arith.constant 0 : index
    %4 = vector.load %arg3[%c0_3, %c0_4] : memref<256x64xf32, #tpu.memory_space<vmem>>, vector<256x64xf32>
    %cst_5 = arith.constant dense<0.000000e+00> : vector<32x64xf32>
    %5 = tpu.matmul %3, %4, %cst_5 {dimension_numbers = #tpu.dot_dimension_numbers<[1], [0], [0], [1], [0, 0, 1, 1], [], []>} : vector<32x256xf32>, vector<256x64xf32>, vector<32x64xf32> -> vector<32x64xf32>
    %6 = tpu.iota {dimensions = array<i32: 0>} : vector<32x1xi32>
    %c2_i32 = arith.constant 2 : i32
    %c0_i32 = arith.constant 0 : i32
    %7 = arith.cmpi eq, %c2_i32, %c0_i32 : i32
    %c1_i32 = arith.constant 1 : i32
    %8 = arith.select %7, %c1_i32, %c2_i32 : i32
    %9 = vector.broadcast %8 : i32 to vector<32x1xi32>
    %10 = arith.remsi %6, %9 : vector<32x1xi32>
    %c0_i32_6 = arith.constant 0 : i32
    %11 = vector.broadcast %c0_i32_6 : i32 to vector<32x1xi32>
    %12 = arith.cmpi ne, %10, %11 : vector<32x1xi32>
    %c0_i32_7 = arith.constant 0 : i32
    %13 = vector.broadcast %c0_i32_7 : i32 to vector<32x1xi32>
    %14 = arith.cmpi slt, %10, %13 : vector<32x1xi32>
    %c0_i32_8 = arith.constant 0 : i32
    %15 = arith.cmpi slt, %8, %c0_i32_8 : i32
    %16 = vector.broadcast %15 : i1 to vector<32x1xi1>
    %17 = vector.broadcast %16 : vector<32x1xi1> to vector<32x1xi1>
    %18 = arith.xori %14, %17 : vector<32x1xi1>
    %19 = arith.andi %18, %12 : vector<32x1xi1>
    %20 = vector.broadcast %8 : i32 to vector<32x1xi32>
    %21 = arith.addi %10, %20 : vector<32x1xi32>
    %22 = arith.select %19, %21, %10 : vector<32x1xi1>, vector<32x1xi32>
    %cst_9 = arith.constant dense<0.000000e+00> : vector<32xf32>
    %23 = vector.multi_reduction <add>, %5, %cst_9 [1] : vector<32x64xf32> to vector<32xf32>
    %24 = vector.shape_cast %23 : vector<32xf32> to vector<32x1xf32>
    %cst_10 = arith.constant 0.000000e+00 : f32
    %25 = vector.broadcast %cst_10 : f32 to vector<32x1xf32>
    %c0_i32_11 = arith.constant 0 : i32
    %26 = vector.broadcast %c0_i32_11 : i32 to vector<32x1xi32>
    %27 = arith.cmpi eq, %22, %26 : vector<32x1xi32>
    %cst_12 = arith.constant 0.000000e+00 : f32
    %28 = vector.broadcast %cst_12 : f32 to vector<32x1xf32>
    %29 = arith.select %27, %24, %28 : vector<32x1xi1>, vector<32x1xf32>
    %cst_13 = arith.constant dense<0.000000e+00> : vector<1xf32>
    %30 = vector.multi_reduction <add>, %29, %cst_13 [0] : vector<32x1xf32> to vector<1xf32>
    %31 = vector.shape_cast %30 : vector<1xf32> to vector<1x1xf32>
    %cst_14 = arith.constant 1.024000e+03 : f32
    %32 = vector.broadcast %cst_14 : f32 to vector<1x1xf32>
    %33 = arith.divf %31, %32 : vector<1x1xf32>
    %34 = vector.shape_cast %33 : vector<1x1xf32> to vector<1x1xf32>
    %35 = vector.broadcast %34 : vector<1x1xf32> to vector<32x1xf32>
    %36 = arith.select %27, %35, %25 : vector<32x1xi1>, vector<32x1xf32>
    %c1_i32_15 = arith.constant 1 : i32
    %37 = vector.broadcast %c1_i32_15 : i32 to vector<32x1xi32>
    %38 = arith.cmpi eq, %22, %37 : vector<32x1xi32>
    %cst_16 = arith.constant 0.000000e+00 : f32
    %39 = vector.broadcast %cst_16 : f32 to vector<32x1xf32>
    %40 = arith.select %38, %24, %39 : vector<32x1xi1>, vector<32x1xf32>
    %cst_17 = arith.constant dense<0.000000e+00> : vector<1xf32>
    %41 = vector.multi_reduction <add>, %40, %cst_17 [0] : vector<32x1xf32> to vector<1xf32>
    %42 = vector.shape_cast %41 : vector<1xf32> to vector<1x1xf32>
    %cst_18 = arith.constant 1.024000e+03 : f32
    %43 = vector.broadcast %cst_18 : f32 to vector<1x1xf32>
    %44 = arith.divf %42, %43 : vector<1x1xf32>
    %45 = vector.shape_cast %44 : vector<1x1xf32> to vector<1x1xf32>
    %46 = vector.broadcast %45 : vector<1x1xf32> to vector<32x1xf32>
    %47 = arith.select %38, %46, %36 : vector<32x1xi1>, vector<32x1xf32>
    %48 = vector.broadcast %47 : vector<32x1xf32> to vector<32x64xf32>
    %49 = arith.subf %5, %48 : vector<32x64xf32>
    %50 = arith.mulf %49, %49 : vector<32x64xf32>
    %cst_19 = arith.constant dense<0.000000e+00> : vector<32xf32>
    %51 = vector.multi_reduction <add>, %50, %cst_19 [1] : vector<32x64xf32> to vector<32xf32>
    %52 = vector.shape_cast %51 : vector<32xf32> to vector<32x1xf32>
    %cst_20 = arith.constant 0.000000e+00 : f32
    %53 = vector.broadcast %cst_20 : f32 to vector<32x1xf32>
    %c0_i32_21 = arith.constant 0 : i32
    %54 = vector.broadcast %c0_i32_21 : i32 to vector<32x1xi32>
    %55 = arith.cmpi eq, %22, %54 : vector<32x1xi32>
    %cst_22 = arith.constant 0.000000e+00 : f32
    %56 = vector.broadcast %cst_22 : f32 to vector<32x1xf32>
    %57 = arith.select %55, %52, %56 : vector<32x1xi1>, vector<32x1xf32>
    %cst_23 = arith.constant dense<0.000000e+00> : vector<1xf32>
    %58 = vector.multi_reduction <add>, %57, %cst_23 [0] : vector<32x1xf32> to vector<1xf32>
    %59 = vector.shape_cast %58 : vector<1xf32> to vector<1x1xf32>
    %cst_24 = arith.constant 1.023000e+03 : f32
    %60 = vector.broadcast %cst_24 : f32 to vector<1x1xf32>
    %61 = arith.divf %59, %60 : vector<1x1xf32>
    %62 = math.sqrt %61 : vector<1x1xf32>
    %cst_25 = arith.constant 9.99999974E-6 : f32
    %63 = vector.broadcast %cst_25 : f32 to vector<1x1xf32>
    %64 = arith.addf %62, %63 : vector<1x1xf32>
    %cst_26 = arith.constant 1.000000e+00 : f32
    %65 = vector.broadcast %cst_26 : f32 to vector<1x1xf32>
    %66 = arith.divf %65, %64 : vector<1x1xf32>
    %67 = vector.shape_cast %66 : vector<1x1xf32> to vector<1x1xf32>
    %68 = vector.broadcast %67 : vector<1x1xf32> to vector<32x1xf32>
    %69 = arith.select %55, %68, %53 : vector<32x1xi1>, vector<32x1xf32>
    %c1_i32_27 = arith.constant 1 : i32
    %70 = vector.broadcast %c1_i32_27 : i32 to vector<32x1xi32>
    %71 = arith.cmpi eq, %22, %70 : vector<32x1xi32>
    %cst_28 = arith.constant 0.000000e+00 : f32
    %72 = vector.broadcast %cst_28 : f32 to vector<32x1xf32>
    %73 = arith.select %71, %52, %72 : vector<32x1xi1>, vector<32x1xf32>
    %cst_29 = arith.constant dense<0.000000e+00> : vector<1xf32>
    %74 = vector.multi_reduction <add>, %73, %cst_29 [0] : vector<32x1xf32> to vector<1xf32>
    %75 = vector.shape_cast %74 : vector<1xf32> to vector<1x1xf32>
    %cst_30 = arith.constant 1.023000e+03 : f32
    %76 = vector.broadcast %cst_30 : f32 to vector<1x1xf32>
    %77 = arith.divf %75, %76 : vector<1x1xf32>
    %78 = math.sqrt %77 : vector<1x1xf32>
    %cst_31 = arith.constant 9.99999974E-6 : f32
    %79 = vector.broadcast %cst_31 : f32 to vector<1x1xf32>
    %80 = arith.addf %78, %79 : vector<1x1xf32>
    %cst_32 = arith.constant 1.000000e+00 : f32
    %81 = vector.broadcast %cst_32 : f32 to vector<1x1xf32>
    %82 = arith.divf %81, %80 : vector<1x1xf32>
    %83 = vector.shape_cast %82 : vector<1x1xf32> to vector<1x1xf32>
    %84 = vector.broadcast %83 : vector<1x1xf32> to vector<32x1xf32>
    %85 = arith.select %71, %84, %69 : vector<32x1xi1>, vector<32x1xf32>
    %86 = vector.broadcast %85 : vector<32x1xf32> to vector<32x64xf32>
    %87 = arith.mulf %49, %86 : vector<32x64xf32>
    %c0_33 = arith.constant 0 : index
    %c0_34 = arith.constant 0 : index
    %88 = vector.load %arg4[%c0_33, %c0_34] : memref<64x32xf32, #tpu.memory_space<vmem>>, vector<64x32xf32>
    %cst_35 = arith.constant dense<0.000000e+00> : vector<32x32xf32>
    %89 = tpu.matmul %87, %88, %cst_35 {dimension_numbers = #tpu.dot_dimension_numbers<[1], [0], [0], [1], [0, 0, 1, 1], [], []>} : vector<32x64xf32>, vector<64x32xf32>, vector<32x32xf32> -> vector<32x32xf32>
    %c0_36 = arith.constant 0 : index
    %c0_37 = arith.constant 0 : index
    %90 = vector.load %arg5[%c0_36, %c0_37] : memref<1x32xf32, #tpu.memory_space<vmem>>, vector<1x32xf32>
    %91 = vector.broadcast %90 : vector<1x32xf32> to vector<32x32xf32>
    %92 = arith.addf %89, %91 : vector<32x32xf32>
    %cst_38 = arith.constant 0.000000e+00 : f32
    %93 = vector.broadcast %cst_38 : f32 to vector<32x32xf32>
    %94 = arith.maximumf %92, %93 : vector<32x32xf32>
    %c0_39 = arith.constant 0 : index
    %c0_40 = arith.constant 0 : index
    %95 = vector.load %arg6[%c0_39, %c0_40] : memref<32x96xf32, #tpu.memory_space<vmem>>, vector<32x96xf32>
    %cst_41 = arith.constant dense<0.000000e+00> : vector<32x96xf32>
    %96 = tpu.matmul %94, %95, %cst_41 {dimension_numbers = #tpu.dot_dimension_numbers<[1], [0], [0], [1], [0, 0, 1, 1], [], []>} : vector<32x32xf32>, vector<32x96xf32>, vector<32x96xf32> -> vector<32x96xf32>
    %c0_42 = arith.constant 0 : index
    %c0_43 = arith.constant 0 : index
    %97 = vector.load %arg7[%c0_42, %c0_43] : memref<1x96xf32, #tpu.memory_space<vmem>>, vector<1x96xf32>
    %98 = vector.broadcast %97 : vector<1x96xf32> to vector<32x96xf32>
    %99 = arith.addf %96, %98 : vector<32x96xf32>
    %c0_44 = arith.constant 0 : index
    %c0_45 = arith.constant 0 : index
    %100 = vector.load %arg8[%c0_44, %c0_45] : memref<32x96xf32, #tpu.memory_space<vmem>>, vector<32x96xf32>
    %c0_46 = arith.constant 0 : index
    %c0_47 = arith.constant 0 : index
    %101 = vector.load %arg9[%c0_46, %c0_47] : memref<1x32xf32, #tpu.memory_space<vmem>>, vector<1x32xf32>
    %102 = vector.shape_cast %101 : vector<1x32xf32> to vector<1x32xf32>
    %103 = vector.broadcast %102 : vector<1x32xf32> to vector<2x32xf32>
    %cst_48 = arith.constant 0.000000e+00 : f32
    %104 = vector.broadcast %cst_48 : f32 to vector<2x32xf32>
    %105 = vector.extract_strided_slice %99 {offsets = [0, 0], sizes = [2, 96], strides = [1, 1]} : vector<32x96xf32> to vector<2x96xf32>
    %cst_49 = arith.constant dense<0.000000e+00> : vector<2x96xf32>
    %106 = tpu.matmul %104, %100, %cst_49 {dimension_numbers = #tpu.dot_dimension_numbers<[1], [0], [0], [1], [0, 0, 1, 1], [], []>} : vector<2x32xf32>, vector<32x96xf32>, vector<2x96xf32> -> vector<2x96xf32>
    %107 = vector.extract_strided_slice %105 {offsets = [0, 0], sizes = [2, 64], strides = [1, 1]} : vector<2x96xf32> to vector<2x64xf32>
    %108 = vector.extract_strided_slice %106 {offsets = [0, 0], sizes = [2, 64], strides = [1, 1]} : vector<2x96xf32> to vector<2x64xf32>
    %109 = arith.addf %107, %108 : vector<2x64xf32>
    %cst_50 = arith.constant 0.000000e+00 : f32
    %110 = vector.broadcast %cst_50 : f32 to vector<2x64xf32>
    %111 = arith.subf %110, %109 : vector<2x64xf32>
    %112 = math.exp %111 : vector<2x64xf32>
    %cst_51 = arith.constant 1.000000e+00 : f32
    %113 = vector.broadcast %cst_51 : f32 to vector<2x64xf32>
    %114 = arith.addf %113, %112 : vector<2x64xf32>
    %cst_52 = arith.constant 1.000000e+00 : f32
    %115 = vector.broadcast %cst_52 : f32 to vector<2x64xf32>
    %116 = arith.divf %115, %114 : vector<2x64xf32>
    %117 = vector.extract_strided_slice %116 {offsets = [0, 0], sizes = [2, 32], strides = [1, 1]} : vector<2x64xf32> to vector<2x32xf32>
    %118 = vector.extract_strided_slice %116 {offsets = [0, 32], sizes = [2, 32], strides = [1, 1]} : vector<2x64xf32> to vector<2x32xf32>
    %119 = vector.extract_strided_slice %105 {offsets = [0, 64], sizes = [2, 32], strides = [1, 1]} : vector<2x96xf32> to vector<2x32xf32>
    %120 = vector.extract_strided_slice %106 {offsets = [0, 64], sizes = [2, 32], strides = [1, 1]} : vector<2x96xf32> to vector<2x32xf32>
    %121 = arith.addf %120, %103 : vector<2x32xf32>
    %122 = arith.mulf %117, %121 : vector<2x32xf32>
    %123 = arith.addf %119, %122 : vector<2x32xf32>
    %124 = math.tanh %123 : vector<2x32xf32>
    %cst_53 = arith.constant 1.000000e+00 : f32
    %125 = vector.broadcast %cst_53 : f32 to vector<2x32xf32>
    %126 = arith.subf %125, %118 : vector<2x32xf32>
    %127 = arith.mulf %126, %124 : vector<2x32xf32>
    %128 = arith.mulf %118, %104 : vector<2x32xf32>
    %129 = arith.addf %127, %128 : vector<2x32xf32>
    %130 = vector.extract_strided_slice %99 {offsets = [2, 0], sizes = [2, 96], strides = [1, 1]} : vector<32x96xf32> to vector<2x96xf32>
    %cst_54 = arith.constant dense<0.000000e+00> : vector<2x96xf32>
    %131 = tpu.matmul %129, %100, %cst_54 {dimension_numbers = #tpu.dot_dimension_numbers<[1], [0], [0], [1], [0, 0, 1, 1], [], []>} : vector<2x32xf32>, vector<32x96xf32>, vector<2x96xf32> -> vector<2x96xf32>
    %132 = vector.extract_strided_slice %130 {offsets = [0, 0], sizes = [2, 64], strides = [1, 1]} : vector<2x96xf32> to vector<2x64xf32>
    %133 = vector.extract_strided_slice %131 {offsets = [0, 0], sizes = [2, 64], strides = [1, 1]} : vector<2x96xf32> to vector<2x64xf32>
    %134 = arith.addf %132, %133 : vector<2x64xf32>
    %cst_55 = arith.constant 0.000000e+00 : f32
    %135 = vector.broadcast %cst_55 : f32 to vector<2x64xf32>
    %136 = arith.subf %135, %134 : vector<2x64xf32>
    %137 = math.exp %136 : vector<2x64xf32>
    %cst_56 = arith.constant 1.000000e+00 : f32
    %138 = vector.broadcast %cst_56 : f32 to vector<2x64xf32>
    %139 = arith.addf %138, %137 : vector<2x64xf32>
    %cst_57 = arith.constant 1.000000e+00 : f32
    %140 = vector.broadcast %cst_57 : f32 to vector<2x64xf32>
    %141 = arith.divf %140, %139 : vector<2x64xf32>
    %142 = vector.extract_strided_slice %141 {offsets = [0, 0], sizes = [2, 32], strides = [1, 1]} : vector<2x64xf32> to vector<2x32xf32>
    %143 = vector.extract_strided_slice %141 {offsets = [0, 32], sizes = [2, 32], strides = [1, 1]} : vector<2x64xf32> to vector<2x32xf32>
    %144 = vector.extract_strided_slice %130 {offsets = [0, 64], sizes = [2, 32], strides = [1, 1]} : vector<2x96xf32> to vector<2x32xf32>
    %145 = vector.extract_strided_slice %131 {offsets = [0, 64], sizes = [2, 32], strides = [1, 1]} : vector<2x96xf32> to vector<2x32xf32>
    %146 = arith.addf %145, %103 : vector<2x32xf32>
    %147 = arith.mulf %142, %146 : vector<2x32xf32>
    %148 = arith.addf %144, %147 : vector<2x32xf32>
    %149 = math.tanh %148 : vector<2x32xf32>
    %cst_58 = arith.constant 1.000000e+00 : f32
    %150 = vector.broadcast %cst_58 : f32 to vector<2x32xf32>
    %151 = arith.subf %150, %143 : vector<2x32xf32>
    %152 = arith.mulf %151, %149 : vector<2x32xf32>
    %153 = arith.mulf %143, %129 : vector<2x32xf32>
    %154 = arith.addf %152, %153 : vector<2x32xf32>
    %155 = vector.extract_strided_slice %99 {offsets = [4, 0], sizes = [2, 96], strides = [1, 1]} : vector<32x96xf32> to vector<2x96xf32>
    %cst_59 = arith.constant dense<0.000000e+00> : vector<2x96xf32>
    %156 = tpu.matmul %154, %100, %cst_59 {dimension_numbers = #tpu.dot_dimension_numbers<[1], [0], [0], [1], [0, 0, 1, 1], [], []>} : vector<2x32xf32>, vector<32x96xf32>, vector<2x96xf32> -> vector<2x96xf32>
    %157 = vector.extract_strided_slice %155 {offsets = [0, 0], sizes = [2, 64], strides = [1, 1]} : vector<2x96xf32> to vector<2x64xf32>
    %158 = vector.extract_strided_slice %156 {offsets = [0, 0], sizes = [2, 64], strides = [1, 1]} : vector<2x96xf32> to vector<2x64xf32>
    %159 = arith.addf %157, %158 : vector<2x64xf32>
    %cst_60 = arith.constant 0.000000e+00 : f32
    %160 = vector.broadcast %cst_60 : f32 to vector<2x64xf32>
    %161 = arith.subf %160, %159 : vector<2x64xf32>
    %162 = math.exp %161 : vector<2x64xf32>
    %cst_61 = arith.constant 1.000000e+00 : f32
    %163 = vector.broadcast %cst_61 : f32 to vector<2x64xf32>
    %164 = arith.addf %163, %162 : vector<2x64xf32>
    %cst_62 = arith.constant 1.000000e+00 : f32
    %165 = vector.broadcast %cst_62 : f32 to vector<2x64xf32>
    %166 = arith.divf %165, %164 : vector<2x64xf32>
    %167 = vector.extract_strided_slice %166 {offsets = [0, 0], sizes = [2, 32], strides = [1, 1]} : vector<2x64xf32> to vector<2x32xf32>
    %168 = vector.extract_strided_slice %166 {offsets = [0, 32], sizes = [2, 32], strides = [1, 1]} : vector<2x64xf32> to vector<2x32xf32>
    %169 = vector.extract_strided_slice %155 {offsets = [0, 64], sizes = [2, 32], strides = [1, 1]} : vector<2x96xf32> to vector<2x32xf32>
    %170 = vector.extract_strided_slice %156 {offsets = [0, 64], sizes = [2, 32], strides = [1, 1]} : vector<2x96xf32> to vector<2x32xf32>
    %171 = arith.addf %170, %103 : vector<2x32xf32>
    %172 = arith.mulf %167, %171 : vector<2x32xf32>
    %173 = arith.addf %169, %172 : vector<2x32xf32>
    %174 = math.tanh %173 : vector<2x32xf32>
    %cst_63 = arith.constant 1.000000e+00 : f32
    %175 = vector.broadcast %cst_63 : f32 to vector<2x32xf32>
    %176 = arith.subf %175, %168 : vector<2x32xf32>
    %177 = arith.mulf %176, %174 : vector<2x32xf32>
    %178 = arith.mulf %168, %154 : vector<2x32xf32>
    %179 = arith.addf %177, %178 : vector<2x32xf32>
    %180 = vector.extract_strided_slice %99 {offsets = [6, 0], sizes = [2, 96], strides = [1, 1]} : vector<32x96xf32> to vector<2x96xf32>
    %cst_64 = arith.constant dense<0.000000e+00> : vector<2x96xf32>
    %181 = tpu.matmul %179, %100, %cst_64 {dimension_numbers = #tpu.dot_dimension_numbers<[1], [0], [0], [1], [0, 0, 1, 1], [], []>} : vector<2x32xf32>, vector<32x96xf32>, vector<2x96xf32> -> vector<2x96xf32>
    %182 = vector.extract_strided_slice %180 {offsets = [0, 0], sizes = [2, 64], strides = [1, 1]} : vector<2x96xf32> to vector<2x64xf32>
    %183 = vector.extract_strided_slice %181 {offsets = [0, 0], sizes = [2, 64], strides = [1, 1]} : vector<2x96xf32> to vector<2x64xf32>
    %184 = arith.addf %182, %183 : vector<2x64xf32>
    %cst_65 = arith.constant 0.000000e+00 : f32
    %185 = vector.broadcast %cst_65 : f32 to vector<2x64xf32>
    %186 = arith.subf %185, %184 : vector<2x64xf32>
    %187 = math.exp %186 : vector<2x64xf32>
    %cst_66 = arith.constant 1.000000e+00 : f32
    %188 = vector.broadcast %cst_66 : f32 to vector<2x64xf32>
    %189 = arith.addf %188, %187 : vector<2x64xf32>
    %cst_67 = arith.constant 1.000000e+00 : f32
    %190 = vector.broadcast %cst_67 : f32 to vector<2x64xf32>
    %191 = arith.divf %190, %189 : vector<2x64xf32>
    %192 = vector.extract_strided_slice %191 {offsets = [0, 0], sizes = [2, 32], strides = [1, 1]} : vector<2x64xf32> to vector<2x32xf32>
    %193 = vector.extract_strided_slice %191 {offsets = [0, 32], sizes = [2, 32], strides = [1, 1]} : vector<2x64xf32> to vector<2x32xf32>
    %194 = vector.extract_strided_slice %180 {offsets = [0, 64], sizes = [2, 32], strides = [1, 1]} : vector<2x96xf32> to vector<2x32xf32>
    %195 = vector.extract_strided_slice %181 {offsets = [0, 64], sizes = [2, 32], strides = [1, 1]} : vector<2x96xf32> to vector<2x32xf32>
    %196 = arith.addf %195, %103 : vector<2x32xf32>
    %197 = arith.mulf %192, %196 : vector<2x32xf32>
    %198 = arith.addf %194, %197 : vector<2x32xf32>
    %199 = math.tanh %198 : vector<2x32xf32>
    %cst_68 = arith.constant 1.000000e+00 : f32
    %200 = vector.broadcast %cst_68 : f32 to vector<2x32xf32>
    %201 = arith.subf %200, %193 : vector<2x32xf32>
    %202 = arith.mulf %201, %199 : vector<2x32xf32>
    %203 = arith.mulf %193, %179 : vector<2x32xf32>
    %204 = arith.addf %202, %203 : vector<2x32xf32>
    %205 = vector.extract_strided_slice %99 {offsets = [8, 0], sizes = [2, 96], strides = [1, 1]} : vector<32x96xf32> to vector<2x96xf32>
    %cst_69 = arith.constant dense<0.000000e+00> : vector<2x96xf32>
    %206 = tpu.matmul %204, %100, %cst_69 {dimension_numbers = #tpu.dot_dimension_numbers<[1], [0], [0], [1], [0, 0, 1, 1], [], []>} : vector<2x32xf32>, vector<32x96xf32>, vector<2x96xf32> -> vector<2x96xf32>
    %207 = vector.extract_strided_slice %205 {offsets = [0, 0], sizes = [2, 64], strides = [1, 1]} : vector<2x96xf32> to vector<2x64xf32>
    %208 = vector.extract_strided_slice %206 {offsets = [0, 0], sizes = [2, 64], strides = [1, 1]} : vector<2x96xf32> to vector<2x64xf32>
    %209 = arith.addf %207, %208 : vector<2x64xf32>
    %cst_70 = arith.constant 0.000000e+00 : f32
    %210 = vector.broadcast %cst_70 : f32 to vector<2x64xf32>
    %211 = arith.subf %210, %209 : vector<2x64xf32>
    %212 = math.exp %211 : vector<2x64xf32>
    %cst_71 = arith.constant 1.000000e+00 : f32
    %213 = vector.broadcast %cst_71 : f32 to vector<2x64xf32>
    %214 = arith.addf %213, %212 : vector<2x64xf32>
    %cst_72 = arith.constant 1.000000e+00 : f32
    %215 = vector.broadcast %cst_72 : f32 to vector<2x64xf32>
    %216 = arith.divf %215, %214 : vector<2x64xf32>
    %217 = vector.extract_strided_slice %216 {offsets = [0, 0], sizes = [2, 32], strides = [1, 1]} : vector<2x64xf32> to vector<2x32xf32>
    %218 = vector.extract_strided_slice %216 {offsets = [0, 32], sizes = [2, 32], strides = [1, 1]} : vector<2x64xf32> to vector<2x32xf32>
    %219 = vector.extract_strided_slice %205 {offsets = [0, 64], sizes = [2, 32], strides = [1, 1]} : vector<2x96xf32> to vector<2x32xf32>
    %220 = vector.extract_strided_slice %206 {offsets = [0, 64], sizes = [2, 32], strides = [1, 1]} : vector<2x96xf32> to vector<2x32xf32>
    %221 = arith.addf %220, %103 : vector<2x32xf32>
    %222 = arith.mulf %217, %221 : vector<2x32xf32>
    %223 = arith.addf %219, %222 : vector<2x32xf32>
    %224 = math.tanh %223 : vector<2x32xf32>
    %cst_73 = arith.constant 1.000000e+00 : f32
    %225 = vector.broadcast %cst_73 : f32 to vector<2x32xf32>
    %226 = arith.subf %225, %218 : vector<2x32xf32>
    %227 = arith.mulf %226, %224 : vector<2x32xf32>
    %228 = arith.mulf %218, %204 : vector<2x32xf32>
    %229 = arith.addf %227, %228 : vector<2x32xf32>
    %230 = vector.extract_strided_slice %99 {offsets = [10, 0], sizes = [2, 96], strides = [1, 1]} : vector<32x96xf32> to vector<2x96xf32>
    %cst_74 = arith.constant dense<0.000000e+00> : vector<2x96xf32>
    %231 = tpu.matmul %229, %100, %cst_74 {dimension_numbers = #tpu.dot_dimension_numbers<[1], [0], [0], [1], [0, 0, 1, 1], [], []>} : vector<2x32xf32>, vector<32x96xf32>, vector<2x96xf32> -> vector<2x96xf32>
    %232 = vector.extract_strided_slice %230 {offsets = [0, 0], sizes = [2, 64], strides = [1, 1]} : vector<2x96xf32> to vector<2x64xf32>
    %233 = vector.extract_strided_slice %231 {offsets = [0, 0], sizes = [2, 64], strides = [1, 1]} : vector<2x96xf32> to vector<2x64xf32>
    %234 = arith.addf %232, %233 : vector<2x64xf32>
    %cst_75 = arith.constant 0.000000e+00 : f32
    %235 = vector.broadcast %cst_75 : f32 to vector<2x64xf32>
    %236 = arith.subf %235, %234 : vector<2x64xf32>
    %237 = math.exp %236 : vector<2x64xf32>
    %cst_76 = arith.constant 1.000000e+00 : f32
    %238 = vector.broadcast %cst_76 : f32 to vector<2x64xf32>
    %239 = arith.addf %238, %237 : vector<2x64xf32>
    %cst_77 = arith.constant 1.000000e+00 : f32
    %240 = vector.broadcast %cst_77 : f32 to vector<2x64xf32>
    %241 = arith.divf %240, %239 : vector<2x64xf32>
    %242 = vector.extract_strided_slice %241 {offsets = [0, 0], sizes = [2, 32], strides = [1, 1]} : vector<2x64xf32> to vector<2x32xf32>
    %243 = vector.extract_strided_slice %241 {offsets = [0, 32], sizes = [2, 32], strides = [1, 1]} : vector<2x64xf32> to vector<2x32xf32>
    %244 = vector.extract_strided_slice %230 {offsets = [0, 64], sizes = [2, 32], strides = [1, 1]} : vector<2x96xf32> to vector<2x32xf32>
    %245 = vector.extract_strided_slice %231 {offsets = [0, 64], sizes = [2, 32], strides = [1, 1]} : vector<2x96xf32> to vector<2x32xf32>
    %246 = arith.addf %245, %103 : vector<2x32xf32>
    %247 = arith.mulf %242, %246 : vector<2x32xf32>
    %248 = arith.addf %244, %247 : vector<2x32xf32>
    %249 = math.tanh %248 : vector<2x32xf32>
    %cst_78 = arith.constant 1.000000e+00 : f32
    %250 = vector.broadcast %cst_78 : f32 to vector<2x32xf32>
    %251 = arith.subf %250, %243 : vector<2x32xf32>
    %252 = arith.mulf %251, %249 : vector<2x32xf32>
    %253 = arith.mulf %243, %229 : vector<2x32xf32>
    %254 = arith.addf %252, %253 : vector<2x32xf32>
    %255 = vector.extract_strided_slice %99 {offsets = [12, 0], sizes = [2, 96], strides = [1, 1]} : vector<32x96xf32> to vector<2x96xf32>
    %cst_79 = arith.constant dense<0.000000e+00> : vector<2x96xf32>
    %256 = tpu.matmul %254, %100, %cst_79 {dimension_numbers = #tpu.dot_dimension_numbers<[1], [0], [0], [1], [0, 0, 1, 1], [], []>} : vector<2x32xf32>, vector<32x96xf32>, vector<2x96xf32> -> vector<2x96xf32>
    %257 = vector.extract_strided_slice %255 {offsets = [0, 0], sizes = [2, 64], strides = [1, 1]} : vector<2x96xf32> to vector<2x64xf32>
    %258 = vector.extract_strided_slice %256 {offsets = [0, 0], sizes = [2, 64], strides = [1, 1]} : vector<2x96xf32> to vector<2x64xf32>
    %259 = arith.addf %257, %258 : vector<2x64xf32>
    %cst_80 = arith.constant 0.000000e+00 : f32
    %260 = vector.broadcast %cst_80 : f32 to vector<2x64xf32>
    %261 = arith.subf %260, %259 : vector<2x64xf32>
    %262 = math.exp %261 : vector<2x64xf32>
    %cst_81 = arith.constant 1.000000e+00 : f32
    %263 = vector.broadcast %cst_81 : f32 to vector<2x64xf32>
    %264 = arith.addf %263, %262 : vector<2x64xf32>
    %cst_82 = arith.constant 1.000000e+00 : f32
    %265 = vector.broadcast %cst_82 : f32 to vector<2x64xf32>
    %266 = arith.divf %265, %264 : vector<2x64xf32>
    %267 = vector.extract_strided_slice %266 {offsets = [0, 0], sizes = [2, 32], strides = [1, 1]} : vector<2x64xf32> to vector<2x32xf32>
    %268 = vector.extract_strided_slice %266 {offsets = [0, 32], sizes = [2, 32], strides = [1, 1]} : vector<2x64xf32> to vector<2x32xf32>
    %269 = vector.extract_strided_slice %255 {offsets = [0, 64], sizes = [2, 32], strides = [1, 1]} : vector<2x96xf32> to vector<2x32xf32>
    %270 = vector.extract_strided_slice %256 {offsets = [0, 64], sizes = [2, 32], strides = [1, 1]} : vector<2x96xf32> to vector<2x32xf32>
    %271 = arith.addf %270, %103 : vector<2x32xf32>
    %272 = arith.mulf %267, %271 : vector<2x32xf32>
    %273 = arith.addf %269, %272 : vector<2x32xf32>
    %274 = math.tanh %273 : vector<2x32xf32>
    %cst_83 = arith.constant 1.000000e+00 : f32
    %275 = vector.broadcast %cst_83 : f32 to vector<2x32xf32>
    %276 = arith.subf %275, %268 : vector<2x32xf32>
    %277 = arith.mulf %276, %274 : vector<2x32xf32>
    %278 = arith.mulf %268, %254 : vector<2x32xf32>
    %279 = arith.addf %277, %278 : vector<2x32xf32>
    %280 = vector.extract_strided_slice %99 {offsets = [14, 0], sizes = [2, 96], strides = [1, 1]} : vector<32x96xf32> to vector<2x96xf32>
    %cst_84 = arith.constant dense<0.000000e+00> : vector<2x96xf32>
    %281 = tpu.matmul %279, %100, %cst_84 {dimension_numbers = #tpu.dot_dimension_numbers<[1], [0], [0], [1], [0, 0, 1, 1], [], []>} : vector<2x32xf32>, vector<32x96xf32>, vector<2x96xf32> -> vector<2x96xf32>
    %282 = vector.extract_strided_slice %280 {offsets = [0, 0], sizes = [2, 64], strides = [1, 1]} : vector<2x96xf32> to vector<2x64xf32>
    %283 = vector.extract_strided_slice %281 {offsets = [0, 0], sizes = [2, 64], strides = [1, 1]} : vector<2x96xf32> to vector<2x64xf32>
    %284 = arith.addf %282, %283 : vector<2x64xf32>
    %cst_85 = arith.constant 0.000000e+00 : f32
    %285 = vector.broadcast %cst_85 : f32 to vector<2x64xf32>
    %286 = arith.subf %285, %284 : vector<2x64xf32>
    %287 = math.exp %286 : vector<2x64xf32>
    %cst_86 = arith.constant 1.000000e+00 : f32
    %288 = vector.broadcast %cst_86 : f32 to vector<2x64xf32>
    %289 = arith.addf %288, %287 : vector<2x64xf32>
    %cst_87 = arith.constant 1.000000e+00 : f32
    %290 = vector.broadcast %cst_87 : f32 to vector<2x64xf32>
    %291 = arith.divf %290, %289 : vector<2x64xf32>
    %292 = vector.extract_strided_slice %291 {offsets = [0, 0], sizes = [2, 32], strides = [1, 1]} : vector<2x64xf32> to vector<2x32xf32>
    %293 = vector.extract_strided_slice %291 {offsets = [0, 32], sizes = [2, 32], strides = [1, 1]} : vector<2x64xf32> to vector<2x32xf32>
    %294 = vector.extract_strided_slice %280 {offsets = [0, 64], sizes = [2, 32], strides = [1, 1]} : vector<2x96xf32> to vector<2x32xf32>
    %295 = vector.extract_strided_slice %281 {offsets = [0, 64], sizes = [2, 32], strides = [1, 1]} : vector<2x96xf32> to vector<2x32xf32>
    %296 = arith.addf %295, %103 : vector<2x32xf32>
    %297 = arith.mulf %292, %296 : vector<2x32xf32>
    %298 = arith.addf %294, %297 : vector<2x32xf32>
    %299 = math.tanh %298 : vector<2x32xf32>
    %cst_88 = arith.constant 1.000000e+00 : f32
    %300 = vector.broadcast %cst_88 : f32 to vector<2x32xf32>
    %301 = arith.subf %300, %293 : vector<2x32xf32>
    %302 = arith.mulf %301, %299 : vector<2x32xf32>
    %303 = arith.mulf %293, %279 : vector<2x32xf32>
    %304 = arith.addf %302, %303 : vector<2x32xf32>
    %305 = vector.extract_strided_slice %99 {offsets = [16, 0], sizes = [2, 96], strides = [1, 1]} : vector<32x96xf32> to vector<2x96xf32>
    %cst_89 = arith.constant dense<0.000000e+00> : vector<2x96xf32>
    %306 = tpu.matmul %304, %100, %cst_89 {dimension_numbers = #tpu.dot_dimension_numbers<[1], [0], [0], [1], [0, 0, 1, 1], [], []>} : vector<2x32xf32>, vector<32x96xf32>, vector<2x96xf32> -> vector<2x96xf32>
    %307 = vector.extract_strided_slice %305 {offsets = [0, 0], sizes = [2, 64], strides = [1, 1]} : vector<2x96xf32> to vector<2x64xf32>
    %308 = vector.extract_strided_slice %306 {offsets = [0, 0], sizes = [2, 64], strides = [1, 1]} : vector<2x96xf32> to vector<2x64xf32>
    %309 = arith.addf %307, %308 : vector<2x64xf32>
    %cst_90 = arith.constant 0.000000e+00 : f32
    %310 = vector.broadcast %cst_90 : f32 to vector<2x64xf32>
    %311 = arith.subf %310, %309 : vector<2x64xf32>
    %312 = math.exp %311 : vector<2x64xf32>
    %cst_91 = arith.constant 1.000000e+00 : f32
    %313 = vector.broadcast %cst_91 : f32 to vector<2x64xf32>
    %314 = arith.addf %313, %312 : vector<2x64xf32>
    %cst_92 = arith.constant 1.000000e+00 : f32
    %315 = vector.broadcast %cst_92 : f32 to vector<2x64xf32>
    %316 = arith.divf %315, %314 : vector<2x64xf32>
    %317 = vector.extract_strided_slice %316 {offsets = [0, 0], sizes = [2, 32], strides = [1, 1]} : vector<2x64xf32> to vector<2x32xf32>
    %318 = vector.extract_strided_slice %316 {offsets = [0, 32], sizes = [2, 32], strides = [1, 1]} : vector<2x64xf32> to vector<2x32xf32>
    %319 = vector.extract_strided_slice %305 {offsets = [0, 64], sizes = [2, 32], strides = [1, 1]} : vector<2x96xf32> to vector<2x32xf32>
    %320 = vector.extract_strided_slice %306 {offsets = [0, 64], sizes = [2, 32], strides = [1, 1]} : vector<2x96xf32> to vector<2x32xf32>
    %321 = arith.addf %320, %103 : vector<2x32xf32>
    %322 = arith.mulf %317, %321 : vector<2x32xf32>
    %323 = arith.addf %319, %322 : vector<2x32xf32>
    %324 = math.tanh %323 : vector<2x32xf32>
    %cst_93 = arith.constant 1.000000e+00 : f32
    %325 = vector.broadcast %cst_93 : f32 to vector<2x32xf32>
    %326 = arith.subf %325, %318 : vector<2x32xf32>
    %327 = arith.mulf %326, %324 : vector<2x32xf32>
    %328 = arith.mulf %318, %304 : vector<2x32xf32>
    %329 = arith.addf %327, %328 : vector<2x32xf32>
    %330 = vector.extract_strided_slice %99 {offsets = [18, 0], sizes = [2, 96], strides = [1, 1]} : vector<32x96xf32> to vector<2x96xf32>
    %cst_94 = arith.constant dense<0.000000e+00> : vector<2x96xf32>
    %331 = tpu.matmul %329, %100, %cst_94 {dimension_numbers = #tpu.dot_dimension_numbers<[1], [0], [0], [1], [0, 0, 1, 1], [], []>} : vector<2x32xf32>, vector<32x96xf32>, vector<2x96xf32> -> vector<2x96xf32>
    %332 = vector.extract_strided_slice %330 {offsets = [0, 0], sizes = [2, 64], strides = [1, 1]} : vector<2x96xf32> to vector<2x64xf32>
    %333 = vector.extract_strided_slice %331 {offsets = [0, 0], sizes = [2, 64], strides = [1, 1]} : vector<2x96xf32> to vector<2x64xf32>
    %334 = arith.addf %332, %333 : vector<2x64xf32>
    %cst_95 = arith.constant 0.000000e+00 : f32
    %335 = vector.broadcast %cst_95 : f32 to vector<2x64xf32>
    %336 = arith.subf %335, %334 : vector<2x64xf32>
    %337 = math.exp %336 : vector<2x64xf32>
    %cst_96 = arith.constant 1.000000e+00 : f32
    %338 = vector.broadcast %cst_96 : f32 to vector<2x64xf32>
    %339 = arith.addf %338, %337 : vector<2x64xf32>
    %cst_97 = arith.constant 1.000000e+00 : f32
    %340 = vector.broadcast %cst_97 : f32 to vector<2x64xf32>
    %341 = arith.divf %340, %339 : vector<2x64xf32>
    %342 = vector.extract_strided_slice %341 {offsets = [0, 0], sizes = [2, 32], strides = [1, 1]} : vector<2x64xf32> to vector<2x32xf32>
    %343 = vector.extract_strided_slice %341 {offsets = [0, 32], sizes = [2, 32], strides = [1, 1]} : vector<2x64xf32> to vector<2x32xf32>
    %344 = vector.extract_strided_slice %330 {offsets = [0, 64], sizes = [2, 32], strides = [1, 1]} : vector<2x96xf32> to vector<2x32xf32>
    %345 = vector.extract_strided_slice %331 {offsets = [0, 64], sizes = [2, 32], strides = [1, 1]} : vector<2x96xf32> to vector<2x32xf32>
    %346 = arith.addf %345, %103 : vector<2x32xf32>
    %347 = arith.mulf %342, %346 : vector<2x32xf32>
    %348 = arith.addf %344, %347 : vector<2x32xf32>
    %349 = math.tanh %348 : vector<2x32xf32>
    %cst_98 = arith.constant 1.000000e+00 : f32
    %350 = vector.broadcast %cst_98 : f32 to vector<2x32xf32>
    %351 = arith.subf %350, %343 : vector<2x32xf32>
    %352 = arith.mulf %351, %349 : vector<2x32xf32>
    %353 = arith.mulf %343, %329 : vector<2x32xf32>
    %354 = arith.addf %352, %353 : vector<2x32xf32>
    %355 = vector.extract_strided_slice %99 {offsets = [20, 0], sizes = [2, 96], strides = [1, 1]} : vector<32x96xf32> to vector<2x96xf32>
    %cst_99 = arith.constant dense<0.000000e+00> : vector<2x96xf32>
    %356 = tpu.matmul %354, %100, %cst_99 {dimension_numbers = #tpu.dot_dimension_numbers<[1], [0], [0], [1], [0, 0, 1, 1], [], []>} : vector<2x32xf32>, vector<32x96xf32>, vector<2x96xf32> -> vector<2x96xf32>
    %357 = vector.extract_strided_slice %355 {offsets = [0, 0], sizes = [2, 64], strides = [1, 1]} : vector<2x96xf32> to vector<2x64xf32>
    %358 = vector.extract_strided_slice %356 {offsets = [0, 0], sizes = [2, 64], strides = [1, 1]} : vector<2x96xf32> to vector<2x64xf32>
    %359 = arith.addf %357, %358 : vector<2x64xf32>
    %cst_100 = arith.constant 0.000000e+00 : f32
    %360 = vector.broadcast %cst_100 : f32 to vector<2x64xf32>
    %361 = arith.subf %360, %359 : vector<2x64xf32>
    %362 = math.exp %361 : vector<2x64xf32>
    %cst_101 = arith.constant 1.000000e+00 : f32
    %363 = vector.broadcast %cst_101 : f32 to vector<2x64xf32>
    %364 = arith.addf %363, %362 : vector<2x64xf32>
    %cst_102 = arith.constant 1.000000e+00 : f32
    %365 = vector.broadcast %cst_102 : f32 to vector<2x64xf32>
    %366 = arith.divf %365, %364 : vector<2x64xf32>
    %367 = vector.extract_strided_slice %366 {offsets = [0, 0], sizes = [2, 32], strides = [1, 1]} : vector<2x64xf32> to vector<2x32xf32>
    %368 = vector.extract_strided_slice %366 {offsets = [0, 32], sizes = [2, 32], strides = [1, 1]} : vector<2x64xf32> to vector<2x32xf32>
    %369 = vector.extract_strided_slice %355 {offsets = [0, 64], sizes = [2, 32], strides = [1, 1]} : vector<2x96xf32> to vector<2x32xf32>
    %370 = vector.extract_strided_slice %356 {offsets = [0, 64], sizes = [2, 32], strides = [1, 1]} : vector<2x96xf32> to vector<2x32xf32>
    %371 = arith.addf %370, %103 : vector<2x32xf32>
    %372 = arith.mulf %367, %371 : vector<2x32xf32>
    %373 = arith.addf %369, %372 : vector<2x32xf32>
    %374 = math.tanh %373 : vector<2x32xf32>
    %cst_103 = arith.constant 1.000000e+00 : f32
    %375 = vector.broadcast %cst_103 : f32 to vector<2x32xf32>
    %376 = arith.subf %375, %368 : vector<2x32xf32>
    %377 = arith.mulf %376, %374 : vector<2x32xf32>
    %378 = arith.mulf %368, %354 : vector<2x32xf32>
    %379 = arith.addf %377, %378 : vector<2x32xf32>
    %380 = vector.extract_strided_slice %99 {offsets = [22, 0], sizes = [2, 96], strides = [1, 1]} : vector<32x96xf32> to vector<2x96xf32>
    %cst_104 = arith.constant dense<0.000000e+00> : vector<2x96xf32>
    %381 = tpu.matmul %379, %100, %cst_104 {dimension_numbers = #tpu.dot_dimension_numbers<[1], [0], [0], [1], [0, 0, 1, 1], [], []>} : vector<2x32xf32>, vector<32x96xf32>, vector<2x96xf32> -> vector<2x96xf32>
    %382 = vector.extract_strided_slice %380 {offsets = [0, 0], sizes = [2, 64], strides = [1, 1]} : vector<2x96xf32> to vector<2x64xf32>
    %383 = vector.extract_strided_slice %381 {offsets = [0, 0], sizes = [2, 64], strides = [1, 1]} : vector<2x96xf32> to vector<2x64xf32>
    %384 = arith.addf %382, %383 : vector<2x64xf32>
    %cst_105 = arith.constant 0.000000e+00 : f32
    %385 = vector.broadcast %cst_105 : f32 to vector<2x64xf32>
    %386 = arith.subf %385, %384 : vector<2x64xf32>
    %387 = math.exp %386 : vector<2x64xf32>
    %cst_106 = arith.constant 1.000000e+00 : f32
    %388 = vector.broadcast %cst_106 : f32 to vector<2x64xf32>
    %389 = arith.addf %388, %387 : vector<2x64xf32>
    %cst_107 = arith.constant 1.000000e+00 : f32
    %390 = vector.broadcast %cst_107 : f32 to vector<2x64xf32>
    %391 = arith.divf %390, %389 : vector<2x64xf32>
    %392 = vector.extract_strided_slice %391 {offsets = [0, 0], sizes = [2, 32], strides = [1, 1]} : vector<2x64xf32> to vector<2x32xf32>
    %393 = vector.extract_strided_slice %391 {offsets = [0, 32], sizes = [2, 32], strides = [1, 1]} : vector<2x64xf32> to vector<2x32xf32>
    %394 = vector.extract_strided_slice %380 {offsets = [0, 64], sizes = [2, 32], strides = [1, 1]} : vector<2x96xf32> to vector<2x32xf32>
    %395 = vector.extract_strided_slice %381 {offsets = [0, 64], sizes = [2, 32], strides = [1, 1]} : vector<2x96xf32> to vector<2x32xf32>
    %396 = arith.addf %395, %103 : vector<2x32xf32>
    %397 = arith.mulf %392, %396 : vector<2x32xf32>
    %398 = arith.addf %394, %397 : vector<2x32xf32>
    %399 = math.tanh %398 : vector<2x32xf32>
    %cst_108 = arith.constant 1.000000e+00 : f32
    %400 = vector.broadcast %cst_108 : f32 to vector<2x32xf32>
    %401 = arith.subf %400, %393 : vector<2x32xf32>
    %402 = arith.mulf %401, %399 : vector<2x32xf32>
    %403 = arith.mulf %393, %379 : vector<2x32xf32>
    %404 = arith.addf %402, %403 : vector<2x32xf32>
    %405 = vector.extract_strided_slice %99 {offsets = [24, 0], sizes = [2, 96], strides = [1, 1]} : vector<32x96xf32> to vector<2x96xf32>
    %cst_109 = arith.constant dense<0.000000e+00> : vector<2x96xf32>
    %406 = tpu.matmul %404, %100, %cst_109 {dimension_numbers = #tpu.dot_dimension_numbers<[1], [0], [0], [1], [0, 0, 1, 1], [], []>} : vector<2x32xf32>, vector<32x96xf32>, vector<2x96xf32> -> vector<2x96xf32>
    %407 = vector.extract_strided_slice %405 {offsets = [0, 0], sizes = [2, 64], strides = [1, 1]} : vector<2x96xf32> to vector<2x64xf32>
    %408 = vector.extract_strided_slice %406 {offsets = [0, 0], sizes = [2, 64], strides = [1, 1]} : vector<2x96xf32> to vector<2x64xf32>
    %409 = arith.addf %407, %408 : vector<2x64xf32>
    %cst_110 = arith.constant 0.000000e+00 : f32
    %410 = vector.broadcast %cst_110 : f32 to vector<2x64xf32>
    %411 = arith.subf %410, %409 : vector<2x64xf32>
    %412 = math.exp %411 : vector<2x64xf32>
    %cst_111 = arith.constant 1.000000e+00 : f32
    %413 = vector.broadcast %cst_111 : f32 to vector<2x64xf32>
    %414 = arith.addf %413, %412 : vector<2x64xf32>
    %cst_112 = arith.constant 1.000000e+00 : f32
    %415 = vector.broadcast %cst_112 : f32 to vector<2x64xf32>
    %416 = arith.divf %415, %414 : vector<2x64xf32>
    %417 = vector.extract_strided_slice %416 {offsets = [0, 0], sizes = [2, 32], strides = [1, 1]} : vector<2x64xf32> to vector<2x32xf32>
    %418 = vector.extract_strided_slice %416 {offsets = [0, 32], sizes = [2, 32], strides = [1, 1]} : vector<2x64xf32> to vector<2x32xf32>
    %419 = vector.extract_strided_slice %405 {offsets = [0, 64], sizes = [2, 32], strides = [1, 1]} : vector<2x96xf32> to vector<2x32xf32>
    %420 = vector.extract_strided_slice %406 {offsets = [0, 64], sizes = [2, 32], strides = [1, 1]} : vector<2x96xf32> to vector<2x32xf32>
    %421 = arith.addf %420, %103 : vector<2x32xf32>
    %422 = arith.mulf %417, %421 : vector<2x32xf32>
    %423 = arith.addf %419, %422 : vector<2x32xf32>
    %424 = math.tanh %423 : vector<2x32xf32>
    %cst_113 = arith.constant 1.000000e+00 : f32
    %425 = vector.broadcast %cst_113 : f32 to vector<2x32xf32>
    %426 = arith.subf %425, %418 : vector<2x32xf32>
    %427 = arith.mulf %426, %424 : vector<2x32xf32>
    %428 = arith.mulf %418, %404 : vector<2x32xf32>
    %429 = arith.addf %427, %428 : vector<2x32xf32>
    %430 = vector.extract_strided_slice %99 {offsets = [26, 0], sizes = [2, 96], strides = [1, 1]} : vector<32x96xf32> to vector<2x96xf32>
    %cst_114 = arith.constant dense<0.000000e+00> : vector<2x96xf32>
    %431 = tpu.matmul %429, %100, %cst_114 {dimension_numbers = #tpu.dot_dimension_numbers<[1], [0], [0], [1], [0, 0, 1, 1], [], []>} : vector<2x32xf32>, vector<32x96xf32>, vector<2x96xf32> -> vector<2x96xf32>
    %432 = vector.extract_strided_slice %430 {offsets = [0, 0], sizes = [2, 64], strides = [1, 1]} : vector<2x96xf32> to vector<2x64xf32>
    %433 = vector.extract_strided_slice %431 {offsets = [0, 0], sizes = [2, 64], strides = [1, 1]} : vector<2x96xf32> to vector<2x64xf32>
    %434 = arith.addf %432, %433 : vector<2x64xf32>
    %cst_115 = arith.constant 0.000000e+00 : f32
    %435 = vector.broadcast %cst_115 : f32 to vector<2x64xf32>
    %436 = arith.subf %435, %434 : vector<2x64xf32>
    %437 = math.exp %436 : vector<2x64xf32>
    %cst_116 = arith.constant 1.000000e+00 : f32
    %438 = vector.broadcast %cst_116 : f32 to vector<2x64xf32>
    %439 = arith.addf %438, %437 : vector<2x64xf32>
    %cst_117 = arith.constant 1.000000e+00 : f32
    %440 = vector.broadcast %cst_117 : f32 to vector<2x64xf32>
    %441 = arith.divf %440, %439 : vector<2x64xf32>
    %442 = vector.extract_strided_slice %441 {offsets = [0, 0], sizes = [2, 32], strides = [1, 1]} : vector<2x64xf32> to vector<2x32xf32>
    %443 = vector.extract_strided_slice %441 {offsets = [0, 32], sizes = [2, 32], strides = [1, 1]} : vector<2x64xf32> to vector<2x32xf32>
    %444 = vector.extract_strided_slice %430 {offsets = [0, 64], sizes = [2, 32], strides = [1, 1]} : vector<2x96xf32> to vector<2x32xf32>
    %445 = vector.extract_strided_slice %431 {offsets = [0, 64], sizes = [2, 32], strides = [1, 1]} : vector<2x96xf32> to vector<2x32xf32>
    %446 = arith.addf %445, %103 : vector<2x32xf32>
    %447 = arith.mulf %442, %446 : vector<2x32xf32>
    %448 = arith.addf %444, %447 : vector<2x32xf32>
    %449 = math.tanh %448 : vector<2x32xf32>
    %cst_118 = arith.constant 1.000000e+00 : f32
    %450 = vector.broadcast %cst_118 : f32 to vector<2x32xf32>
    %451 = arith.subf %450, %443 : vector<2x32xf32>
    %452 = arith.mulf %451, %449 : vector<2x32xf32>
    %453 = arith.mulf %443, %429 : vector<2x32xf32>
    %454 = arith.addf %452, %453 : vector<2x32xf32>
    %455 = vector.extract_strided_slice %99 {offsets = [28, 0], sizes = [2, 96], strides = [1, 1]} : vector<32x96xf32> to vector<2x96xf32>
    %cst_119 = arith.constant dense<0.000000e+00> : vector<2x96xf32>
    %456 = tpu.matmul %454, %100, %cst_119 {dimension_numbers = #tpu.dot_dimension_numbers<[1], [0], [0], [1], [0, 0, 1, 1], [], []>} : vector<2x32xf32>, vector<32x96xf32>, vector<2x96xf32> -> vector<2x96xf32>
    %457 = vector.extract_strided_slice %455 {offsets = [0, 0], sizes = [2, 64], strides = [1, 1]} : vector<2x96xf32> to vector<2x64xf32>
    %458 = vector.extract_strided_slice %456 {offsets = [0, 0], sizes = [2, 64], strides = [1, 1]} : vector<2x96xf32> to vector<2x64xf32>
    %459 = arith.addf %457, %458 : vector<2x64xf32>
    %cst_120 = arith.constant 0.000000e+00 : f32
    %460 = vector.broadcast %cst_120 : f32 to vector<2x64xf32>
    %461 = arith.subf %460, %459 : vector<2x64xf32>
    %462 = math.exp %461 : vector<2x64xf32>
    %cst_121 = arith.constant 1.000000e+00 : f32
    %463 = vector.broadcast %cst_121 : f32 to vector<2x64xf32>
    %464 = arith.addf %463, %462 : vector<2x64xf32>
    %cst_122 = arith.constant 1.000000e+00 : f32
    %465 = vector.broadcast %cst_122 : f32 to vector<2x64xf32>
    %466 = arith.divf %465, %464 : vector<2x64xf32>
    %467 = vector.extract_strided_slice %466 {offsets = [0, 0], sizes = [2, 32], strides = [1, 1]} : vector<2x64xf32> to vector<2x32xf32>
    %468 = vector.extract_strided_slice %466 {offsets = [0, 32], sizes = [2, 32], strides = [1, 1]} : vector<2x64xf32> to vector<2x32xf32>
    %469 = vector.extract_strided_slice %455 {offsets = [0, 64], sizes = [2, 32], strides = [1, 1]} : vector<2x96xf32> to vector<2x32xf32>
    %470 = vector.extract_strided_slice %456 {offsets = [0, 64], sizes = [2, 32], strides = [1, 1]} : vector<2x96xf32> to vector<2x32xf32>
    %471 = arith.addf %470, %103 : vector<2x32xf32>
    %472 = arith.mulf %467, %471 : vector<2x32xf32>
    %473 = arith.addf %469, %472 : vector<2x32xf32>
    %474 = math.tanh %473 : vector<2x32xf32>
    %cst_123 = arith.constant 1.000000e+00 : f32
    %475 = vector.broadcast %cst_123 : f32 to vector<2x32xf32>
    %476 = arith.subf %475, %468 : vector<2x32xf32>
    %477 = arith.mulf %476, %474 : vector<2x32xf32>
    %478 = arith.mulf %468, %454 : vector<2x32xf32>
    %479 = arith.addf %477, %478 : vector<2x32xf32>
    %480 = vector.extract_strided_slice %99 {offsets = [30, 0], sizes = [2, 96], strides = [1, 1]} : vector<32x96xf32> to vector<2x96xf32>
    %cst_124 = arith.constant dense<0.000000e+00> : vector<2x96xf32>
    %481 = tpu.matmul %479, %100, %cst_124 {dimension_numbers = #tpu.dot_dimension_numbers<[1], [0], [0], [1], [0, 0, 1, 1], [], []>} : vector<2x32xf32>, vector<32x96xf32>, vector<2x96xf32> -> vector<2x96xf32>
    %482 = vector.extract_strided_slice %480 {offsets = [0, 0], sizes = [2, 64], strides = [1, 1]} : vector<2x96xf32> to vector<2x64xf32>
    %483 = vector.extract_strided_slice %481 {offsets = [0, 0], sizes = [2, 64], strides = [1, 1]} : vector<2x96xf32> to vector<2x64xf32>
    %484 = arith.addf %482, %483 : vector<2x64xf32>
    %cst_125 = arith.constant 0.000000e+00 : f32
    %485 = vector.broadcast %cst_125 : f32 to vector<2x64xf32>
    %486 = arith.subf %485, %484 : vector<2x64xf32>
    %487 = math.exp %486 : vector<2x64xf32>
    %cst_126 = arith.constant 1.000000e+00 : f32
    %488 = vector.broadcast %cst_126 : f32 to vector<2x64xf32>
    %489 = arith.addf %488, %487 : vector<2x64xf32>
    %cst_127 = arith.constant 1.000000e+00 : f32
    %490 = vector.broadcast %cst_127 : f32 to vector<2x64xf32>
    %491 = arith.divf %490, %489 : vector<2x64xf32>
    %492 = vector.extract_strided_slice %491 {offsets = [0, 0], sizes = [2, 32], strides = [1, 1]} : vector<2x64xf32> to vector<2x32xf32>
    %493 = vector.extract_strided_slice %491 {offsets = [0, 32], sizes = [2, 32], strides = [1, 1]} : vector<2x64xf32> to vector<2x32xf32>
    %494 = vector.extract_strided_slice %480 {offsets = [0, 64], sizes = [2, 32], strides = [1, 1]} : vector<2x96xf32> to vector<2x32xf32>
    %495 = vector.extract_strided_slice %481 {offsets = [0, 64], sizes = [2, 32], strides = [1, 1]} : vector<2x96xf32> to vector<2x32xf32>
    %496 = arith.addf %495, %103 : vector<2x32xf32>
    %497 = arith.mulf %492, %496 : vector<2x32xf32>
    %498 = arith.addf %494, %497 : vector<2x32xf32>
    %499 = math.tanh %498 : vector<2x32xf32>
    %cst_128 = arith.constant 1.000000e+00 : f32
    %500 = vector.broadcast %cst_128 : f32 to vector<2x32xf32>
    %501 = arith.subf %500, %493 : vector<2x32xf32>
    %502 = arith.mulf %501, %499 : vector<2x32xf32>
    %503 = arith.mulf %493, %479 : vector<2x32xf32>
    %504 = arith.addf %502, %503 : vector<2x32xf32>
    %505 = tpu.concatenate %129, %154, %179, %204, %229, %254, %279, %304, %329, %354, %379, %404, %429, %454, %479, %504 in 0 : vector<2x32xf32>, vector<2x32xf32>, vector<2x32xf32>, vector<2x32xf32>, vector<2x32xf32>, vector<2x32xf32>, vector<2x32xf32>, vector<2x32xf32>, vector<2x32xf32>, vector<2x32xf32>, vector<2x32xf32>, vector<2x32xf32>, vector<2x32xf32>, vector<2x32xf32>, vector<2x32xf32>, vector<2x32xf32> -> vector<32x32xf32>
    %c0_129 = arith.constant 0 : index
    %c0_130 = arith.constant 0 : index
    %506 = vector.load %arg10[%c0_129, %c0_130] : memref<32x64xf32, #tpu.memory_space<vmem>>, vector<32x64xf32>
    %cst_131 = arith.constant dense<0.000000e+00> : vector<32x64xf32>
    %507 = tpu.matmul %505, %506, %cst_131 {dimension_numbers = #tpu.dot_dimension_numbers<[1], [0], [0], [1], [0, 0, 1, 1], [], []>} : vector<32x32xf32>, vector<32x64xf32>, vector<32x64xf32> -> vector<32x64xf32>
    %c0_132 = arith.constant 0 : index
    %c0_133 = arith.constant 0 : index
    %508 = vector.load %arg11[%c0_132, %c0_133] : memref<1x64xf32, #tpu.memory_space<vmem>>, vector<1x64xf32>
    %509 = vector.broadcast %508 : vector<1x64xf32> to vector<32x64xf32>
    %510 = arith.addf %507, %509 : vector<32x64xf32>
    %511 = vector.extract_strided_slice %510 {offsets = [0, 0], sizes = [32, 32], strides = [1, 1]} : vector<32x64xf32> to vector<32x32xf32>
    %512 = vector.extract_strided_slice %510 {offsets = [0, 32], sizes = [32, 32], strides = [1, 1]} : vector<32x64xf32> to vector<32x32xf32>
    %513 = math.tanh %512 : vector<32x32xf32>
    %c0_134 = arith.constant 0 : index
    %c0_135 = arith.constant 0 : index
    %514 = vector.load %arg12[%c0_134, %c0_135] : memref<1x32xf32, #tpu.memory_space<vmem>>, vector<1x32xf32>
    %515 = vector.broadcast %514 : vector<1x32xf32> to vector<32x32xf32>
    %516 = arith.mulf %513, %515 : vector<32x32xf32>
    %cst_136 = arith.constant dense<0.000000e+00> : vector<32xf32>
    %517 = vector.multi_reduction <add>, %516, %cst_136 [1] : vector<32x32xf32> to vector<32xf32>
    %518 = vector.shape_cast %517 : vector<32xf32> to vector<32x1xf32>
    %c0_137 = arith.constant 0 : index
    %c0_138 = arith.constant 0 : index
    %519 = vector.load %arg13[%c0_137, %c0_138] : memref<1x1xf32, #tpu.memory_space<vmem>>, vector<1x1xf32>
    %520 = vector.broadcast %519 : vector<1x1xf32> to vector<32x1xf32>
    %521 = arith.addf %518, %520 : vector<32x1xf32>
    %c0_i32_139 = arith.constant 0 : i32
    %522 = vector.broadcast %c0_i32_139 : i32 to vector<32x1xi32>
    %523 = arith.cmpi eq, %22, %522 : vector<32x1xi32>
    %cst_140 = arith.constant 0xFF800000 : f32
    %524 = vector.broadcast %cst_140 : f32 to vector<32x1xf32>
    %525 = arith.select %523, %521, %524 : vector<32x1xi1>, vector<32x1xf32>
    %cst_141 = arith.constant dense<0xFF800000> : vector<1xf32>
    %526 = vector.multi_reduction <maximumf>, %525, %cst_141 [0] : vector<32x1xf32> to vector<1xf32>
    %527 = vector.shape_cast %526 : vector<1xf32> to vector<1x1xf32>
    %528 = vector.broadcast %527 : vector<1x1xf32> to vector<32x1xf32>
    %529 = arith.subf %521, %528 : vector<32x1xf32>
    %530 = math.exp %529 : vector<32x1xf32>
    %cst_142 = arith.constant 0.000000e+00 : f32
    %531 = vector.broadcast %cst_142 : f32 to vector<32x1xf32>
    %532 = arith.select %523, %530, %531 : vector<32x1xi1>, vector<32x1xf32>
    %cst_143 = arith.constant dense<0.000000e+00> : vector<1xf32>
    %533 = vector.multi_reduction <add>, %532, %cst_143 [0] : vector<32x1xf32> to vector<1xf32>
    %534 = vector.shape_cast %533 : vector<1xf32> to vector<1x1xf32>
    %535 = vector.broadcast %532 : vector<32x1xf32> to vector<32x32xf32>
    %536 = arith.mulf %535, %511 : vector<32x32xf32>
    %cst_144 = arith.constant dense<0.000000e+00> : vector<32xf32>
    %537 = vector.multi_reduction <add>, %536, %cst_144 [0] : vector<32x32xf32> to vector<32xf32>
    %538 = vector.shape_cast %537 : vector<32xf32> to vector<1x32xf32>
    %539 = vector.broadcast %534 : vector<1x1xf32> to vector<1x32xf32>
    %540 = arith.divf %538, %539 : vector<1x32xf32>
    %c1_i32_145 = arith.constant 1 : i32
    %541 = vector.broadcast %c1_i32_145 : i32 to vector<32x1xi32>
    %542 = arith.cmpi eq, %22, %541 : vector<32x1xi32>
    %cst_146 = arith.constant 0xFF800000 : f32
    %543 = vector.broadcast %cst_146 : f32 to vector<32x1xf32>
    %544 = arith.select %542, %521, %543 : vector<32x1xi1>, vector<32x1xf32>
    %cst_147 = arith.constant dense<0xFF800000> : vector<1xf32>
    %545 = vector.multi_reduction <maximumf>, %544, %cst_147 [0] : vector<32x1xf32> to vector<1xf32>
    %546 = vector.shape_cast %545 : vector<1xf32> to vector<1x1xf32>
    %547 = vector.broadcast %546 : vector<1x1xf32> to vector<32x1xf32>
    %548 = arith.subf %521, %547 : vector<32x1xf32>
    %549 = math.exp %548 : vector<32x1xf32>
    %cst_148 = arith.constant 0.000000e+00 : f32
    %550 = vector.broadcast %cst_148 : f32 to vector<32x1xf32>
    %551 = arith.select %542, %549, %550 : vector<32x1xi1>, vector<32x1xf32>
    %cst_149 = arith.constant dense<0.000000e+00> : vector<1xf32>
    %552 = vector.multi_reduction <add>, %551, %cst_149 [0] : vector<32x1xf32> to vector<1xf32>
    %553 = vector.shape_cast %552 : vector<1xf32> to vector<1x1xf32>
    %554 = vector.broadcast %551 : vector<32x1xf32> to vector<32x32xf32>
    %555 = arith.mulf %554, %511 : vector<32x32xf32>
    %cst_150 = arith.constant dense<0.000000e+00> : vector<32xf32>
    %556 = vector.multi_reduction <add>, %555, %cst_150 [0] : vector<32x32xf32> to vector<32xf32>
    %557 = vector.shape_cast %556 : vector<32xf32> to vector<1x32xf32>
    %558 = vector.broadcast %553 : vector<1x1xf32> to vector<1x32xf32>
    %559 = arith.divf %557, %558 : vector<1x32xf32>
    %560 = tpu.concatenate %540, %559 in 0 : vector<1x32xf32>, vector<1x32xf32> -> vector<2x32xf32>
    %c0_151 = arith.constant 0 : index
    %c0_152 = arith.constant 0 : index
    %561 = vector.load %arg14[%c0_151, %c0_152] : memref<32x10xf32, #tpu.memory_space<vmem>>, vector<32x10xf32>
    %cst_153 = arith.constant dense<0.000000e+00> : vector<2x10xf32>
    %562 = tpu.matmul %560, %561, %cst_153 {dimension_numbers = #tpu.dot_dimension_numbers<[1], [0], [0], [1], [0, 0, 1, 1], [], []>} : vector<2x32xf32>, vector<32x10xf32>, vector<2x10xf32> -> vector<2x10xf32>
    %c0_154 = arith.constant 0 : index
    %c0_155 = arith.constant 0 : index
    %563 = vector.load %arg15[%c0_154, %c0_155] : memref<1x10xf32, #tpu.memory_space<vmem>>, vector<1x10xf32>
    %564 = vector.broadcast %563 : vector<1x10xf32> to vector<2x10xf32>
    %565 = arith.addf %562, %564 : vector<2x10xf32>
    %c0_156 = arith.constant 0 : index
    %c0_157 = arith.constant 0 : index
    %566 = vector.load %arg16[%c0_156, %c0_157] : memref<2x10xf32, #tpu.memory_space<vmem>>, vector<2x10xf32>
    tpu.vector_store %arg16[%c0_156, %c0_157], %565 {strides = array<i32>} : memref<2x10xf32, #tpu.memory_space<vmem>>, vector<2x10xf32>,
    return
  }
  func.func @transform_0(%arg0: i32) -> (i32, i32) {
    %c0_i32 = arith.constant 0 : i32
    %c0_i32_0 = arith.constant 0 : i32
    %c0_i32_1 = arith.constant 0 : i32
    return %c0_i32, %c0_i32_0 : i32, i32
  }
  func.func @transform_1(%arg0: i32) -> (i32, i32) {
    %c0_i32 = arith.constant 0 : i32
    %c0_i32_0 = arith.constant 0 : i32
    %c0_i32_1 = arith.constant 0 : i32
    return %c0_i32, %c0_i32_0 : i32, i32
  }
  func.func @transform_2(%arg0: i32) -> (i32, i32) {
    %c0_i32 = arith.constant 0 : i32
    %c0_i32_0 = arith.constant 0 : i32
    %c0_i32_1 = arith.constant 0 : i32
    return %c0_i32, %c0_i32_0 : i32, i32
  }
  func.func @transform_3(%arg0: i32) -> (i32, i32) {
    %c0_i32 = arith.constant 0 : i32
    %c0_i32_0 = arith.constant 0 : i32
    %c0_i32_1 = arith.constant 0 : i32
    return %c0_i32, %c0_i32_0 : i32, i32
  }
  func.func @transform_4(%arg0: i32) -> (i32, i32) {
    %c0_i32 = arith.constant 0 : i32
    %c0_i32_0 = arith.constant 0 : i32
    %c0_i32_1 = arith.constant 0 : i32
    return %c0_i32, %c0_i32_0 : i32, i32
  }
  func.func @transform_5(%arg0: i32) -> (i32, i32) {
    %c0_i32 = arith.constant 0 : i32
    %c0_i32_0 = arith.constant 0 : i32
    %c0_i32_1 = arith.constant 0 : i32
    return %c0_i32, %c0_i32_0 : i32, i32
  }
  func.func @transform_6(%arg0: i32) -> (i32, i32) {
    %c0_i32 = arith.constant 0 : i32
    %c0_i32_0 = arith.constant 0 : i32
    %c0_i32_1 = arith.constant 0 : i32
    return %c0_i32, %c0_i32_0 : i32, i32
  }
  func.func @transform_7(%arg0: i32) -> (i32, i32) {
    %c0_i32 = arith.constant 0 : i32
    %c0_i32_0 = arith.constant 0 : i32
    %c0_i32_1 = arith.constant 0 : i32
    return %c0_i32, %c0_i32_0 : i32, i32
  }
  func.func @transform_8(%arg0: i32) -> (i32, i32) {
    %c0_i32 = arith.constant 0 : i32
    %c0_i32_0 = arith.constant 0 : i32
    %c0_i32_1 = arith.constant 0 : i32
    return %c0_i32, %c0_i32_0 : i32, i32
  }
  func.func @transform_9(%arg0: i32) -> (i32, i32) {
    %c0_i32 = arith.constant 0 : i32
    %c0_i32_0 = arith.constant 0 : i32
    %c0_i32_1 = arith.constant 0 : i32
    return %c0_i32, %c0_i32_0 : i32, i32
  }
  func.func @transform_10(%arg0: i32) -> (i32, i32) {
    %c0_i32 = arith.constant 0 : i32
    %c0_i32_0 = arith.constant 0 : i32
    %c0_i32_1 = arith.constant 0 : i32
    return %c0_i32, %c0_i32_0 : i32, i32
  }
  func.func @transform_11(%arg0: i32) -> (i32, i32) {
    %c0_i32 = arith.constant 0 : i32
    %c0_i32_0 = arith.constant 0 : i32
    %c0_i32_1 = arith.constant 0 : i32
    return %c0_i32, %c0_i32_0 : i32, i32
  }
  func.func @transform_12(%arg0: i32) -> (i32, i32) {
    %c0_i32 = arith.constant 0 : i32
    %c0_i32_0 = arith.constant 0 : i32
    %c0_i32_1 = arith.constant 0 : i32
    return %c0_i32, %c0_i32_0 : i32, i32
  }
  func.func @transform_13(%arg0: i32) -> (i32, i32) {
    %c0_i32 = arith.constant 0 : i32
    %c0_i32_0 = arith.constant 0 : i32
    %c0_i32_1 = arith.constant 0 : i32
    return %c0_i32, %c0_i32_0 : i32, i32
  }
  func.func @transform_14(%arg0: i32) -> (i32, i32) {
    %c0_i32 = arith.constant 0 : i32
    %c0_i32_0 = arith.constant 0 : i32
    %c0_i32_1 = arith.constant 0 : i32
    return %c0_i32, %c0_i32_0 : i32, i32
  }
  func.func @transform_15(%arg0: i32) -> (i32, i32) {
    %c0_i32 = arith.constant 0 : i32
    %c0_i32_0 = arith.constant 0 : i32
    %c0_i32_1 = arith.constant 0 : i32
    return %c0_i32, %c0_i32_0 : i32, i32
  }
}

</mosaic_0001>

<bundles_post_ra>
// kernel: tpu_custom_call.1
= control target key start
LH: loop header
LB: loop body
LE: loop exit
PB: predicated region body
PF: predicated region fallthrough
CT: control target
= control target key end

     0   :  { %s4985_s0 = inlined_call_operand.hbm [shape: f32[32,256], index: 0, kind: input, shape index: {}]   ;;  %s4986_s1 = inlined_call_operand.vmem [shape: f32[256,256], index: 1, kind: input, shape index: {}]   ;;  %s4987_s2 = inlined_call_operand.vmem [shape: f32[256,64], index: 2, kind: input, shape index: {}]   ;;  %s4988_s3 = inlined_call_operand.vmem [shape: f32[64,32], index: 3, kind: input, shape index: {}]   ;;  %s4989_s4 = inlined_call_operand.vmem [shape: f32[1,32], index: 4, kind: input, shape index: {}]   ;;  %s4990_s5 = inlined_call_operand.vmem [shape: f32[32,96], index: 5, kind: input, shape index: {}]   ;;  %s4991_s6 = inlined_call_operand.vmem [shape: f32[1,96], index: 6, kind: input, shape index: {}]   ;;  %s4992_s7 = inlined_call_operand.hbm [shape: f32[32,96], index: 7, kind: input, shape index: {}]   ;;  %s4993_s8 = inlined_call_operand.hbm [shape: f32[1,32], index: 8, kind: input, shape index: {}]   ;;  %s4994_s9 = inlined_call_operand.hbm [shape: f32[32,64], index: 9, kind: input, shape index: {}]   ;;  %s4995_s10 = inlined_call_operand.vmem [shape: f32[1,64], index: 10, kind: input, shape index: {}]   ;;  %s4996_s11 = inlined_call_operand.vmem [shape: f32[1,32], index: 11, kind: input, shape index: {}]   ;;  %s4997_s12 = inlined_call_operand.<no memory space> [shape: f32[1,1], index: 12, kind: input, shape index: {}]   ;;  %s4998_s13 = inlined_call_operand.vmem [shape: f32[32,10], index: 13, kind: input, shape index: {}]   ;;  %s4999_s14 = inlined_call_operand.vmem [shape: f32[1,10], index: 14, kind: input, shape index: {}]   ;;  %s5000_s15 = inlined_call_operand.hbm [shape: f32[2,10], index: 15, kind: output, shape index: {}]  }
   0x1   :  { %v20_v0 = vstv %s4997_s12 }
   0x2   :  { %21 = vst [vmem:[#allocation2] sm:$0x1] %v20_v0 }
   0x3   :  { %22 = vsyncpa [#allocation4], 0 }
   0x4   :  { %23 = vsyncpa [#allocation7], 0 }
   0x5   :  { %24 = vsyncpa [#allocation10], 0 }
   0x6   :  { %25 = vsyncpa [#allocation5], 0  ;;  %s3938_s20 = smov [#allocation6]   ;;  %s3820_s24 = scalar_lea.hbm %s4992_s7, 512 }
   0x7   :  { %s55_s21 = sshll.u32 %s3938_s20, 4  ;;  %p3821_p0 = scmp.ne.s32.totalorder %s4992_s7, %s3820_s24  ;;  %s56_s21 = int_to_ptr.vmem [resolvable:$true] %s55_s21 }
   0x8   :  { %p3824_p1 = scmp.lt.u32.totalorder %s3820_s24, %s4992_s7 }
   0xa   :  { %p3826_p2 = pnand %p3824_p1, %p3821_p0 }
   0xc   :  { %3829 = shalt.err (!%p3826_p2)
}
   0xd   :  { %s3830_s12 = scalar_lea.vmem %s56_s21, 512  ;;  %p3835_p4 = scmp.lt.s32.totalorder %s56_s21, %s56_s21 }
   0xe   :  { %p3831_p3 = scmp.ne.s32.totalorder %s56_s21, %s3830_s12  ;;  %p3836_p5 = scmp.lt.s32.totalorder %s3830_s12, %s3830_s12 }
  0x10   :  { %p3837_p6 = por %p3836_p5, %p3835_p4 }
  0x12   :  { %p3838_p7 = pnand %p3837_p6, %p3831_p3 }
  0x14   :  { %3841 = shalt.err (!%p3838_p7)
}
  0x15   :  { %s5001_s29 = smov 128   ;;  %s3940_s30 = smov 8  }
  0x16   :  { %61 = dma.hbm_to_vmem [thread:$0]  %s4992_s7, 512, %s56_s21, [#allocation7], %s5001_s29, %s5001_s29, %s3940_s30  }
  0x17   :  { %s3941_s18 = smov [#allocation3]   ;;  %s3842_s23 = scalar_lea.hbm %s4985_s0, 1024 }
  0x18   :  { %s31_s19 = sshll.u32 %s3941_s18, 4  ;;  %p3843_p8 = scmp.ne.s32.totalorder %s4985_s0, %s3842_s23  ;;  %s32_s19 = int_to_ptr.vmem [resolvable:$true] %s31_s19 }
  0x19   :  { %p3846_p9 = scmp.lt.u32.totalorder %s3842_s23, %s4985_s0 }
  0x1b   :  { %p3848_p10 = pnand %p3846_p9, %p3843_p8 }
  0x1d   :  { %3851 = shalt.err (!%p3848_p10)
}
  0x1e   :  { %s3852_s28 = scalar_lea.vmem %s32_s19, 1024  ;;  %p3857_p12 = scmp.lt.s32.totalorder %s32_s19, %s32_s19 }
  0x1f   :  { %p3853_p11 = scmp.ne.s32.totalorder %s32_s19, %s3852_s28  ;;  %p3858_p13 = scmp.lt.s32.totalorder %s3852_s28, %s3852_s28 }
  0x21   :  { %p3859_p0 = por %p3858_p13, %p3857_p12 }
  0x23   :  { %p3860_p1 = pnand %p3859_p0, %p3853_p11 }
  0x25   :  { %3863 = shalt.err (!%p3860_p1)
}
  0x26   :  { %s3942_s7 = smov 256   ;;  %s3943_s21 = smov 16  }
  0x27   :  { %37 = dma.hbm_to_vmem [thread:$0]  %s4985_s0, 1024, %s32_s19, [#allocation4], %s3942_s7, %s3942_s7, %s3943_s21  }
  0x28   :  { %s3944_s17 = smov [#allocation8]   ;;  %s3945_s20 = smov [#allocation9]  }
  0x29   :  { %s68_s18 = sshll.u32 %s3944_s17, 4  ;;  %s77_s22 = sshll.u32 %s3945_s20, 4  ;;  %s69_s18 = int_to_ptr.vmem [resolvable:$true] %s68_s18  ;;  %s4064_s22 = int_to_ptr.vmem [resolvable:$true] %s77_s22 }
  0x2a   :  { %s3864_s25 = scalar_lea.hbm %s4993_s8, 16 }
  0x2b   :  { %p3865_p2 = scmp.ne.s32.totalorder %s4993_s8, %s3864_s25  ;;  %p3868_p3 = scmp.lt.u32.totalorder %s3864_s25, %s4993_s8 }
  0x2d   :  { %p3870_p4 = pnand %p3868_p3, %p3865_p2 }
  0x2f   :  { %3873 = shalt.err (!%p3870_p4)
}
  0x30   :  { %s3874_s0 = scalar_lea.vmem %s69_s18, 16  ;;  %s3878_s19 = scalar_lea.vmem %s69_s18, 32 }
  0x31   :  { %p3875_p5 = scmp.ne.s32.totalorder %s69_s18, %s3874_s0  ;;  %p3879_p6 = scmp.lt.s32.totalorder %s69_s18, %s69_s18 }
  0x32   :  { %p3880_p7 = scmp.lt.s32.totalorder %s3878_s19, %s3874_s0 }
  0x34   :  { %p3881_p8 = por %p3880_p7, %p3879_p6 }
  0x36   :  { %p3882_p9 = pnand %p3881_p8, %p3875_p5 }
  0x38   :  { %3885 = shalt.err (!%p3882_p9)
}
  0x39   :  { %71 = dma.hbm_to_vmem [thread:$0]  %s4993_s8, 16, %s69_s18, [#allocation7]  }
  0x3a   :  { %s3886_s17 = scalar_lea.hbm %s4994_s9, 512 }
  0x3b   :  { %p3887_p10 = scmp.ne.s32.totalorder %s4994_s9, %s3886_s17  ;;  %p3890_p11 = scmp.lt.u32.totalorder %s3886_s17, %s4994_s9 }
  0x3d   :  { %p3892_p12 = pnand %p3890_p11, %p3887_p10 }
  0x3f   :  { %3895 = shalt.err (!%p3892_p12)
}
  0x40   :  { %s3896_s25 = scalar_lea.vmem %s4064_s22, 512  ;;  %p3901_p0 = scmp.lt.s32.totalorder %s4064_s22, %s4064_s22 }
  0x41   :  { %p3897_p13 = scmp.ne.s32.totalorder %s4064_s22, %s3896_s25  ;;  %p3902_p1 = scmp.lt.s32.totalorder %s3896_s25, %s3896_s25 }
  0x43   :  { %p3903_p2 = por %p3902_p1, %p3901_p0 }
  0x45   :  { %p3904_p3 = pnand %p3903_p2, %p3897_p13 }
  0x47   :  { %3907 = shalt.err (!%p3904_p3)
}
  0x48   :  { %s5002_s8 = smov 128  }
  0x49   :  { %83 = dma.hbm_to_vmem [thread:$0]  %s4994_s9, 512, %s4064_s22, [#allocation10], %s5002_s8, %s5002_s8, %s3940_s30  }
  0x4a   :  { %3930 = dma.done.wait [#allocation4], 1024  }
  0x4b   :  { %3931 = vsyncadd [#allocation4], 4294966272 }
  0x4c   :  { %3932 = dma.done.wait [#allocation7], 528  }
  0x4d   :  { %3933 = vsyncadd [#allocation7], 4294966768 }
  0x4e   :  { %3934 = dma.done.wait [#allocation10], 512  }
  0x4f   :  { %3935 = vsyncadd [#allocation10], 4294966784  ;;  %v115_v1 = vld [vmem:[%s4986_s1 + $0x8] sm:$0xff]  ;;  %v117_v2 = vld [vmem:[%s4986_s1 + $0x18] sm:$0xff]  ;;  %vm445_vm0 = vcmask 523264   ;;  %vm3947_vm13 = vmmov 0  }
  0x50   :  { %v114_v3 = vld [vmem:[%s4986_s1] sm:$0xff]  ;;  %v3440_v4 = vpack.c.bf16 %v117_v2, %v115_v1  ;;  %v116_v5 = vld [vmem:[%s4986_s1 + $0x10] sm:$0xff]  ;;  %v119_v6 = vld [vmem:[%s4986_s1 + $0x28] sm:$0xff]  ;;  %vm711_vm14 = vcmask 261120   ;;  %vm2538_vm15 = vcmask 1041408   ;;  %s3951_s25 = smov 32  }
  0x51   :  { %v121_v7 = vld [vmem:[%s4986_s1 + $0x38] sm:$0xff]  ;;  %v3442_v8 = vpack.c.bf16 %v116_v5, %v114_v3  ;;  %v118_v10 = vld [vmem:[%s4986_s1 + $0x20] sm:$0xff]  ;;  %v120_v11 = vld [vmem:[%s4986_s1 + $0x30] sm:$0xff]  ;;  %s3953_s21 = smov [#allocation11]  }
  0x52   :  { %v3444_v9 = vpack.c.bf16 %v121_v7, %v119_v6  ;;  %v123_v12 = vld [vmem:[%s4986_s1 + $0x48] sm:$0xff]  ;;  %3441 = vmatprep.subr.bf16.mxu0 %v3440_v4  ;;  %v125_v13 = vld [vmem:[%s4986_s1 + $0x58] sm:$0xff]  ;;  %v3446_v14 = vpack.c.bf16 %v120_v11, %v118_v10  ;;  %v122_v16 = vld [vmem:[%s4986_s1 + $0x40] sm:$0xff]  ;;  %s3000_s9 = sshll.u32 %s3953_s21, 4  ;;  %s3001_s9 = int_to_ptr.vmem [resolvable:$true] %s3000_s9 }
  0x53   :  { %3443 = vmatpush1.bf16.msra.mxu0 %v3442_v8  ;;  %v3448_v15 = vpack.c.bf16 %v125_v13, %v123_v12  ;;  %v124_v17 = vld [vmem:[%s4986_s1 + $0x50] sm:$0xff]  ;;  %v127_v18 = vld [vmem:[%s4986_s1 + $0x68] sm:$0xff]  ;;  %v129_v19 = vld [vmem:[%s4986_s1 + $0x78] sm:$0xff]  ;;  %s3908_s30 = scalar_lea.vmem %s3001_s9, 32  ;;  %p3913_p5 = scmp.lt.s32.totalorder %s3001_s9, %s3001_s9 }
  0x54   :  { %3445 = vmatprep.subr.bf16.mxu0 %v3444_v9  ;;  %v3450_v20 = vpack.c.bf16 %v124_v17, %v122_v16  ;;  %v3452_v21 = vpack.c.bf16 %v129_v19, %v127_v18  ;;  %v126_v22 = vld [vmem:[%s4986_s1 + $0x60] sm:$0xff]  ;;  %v128_v23 = vld [vmem:[%s4986_s1 + $0x70] sm:$0xff]  ;;  %v131_v24 = vld [vmem:[%s4986_s1 + $0x88] sm:$0xff]  ;;  %p3909_p4 = scmp.ne.s32.totalorder %s3001_s9, %s3908_s30  ;;  %p3914_p6 = scmp.lt.s32.totalorder %s3908_s30, %s3908_s30 }
  0x55   :  { %v133_v25 = vld [vmem:[%s4986_s1 + $0x98] sm:$0xff]  ;;  %v3454_v26 = vpack.c.bf16 %v128_v23, %v126_v22  ;;  %v130_v28 = vld [vmem:[%s4986_s1 + $0x80] sm:$0xff]  ;;  %v132_v29 = vld [vmem:[%s4986_s1 + $0x90] sm:$0xff] }
  0x56   :  { %v3456_v27 = vpack.c.bf16 %v133_v25, %v131_v24  ;;  %v135_v30 = vld [vmem:[%s4986_s1 + $0xa8] sm:$0xff]  ;;  %v137_v31 = vld [vmem:[%s4986_s1 + $0xb8] sm:$0xff]  ;;  %v3458_v32 = vpack.c.bf16 %v132_v29, %v130_v28  ;;  %v134_v34 = vld [vmem:[%s4986_s1 + $0xa0] sm:$0xff]  ;;  %p3915_p7 = por %p3914_p6, %p3913_p5 }
  0x57   :  { %3447 = vmatpush1.bf16.msra.mxu0 %v3446_v14  ;;  %v3460_v33 = vpack.c.bf16 %v137_v31, %v135_v30  ;;  %v136_v35 = vld [vmem:[%s4986_s1 + $0xb0] sm:$0xff]  ;;  %v139_v36 = vld [vmem:[%s4986_s1 + $0xc8] sm:$0xff]  ;;  %v141_v37 = vld [vmem:[%s4986_s1 + $0xd8] sm:$0xff] }
  0x58   :  { %3449 = vmatprep.subr.bf16.mxu0 %v3448_v15  ;;  %v3462_v38 = vpack.c.bf16 %v136_v35, %v134_v34  ;;  %v3464_v39 = vpack.c.bf16 %v141_v37, %v139_v36  ;;  %v138_v40 = vld [vmem:[%s4986_s1 + $0xc0] sm:$0xff]  ;;  %v140_v41 = vld [vmem:[%s4986_s1 + $0xd0] sm:$0xff]  ;;  %v143_v43 = vld [vmem:[%s4986_s1 + $0xe8] sm:$0xff]  ;;  %p3916_p8 = pnand %p3915_p7, %p3909_p4 }
  0x59   :  { %v107_v42 = vld [vmem:[#allocation3 + $0x8] sm:$0xff]  ;;  %v145_v44 = vld [vmem:[%s4986_s1 + $0xf8] sm:$0xff]  ;;  %v142_v45 = vld [vmem:[%s4986_s1 + $0xe0] sm:$0xff]  ;;  %v3466_v47 = vpack.c.bf16 %v140_v41, %v138_v40 }
  0x5a   :  { %242 = vmatprep.mubr.f32.mxu0 %v107_v42  ;;  %v144_v46 = vld [vmem:[%s4986_s1 + $0xf0] sm:$0xff]  ;;  %v147_v48 = vld [vmem:[%s4986_s1 + $0x108] sm:$0xff]  ;;  %v149_v49 = vld [vmem:[%s4986_s1 + $0x118] sm:$0xff]  ;;  %v3468_v53 = vpack.c.bf16 %v145_v44, %v143_v43 }
  0x5b   :  { %3451 = vmatpush1.bf16.msra.mxu0 %v3450_v20  ;;  %v291_v50 = vld [vmem:[%s4987_s2 + $0x80] sm:$0xff]  ;;  %v292_v51 = vld [vmem:[%s4987_s2 + $0x88] sm:$0xff]  ;;  %v293_v56 = vld [vmem:[%s4987_s2 + $0x90] sm:$0xff]  ;;  %v3470_v0 = vpack.c.bf16 %v144_v46, %v142_v45  ;;  %v3472_v4 = vpack.c.bf16 %v149_v49, %v147_v48 }
  0x5c   :  { %3453 = vmatprep.subr.bf16.mxu0 %v3452_v21  ;;  %v275_v52 = vld [vmem:[%s4987_s2] sm:$0xff]  ;;  %v3504_v54 = vpack.c.bf16 %v292_v51, %v291_v50  ;;  %v276_v55 = vld [vmem:[%s4987_s2 + $0x8] sm:$0xff]  ;;  %v294_v57 = vld [vmem:[%s4987_s2 + $0x98] sm:$0xff] }
  0x5d   :  { %v3506_v58 = vpack.c.bf16 %v276_v55, %v275_v52  ;;  %v3508_v59 = vpack.c.bf16 %v294_v57, %v293_v56  ;;  %v277_v60 = vld [vmem:[%s4987_s2 + $0x10] sm:$0xff]  ;;  %v278_v61 = vld [vmem:[%s4987_s2 + $0x18] sm:$0xff]  ;;  %v295_v62 = vld [vmem:[%s4987_s2 + $0xa0] sm:$0xff] }
  0x5e   :  { %3505 = vmatprep.subr.bf16.mxu1 %v3504_v54  ;;  %v296_v63 = vld [vmem:[%s4987_s2 + $0xa8] sm:$0xff]  ;;  %v146_v1 = vld [vmem:[%s4986_s1 + $0x100] sm:$0xff]  ;;  %v148_v2 = vld [vmem:[%s4986_s1 + $0x110] sm:$0xff]  ;;  %v3510_v3 = vpack.c.bf16 %v278_v61, %v277_v60 }
  0x5f   :  { %3455 = vmatpush1.bf16.msra.mxu0 %v3454_v26  ;;  %3507 = vmatpush3.bf16.msra.mxu1 %v3506_v58  ;;  %v151_v5 = vld [vmem:[%s4986_s1 + $0x128] sm:$0xff]  ;;  %v3512_v6 = vpack.c.bf16 %v296_v63, %v295_v62  ;;  %v279_v7 = vld [vmem:[%s4987_s2 + $0x20] sm:$0xff]  ;;  %v153_v9 = vld [vmem:[%s4986_s1 + $0x138] sm:$0xff]  ;;  %v3474_v12 = vpack.c.bf16 %v148_v2, %v146_v1 }
  0x60   :  { %3457 = vmatprep.subr.bf16.mxu0 %v3456_v27  ;;  %3509 = vmatprep.subr.bf16.mxu1 %v3508_v59  ;;  %v280_v8 = vld [vmem:[%s4987_s2 + $0x28] sm:$0xff]  ;;  %v297_v10 = vld [vmem:[%s4987_s2 + $0xb0] sm:$0xff]  ;;  %v298_v11 = vld [vmem:[%s4987_s2 + $0xb8] sm:$0xff]  ;;  %v3476_v16 = vpack.c.bf16 %v153_v9, %v151_v5 }
  0x61   :  { %v150_v13 = vld [vmem:[%s4986_s1 + $0x120] sm:$0xff]  ;;  %v152_v14 = vld [vmem:[%s4986_s1 + $0x130] sm:$0xff]  ;;  %v3514_v15 = vpack.c.bf16 %v280_v8, %v279_v7  ;;  %v155_v17 = vld [vmem:[%s4986_s1 + $0x148] sm:$0xff]  ;;  %v3516_v18 = vpack.c.bf16 %v298_v11, %v297_v10 }
  0x62   :  { %v281_v19 = vld [vmem:[%s4987_s2 + $0x30] sm:$0xff]  ;;  %v282_v20 = vld [vmem:[%s4987_s2 + $0x38] sm:$0xff]  ;;  %v299_v22 = vld [vmem:[%s4987_s2 + $0xc0] sm:$0xff]  ;;  %v3478_v24 = vpack.c.bf16 %v152_v14, %v150_v13 }
  0x63   :  { %3459 = vmatpush1.bf16.msra.mxu0 %v3458_v32  ;;  %3511 = vmatpush3.bf16.msra.mxu1 %v3510_v3  ;;  %v157_v21 = vld [vmem:[%s4986_s1 + $0x158] sm:$0xff]  ;;  %v300_v23 = vld [vmem:[%s4987_s2 + $0xc8] sm:$0xff]  ;;  %v154_v25 = vld [vmem:[%s4986_s1 + $0x140] sm:$0xff]  ;;  %v3518_v27 = vpack.c.bf16 %v282_v20, %v281_v19 }
  0x64   :  { %3461 = vmatprep.subr.bf16.mxu0 %v3460_v33  ;;  %3513 = vmatprep.subr.bf16.mxu1 %v3512_v6  ;;  %v156_v26 = vld [vmem:[%s4986_s1 + $0x150] sm:$0xff]  ;;  %v3480_v28 = vpack.c.bf16 %v157_v21, %v155_v17  ;;  %v159_v29 = vld [vmem:[%s4986_s1 + $0x168] sm:$0xff]  ;;  %v3520_v30 = vpack.c.bf16 %v300_v23, %v299_v22  ;;  %v283_v31 = vld [vmem:[%s4987_s2 + $0x40] sm:$0xff] }
  0x65   :  { %v284_v32 = vld [vmem:[%s4987_s2 + $0x48] sm:$0xff]  ;;  %v161_v33 = vld [vmem:[%s4986_s1 + $0x178] sm:$0xff]  ;;  %v301_v34 = vld [vmem:[%s4987_s2 + $0xd0] sm:$0xff]  ;;  %v3482_v36 = vpack.c.bf16 %v156_v26, %v154_v25 }
  0x66   :  { %v302_v35 = vld [vmem:[%s4987_s2 + $0xd8] sm:$0xff]  ;;  %v158_v37 = vld [vmem:[%s4986_s1 + $0x160] sm:$0xff]  ;;  %v3484_v40 = vpack.c.bf16 %v161_v33, %v159_v29  ;;  %v163_v41 = vld [vmem:[%s4986_s1 + $0x188] sm:$0xff] }
  0x67   :  { %3463 = vmatpush1.bf16.msra.mxu0 %v3462_v38  ;;  %3515 = vmatpush3.bf16.msra.mxu1 %v3514_v15  ;;  %v160_v38 = vld [vmem:[%s4986_s1 + $0x170] sm:$0xff]  ;;  %v3524_v42 = vpack.c.bf16 %v302_v35, %v301_v34  ;;  %v286_v44 = vld [vmem:[%s4987_s2 + $0x58] sm:$0xff]  ;;  %v303_v46 = vld [vmem:[%s4987_s2 + $0xe0] sm:$0xff] }
  0x68   :  { %3465 = vmatprep.subr.bf16.mxu0 %v3464_v39  ;;  %3517 = vmatprep.subr.bf16.mxu1 %v3516_v18  ;;  %v3522_v39 = vpack.c.bf16 %v284_v32, %v283_v31  ;;  %v285_v43 = vld [vmem:[%s4987_s2 + $0x50] sm:$0xff]  ;;  %v165_v45 = vld [vmem:[%s4986_s1 + $0x198] sm:$0xff]  ;;  %v3486_v48 = vpack.c.bf16 %v160_v38, %v158_v37  ;;  %v162_v49 = vld [vmem:[%s4986_s1 + $0x180] sm:$0xff] }
  0x69   :  { %v3526_v50 = vpack.c.bf16 %v286_v44, %v285_v43  ;;  %v3488_v51 = vpack.c.bf16 %v165_v45, %v163_v41  ;;  %v164_v52 = vld [vmem:[%s4986_s1 + $0x190] sm:$0xff]  ;;  %v287_v54 = vld [vmem:[%s4987_s2 + $0x60] sm:$0xff]  ;;  %v288_v55 = vld [vmem:[%s4987_s2 + $0x68] sm:$0xff] }
  0x6a   :  { %v167_v56 = vld [vmem:[%s4986_s1 + $0x1a8] sm:$0xff]  ;;  %v169_v57 = vld [vmem:[%s4986_s1 + $0x1b8] sm:$0xff]  ;;  %v3490_v58 = vpack.c.bf16 %v164_v52, %v162_v49  ;;  %v3530_v59 = vpack.c.bf16 %v288_v55, %v287_v54  ;;  %v166_v61 = vld [vmem:[%s4986_s1 + $0x1a0] sm:$0xff] }
  0x6b   :  { %3467 = vmatpush1.bf16.msra.mxu0 %v3466_v47  ;;  %3519 = vmatpush3.bf16.msra.mxu1 %v3518_v27  ;;  %v304_v47 = vld [vmem:[%s4987_s2 + $0xe8] sm:$0xff]  ;;  %v3492_v60 = vpack.c.bf16 %v169_v57, %v167_v56  ;;  %v168_v62 = vld [vmem:[%s4986_s1 + $0x1b0] sm:$0xff]  ;;  %v170_v3 = vld [vmem:[%s4986_s1 + $0x1c0] sm:$0xff]  ;;  %v392_v57 = vlaneseq }
  0x6c   :  { %3469 = vmatprep.subr.bf16.mxu0 %v3468_v53  ;;  %3521 = vmatprep.subr.bf16.mxu1 %v3520_v30  ;;  %v3528_v53 = vpack.c.bf16 %v304_v47, %v303_v46  ;;  %v171_v63 = vld [vmem:[%s4986_s1 + $0x1c8] sm:$0xff]  ;;  %v3494_v1 = vpack.c.bf16 %v168_v62, %v166_v61  ;;  %v177_v6 = vld [vmem:[%s4986_s1 + $0x1f8] sm:$0xff]  ;;  %v174_v9 = vld [vmem:[%s4986_s1 + $0x1e0] sm:$0xff] }
  0x6d   :  { %v175_v5 = vld [vmem:[%s4986_s1 + $0x1e8] sm:$0xff]  ;;  %v176_v10 = vld [vmem:[%s4986_s1 + $0x1f0] sm:$0xff]  ;;  %v109_v13 = vld [vmem:[#allocation3 + $0x18] sm:$0xff] }
  0x6e   :  { %v3500_v8 = vpack.c.bf16 %v177_v6, %v175_v5  ;;  %v3502_v11 = vpack.c.bf16 %v176_v10, %v174_v9  ;;  %v108_v14 = vld [vmem:[#allocation3 + $0x10] sm:$0xff]  ;;  %v111_v15 = vld [vmem:[#allocation3 + $0x28] sm:$0xff]  ;;  %v113_v17 = vld [vmem:[#allocation3 + $0x38] sm:$0xff] }
  0x6f   :  { %3471 = vmatpush1.bf16.msra.mxu0 %v3470_v0  ;;  %3523 = vmatpush3.bf16.msra.mxu1 %v3522_v39  ;;  %v173_v0 = vld [vmem:[%s4986_s1 + $0x1d8] sm:$0xff]  ;;  %v305_v19 = vld [vmem:[%s4987_s2 + $0xf0] sm:$0xff] }
  0x70   :  { %3473 = vmatprep.subr.bf16.mxu0 %v3472_v4  ;;  %3525 = vmatprep.subr.bf16.mxu1 %v3524_v42  ;;  %v3496_v2 = vpack.c.bf16 %v173_v0, %v171_v63  ;;  %v172_v4 = vld [vmem:[%s4986_s1 + $0x1d0] sm:$0xff]  ;;  %v306_v20 = vld [vmem:[%s4987_s2 + $0xf8] sm:$0xff] }
  0x71   :  { %v3498_v7 = vpack.c.bf16 %v172_v4, %v170_v3  ;;  %v112_v18 = vld [vmem:[#allocation3 + $0x30] sm:$0xff]  ;;  %v3532_v21 = vpack.c.bf16 %v306_v20, %v305_v19 }
  0x72   :  { %v289_v22 = vld [vmem:[%s4987_s2 + $0x70] sm:$0xff]  ;;  %v290_v23 = vld [vmem:[%s4987_s2 + $0x78] sm:$0xff] }
  0x73   :  { %3475 = vmatpush1.bf16.msra.mxu0 %v3474_v12  ;;  %3527 = vmatpush3.bf16.msra.mxu1 %v3526_v50  ;;  %v106_v12 = vld [vmem:[#allocation3] sm:$0xff] }
  0x74   :  { %3477 = vmatprep.subr.bf16.mxu0 %v3476_v16  ;;  %3529 = vmatprep.subr.bf16.mxu1 %v3528_v53  ;;  %v110_v16 = vld [vmem:[#allocation3 + $0x20] sm:$0xff] }
  0x77   :  { %3479 = vmatpush1.bf16.msra.mxu0 %v3478_v24  ;;  %3531 = vmatpush3.bf16.msra.mxu1 %v3530_v59  ;;  %v3534_v24 = vpack.c.bf16 %v290_v23, %v289_v22 }
  0x78   :  { %3481 = vmatprep.subr.bf16.mxu0 %v3480_v28  ;;  %3533 = vmatprep.subr.bf16.mxu1 %v3532_v21 }
  0x7b   :  { %3483 = vmatpush1.bf16.msra.mxu0 %v3482_v36  ;;  %3535 = vmatpush3.bf16.msra.mxu1 %v3534_v24 }
  0x7c   :  { %3485 = vmatprep.subr.bf16.mxu0 %v3484_v40 }
  0x7f   :  { %3487 = vmatpush1.bf16.msra.mxu0 %v3486_v48 }
  0x80   :  { %3489 = vmatprep.subr.bf16.mxu0 %v3488_v51 }
  0x83   :  { %3491 = vmatpush1.bf16.msra.mxu0 %v3490_v58  ;;  %v393_v58 = vshrl.u32 %v392_v57, 7 }
  0x84   :  { %3493 = vmatprep.subr.bf16.mxu0 %v3492_v60 }
  0x85   :  { %v394_v59 = vadd.s32 8, %v393_v58  ;;  %v395_v60 = vadd.s32 16, %v393_v58  ;;  %v401_v63 = vand.u32 1, %v393_v58 }
  0x87   :  { %3495 = vmatpush1.bf16.msra.mxu0 %v3494_v1  ;;  %v408_v62 = vand.u32 1, %v394_v59  ;;  %v415_v0 = vand.u32 1, %v395_v60  ;;  %v396_v1 = vadd.s32 24, %v393_v58  ;;  %vm4407_vm3 = vcmp.eq.s32.totalorder %v401_v63, 0 }
  0x88   :  { %3497 = vmatprep.subr.bf16.mxu0 %v3496_v2  ;;  %vm4411_vm4 = vcmp.eq.s32.totalorder %v401_v63, 1  ;;  %v585_v63 = vld [vmem:[%s4988_s3 + $0x8] sm:$0xff] }
  0x89   :  { %vm4399_vm1 = vcmp.eq.s32.totalorder %v408_v62, 0  ;;  %vm4403_vm2 = vcmp.eq.s32.totalorder %v408_v62, 1  ;;  %vm4415_vm5 = vcmp.eq.s32.totalorder %v415_v0, 0  ;;  %vm4419_vm6 = vcmp.eq.s32.totalorder %v415_v0, 1  ;;  %v584_v62 = vld [vmem:[%s4988_s3] sm:$0xff] }
  0x8a   :  { %v422_v9 = vand.u32 1, %v396_v1  ;;  %v3536_v0 = vpack.c.bf16 %v585_v63, %v584_v62  ;;  %v586_v1 = vld [vmem:[%s4988_s3 + $0x10] sm:$0xff] }
  0x8b   :  { %3499 = vmatpush1.bf16.msra.mxu0 %v3498_v7 }
  0x8c   :  { %3501 = vmatprep.subr.bf16.mxu0 %v3500_v8  ;;  %vm4435_vm7 = vcmp.eq.s32.totalorder %v422_v9, 0  ;;  %vm4439_vm8 = vcmp.eq.s32.totalorder %v422_v9, 1  ;;  %3537 = vmatprep.subr.bf16.mxu1 %v3536_v0  ;;  %v588_v9 = vld [vmem:[%s4988_s3 + $0x20] sm:$0xff] }
  0x8f   :  { %3503 = vmatpush1.bf16.msra.mxu0 %v3502_v11 }
  0x92   :  { %243 = vmatmul.mubr.f32.vlgmr.msra.gmra.mrb[0].mxu0 %v106_v12 }
  0x93   :  { %248 = vmatprep.mubr.f32.mxu0 %v109_v13 }
  0x96   :  { %249 = vmatmul.mubr.f32.gmra.mrb[2].mxu0 %v108_v14 }
  0x97   :  { %254 = vmatprep.mubr.f32.mxu0 %v111_v15 }
  0x9a   :  { %255 = vmatmul.mubr.f32.gmra.mrb[4].mxu0 %v110_v16 }
  0x9b   :  { %260 = vmatprep.mubr.f32.mxu0 %v113_v17 }
  0x9e   :  { %261 = vmatmul.mubr.f32.gmra.mrb[6].mxu0 %v112_v18 }
 0x165   :  { %v244_v25 = vpop.f32.mrb[0].mxu0 }
 0x166   :  { %v246_v26 = vpop.f32.mrb[1].mxu0  ;;  %v267_v28 = vmul.f32 %v244_v25, %v244_v25 }
 0x167   :  { %v268_v27 = vmul.f32 %v246_v26, %v246_v26 }
 0x169   :  { %v250_v29 = vpop.f32.mrb[2].mxu0  ;;  %371 = vmatprep.mubr.f32.mxu1 %v268_v27 }
 0x16a   :  { %v252_v30 = vpop.f32.mrb[3].mxu0  ;;  %372 = vmatmul.mubr.f32.vlgmr.msra.gmra.mrb[0].mxu1 %v267_v28  ;;  %v269_v32 = vmul.f32 %v250_v29, %v250_v29 }
 0x16b   :  { %v270_v31 = vmul.f32 %v252_v30, %v252_v30  ;;  %3539 = vmatpush3.bf16.msra.mxu1 %v3536_v0 }
 0x16d   :  { %v256_v33 = vpop.f32.mrb[4].mxu0  ;;  %376 = vmatprep.mubr.f32.mxu1 %v270_v31 }
 0x16e   :  { %v258_v34 = vpop.f32.mrb[5].mxu0  ;;  %377 = vmatmul.mubr.f32.gmra.mrb[2].mxu1 %v269_v32  ;;  %v271_v36 = vmul.f32 %v256_v33, %v256_v33 }
 0x16f   :  { %v272_v35 = vmul.f32 %v258_v34, %v258_v34 }
 0x171   :  { %v262_v37 = vpop.f32.mrb[6].mxu0  ;;  %381 = vmatprep.mubr.f32.mxu1 %v272_v35 }
 0x172   :  { %v264_v38 = vpop.f32.mrb[7].mxu0  ;;  %382 = vmatmul.mubr.f32.gmra.mrb[4].mxu1 %v271_v36  ;;  %v273_v40 = vmul.f32 %v262_v37, %v262_v37 }
 0x173   :  { %v274_v39 = vmul.f32 %v264_v38, %v264_v38 }
 0x175   :  { %386 = vmatprep.mubr.f32.mxu1 %v274_v39 }
 0x176   :  { %387 = vmatmul.mubr.f32.gmra.mrb[6].mxu1 %v273_v40 }
 0x23d   :  { %v3078_v41 = vpop.f32.mrb[0].mxu1 }
 0x23e   :  { %v3079_v42 = vpop.f32.mrb[1].mxu1 }
 0x23f   :  { %v4386_v43 = vadd.f32 %v3079_v42, %v3078_v41 }
 0x241   :  { %v3081_v44 = vpop.f32.mrb[2].mxu1  ;;  %v446_v45 = vsel %vm445_vm0, %v4386_v43, 0.0 }
 0x242   :  { %447 = vadd.xlane.f32.xlu0 %v446_v45  ;;  %v3082_v46 = vpop.f32.mrb[3].mxu1 }
 0x243   :  { %v4390_v47 = vadd.f32 %v3082_v46, %v3081_v44 }
 0x245   :  { %v3084_v48 = vpop.f32.mrb[4].mxu1  ;;  %v449_v49 = vsel %vm445_vm0, %v4390_v47, 0.0 }
 0x246   :  { %450 = vadd.xlane.f32.xlu0 %v449_v49  ;;  %v3085_v50 = vpop.f32.mrb[5].mxu1 }
 0x247   :  { %v4394_v51 = vadd.f32 %v3085_v50, %v3084_v48 }
 0x249   :  { %v3087_v52 = vpop.f32.mrb[6].mxu1  ;;  %v452_v53 = vsel %vm445_vm0, %v4394_v51, 0.0 }
 0x24a   :  { %453 = vadd.xlane.f32.xlu1 %v452_v53  ;;  %v3088_v54 = vpop.f32.mrb[7].mxu1 }
 0x24b   :  { %v3089_v55 = vadd.f32 %v3088_v54, %v3087_v52 }
 0x24d   :  { %v455_v56 = vsel %vm445_vm0, %v3089_v55, 0.0 }
 0x24e   :  { %456 = vadd.xlane.f32.xlu1 %v455_v56 }
 0x2cf   :  { %v448_v61 = vpop.xlane.xlu0 %447 }
 0x2d0   :  { %v462_v13 = vsel %vm4407_vm3, %v448_v61, 0.0  ;;  %v485_v14 = vsel %vm4411_vm4, %v448_v61, 0.0 }
 0x2d3   :  { %v451_v4 = vpop.xlane.xlu0 %450 }
 0x2d4   :  { %v463_v10 = vsel %vm4399_vm1, %v451_v4, 0.0  ;;  %v486_v11 = vsel %vm4403_vm2, %v451_v4, 0.0  ;;  %v587_v4 = vld [vmem:[%s4988_s3 + $0x18] sm:$0xff] }
 0x2d5   :  { %v466_v17 = vadd.f32 %v463_v10, %v462_v13  ;;  %v489_v18 = vadd.f32 %v486_v11, %v485_v14  ;;  %v3540_v10 = vpack.c.bf16 %v587_v4, %v586_v1  ;;  %v589_v11 = vld [vmem:[%s4988_s3 + $0x28] sm:$0xff]  ;;  %v590_v13 = vld [vmem:[%s4988_s3 + $0x30] sm:$0xff]  ;;  %v591_v14 = vld [vmem:[%s4988_s3 + $0x38] sm:$0xff] }
 0x2d7   :  { %v454_v12 = vpop.xlane.xlu1 %453  ;;  %3541 = vmatprep.subr.bf16.mxu1 %v3540_v10 }
 0x2d8   :  { %v464_v15 = vsel %vm4415_vm5, %v454_v12, 0.0  ;;  %v487_v16 = vsel %vm4419_vm6, %v454_v12, 0.0  ;;  %v3544_v12 = vpack.c.bf16 %v589_v11, %v588_v9  ;;  %3543 = vmatpush3.bf16.msra.mxu1 %v3540_v10 }
 0x2d9   :  { %v467_v21 = vadd.f32 %v466_v17, %v464_v15  ;;  %v490_v22 = vadd.f32 %v489_v18, %v487_v16  ;;  %v3548_v15 = vpack.c.bf16 %v591_v14, %v590_v13  ;;  %v700_v16 = vld [vmem:[%s4990_s5] sm:$0xff]  ;;  %v701_v17 = vld [vmem:[%s4990_s5 + $0x8] sm:$0xff] }
 0x2da   :  { %3545 = vmatprep.subr.bf16.mxu1 %v3544_v12  ;;  %v4516_v18 = vpack.c.bf16 %v701_v17, %v700_v16 }
 0x2db   :  { %v457_v23 = vpop.xlane.xlu1 %456 }
 0x2dc   :  { %v465_v24 = vsel %vm4435_vm7, %v457_v23, 0.0  ;;  %v488_v25 = vsel %vm4439_vm8, %v457_v23, 0.0  ;;  %3547 = vmatpush3.bf16.msra.mxu1 %v3544_v12 }
 0x2dd   :  { %v468_v26 = vadd.f32 %v467_v21, %v465_v24  ;;  %v491_v27 = vadd.f32 %v490_v22, %v488_v25  ;;  %3549 = vmatprep.subr.bf16.mxu1 %v3548_v15 }
 0x2df   :  { %v469_v28 = vrot.slane %v468_v26, 4  ;;  %v492_v29 = vrot.slane %v491_v27, 4 }
 0x2e0   :  { %3551 = vmatpush3.bf16.msra.mxu1 %v3548_v15 }
 0x2e1   :  { %v470_v30 = vadd.f32 %v469_v28, %v468_v26  ;;  %v493_v31 = vadd.f32 %v492_v29, %v491_v27  ;;  %3553 = vmatprep.subr.bf16.mxu1 %v4516_v18 }
 0x2e3   :  { %v471_v32 = vrot.slane %v470_v30, 2  ;;  %v494_v33 = vrot.slane %v493_v31, 2 }
 0x2e5   :  { %v472_v34 = vadd.f32 %v471_v32, %v470_v30  ;;  %v495_v35 = vadd.f32 %v494_v33, %v493_v31 }
 0x2e7   :  { %v473_v36 = vrot.slane %v472_v34, 1  ;;  %v496_v37 = vrot.slane %v495_v35, 1 }
 0x2e9   :  { %v474_v38 = vadd.f32 %v473_v36, %v472_v34  ;;  %v497_v39 = vadd.f32 %v496_v37, %v495_v35 }
 0x2eb   :  { %v476_v40 = vmul.f32 0.0009765625, %v474_v38  ;;  %v498_v41 = vmul.f32 0.0009765625, %v497_v39 }
 0x2ed   :  { %v478_v42 = vsel %vm4399_vm1, %v476_v40, 0.0  ;;  %v477_v44 = vsel %vm4407_vm3, %v476_v40, 0.0  ;;  %v480_v45 = vsel %vm4435_vm7, %v476_v40, 0.0  ;;  %v479_v46 = vsel %vm4415_vm5, %v476_v40, 0.0 }
 0x2ee   :  { %v500_v48 = vsel %vm4403_vm2, %v498_v41, %v478_v42  ;;  %v499_v49 = vsel %vm4411_vm4, %v498_v41, %v477_v44  ;;  %v502_v50 = vsel %vm4439_vm8, %v498_v41, %v480_v45  ;;  %v501_v52 = vsel %vm4419_vm6, %v498_v41, %v479_v46 }
 0x2ef   :  { %v4464_v53 = vsub.f32 %v4390_v47, %v500_v48  ;;  %v4467_v54 = vsub.f32 %v4386_v43, %v499_v49  ;;  %v4469_v56 = vsub.f32 %v3089_v55, %v502_v50  ;;  %v4472_v57 = vsub.f32 %v4394_v51, %v501_v52 }
 0x2f1   :  { %v508_v58 = vmul.f32 %v4464_v53, %v4464_v53  ;;  %v507_v59 = vmul.f32 %v4467_v54, %v4467_v54  ;;  %v510_v47 = vmul.f32 %v4469_v56, %v4469_v56  ;;  %v509_v43 = vmul.f32 %v4472_v57, %v4472_v57 }
 0x2f3   :  { %v514_v60 = vsel %vm445_vm0, %v508_v58, 0.0  ;;  %v511_v61 = vsel %vm445_vm0, %v507_v59, 0.0  ;;  %v520_v51 = vsel %vm445_vm0, %v510_v47, 0.0  ;;  %v517_v55 = vsel %vm445_vm0, %v509_v43, 0.0 }
 0x2f4   :  { %515 = vadd.xlane.f32.xlu1 %v514_v60  ;;  %512 = vadd.xlane.f32.xlu0 %v511_v61 }
 0x2f8   :  { %521 = vadd.xlane.f32.xlu1 %v520_v51  ;;  %518 = vadd.xlane.f32.xlu0 %v517_v55 }
 0x381   :  { %v516_v21 = vpop.xlane.xlu1 %515  ;;  %v513_v22 = vpop.xlane.xlu0 %512 }
 0x382   :  { %v524_v23 = vsel %vm4399_vm1, %v516_v21, 0.0  ;;  %v553_v24 = vsel %vm4403_vm2, %v516_v21, 0.0  ;;  %v523_v25 = vsel %vm4407_vm3, %v513_v22, 0.0  ;;  %v552_v26 = vsel %vm4411_vm4, %v513_v22, 0.0 }
 0x383   :  { %v527_v27 = vadd.f32 %v524_v23, %v523_v25  ;;  %v556_v28 = vadd.f32 %v553_v24, %v552_v26 }
 0x385   :  { %v522_v29 = vpop.xlane.xlu1 %521  ;;  %v519_v30 = vpop.xlane.xlu0 %518 }
 0x386   :  { %v525_v31 = vsel %vm4415_vm5, %v519_v30, 0.0  ;;  %v554_v32 = vsel %vm4419_vm6, %v519_v30, 0.0  ;;  %v526_v35 = vsel %vm4435_vm7, %v522_v29, 0.0  ;;  %v555_v36 = vsel %vm4439_vm8, %v522_v29, 0.0  ;;  %v810_v29 = vld [vmem:[#allocation6 + $0x8] sm:$0xff] }
 0x387   :  { %v528_v33 = vadd.f32 %v527_v27, %v525_v31  ;;  %v557_v34 = vadd.f32 %v556_v28, %v554_v32  ;;  %v809_v28 = vld [vmem:[#allocation6] sm:$0xff]  ;;  %v812_v31 = vld [vmem:[#allocation6 + $0x18] sm:$0xff] }
 0x388   :  { %v4566_v30 = vpack.c.bf16 %v810_v29, %v809_v28 }
 0x389   :  { %v529_v37 = vadd.f32 %v528_v33, %v526_v35  ;;  %v558_v38 = vadd.f32 %v557_v34, %v555_v36  ;;  %v3948_v33 = vmov 0.0   ;;  %v3021_v34 = vld [vmem:[#allocation8] ss:$0 sm:$0xff]  ;;  %v3011_v35 = vld [vmem:[%s4989_s4] ss:$0 sm:$0xff] }
 0x38a   :  { %3269 = vmatprep.mubr.msk.f32.mxu0 %vm3947_vm13, %v3948_v33 }
 0x38b   :  { %v530_v39 = vrot.slane %v529_v37, 4  ;;  %v559_v40 = vrot.slane %v558_v38, 4 }
 0x38d   :  { %v531_v41 = vadd.f32 %v530_v39, %v529_v37  ;;  %v560_v42 = vadd.f32 %v559_v40, %v558_v38 }
 0x38f   :  { %v532_v44 = vrot.slane %v531_v41, 2  ;;  %v561_v45 = vrot.slane %v560_v42, 2 }
 0x391   :  { %v533_v46 = vadd.f32 %v532_v44, %v531_v41  ;;  %v562_v48 = vadd.f32 %v561_v45, %v560_v42 }
 0x393   :  { %v534_v49 = vrot.slane %v533_v46, 1  ;;  %v563_v50 = vrot.slane %v562_v48, 1 }
 0x395   :  { %v535_v52 = vadd.f32 %v534_v49, %v533_v46  ;;  %v564_v58 = vadd.f32 %v563_v50, %v562_v48  ;;  %v3016_v50 = vld [vmem:[%s4991_s6] ss:$0 sm:$0xff]  ;;  %s3950_s6 = smov 96  }
 0x397   :  { %v537_v59 = vmul.f32 0.0009775171, %v535_v52  ;;  %v565_v60 = vmul.f32 0.0009775171, %v564_v58 }
 0x399   :  { %3688 = vrsqrt.f32 %v537_v59  ;;  %vm540_vm9 = vcmp.eq.f32.partialorder %v537_v59, inf  ;;  %v543_v51 = vand.u32 2147483648, %v537_v59  ;;  %vm542_vm10 = vcmp.eq.f32.partialorder %v537_v59, 0.0 }
 0x39a   :  { %3690 = vrsqrt.f32 %v565_v60  ;;  %vm568_vm11 = vcmp.eq.f32.partialorder %v565_v60, inf  ;;  %v571_v63 = vand.u32 2147483648, %v565_v60  ;;  %vm570_vm12 = vcmp.eq.f32.partialorder %v565_v60, 0.0 }
 0x3a3   :  { %v3689_v61 = vpop.eup %3688 }
 0x3a4   :  { %v3691_v47 = vpop.eup %3690  ;;  %v539_v43 = vmul.f32 %v3689_v61, %v537_v59 }
 0x3a5   :  { %v567_v55 = vmul.f32 %v3691_v47, %v565_v60 }
 0x3a6   :  { %v541_v62 = vsel %vm540_vm9, %v537_v59, %v539_v43  ;;  %vm2542_vm9 = vcmask 1045504  }
 0x3a7   :  { %v544_v0 = vsel %vm542_vm10, %v543_v51, %v541_v62  ;;  %v569_v1 = vsel %vm568_vm11, %v565_v60, %v567_v55  ;;  %vm2729_vm10 = vcmask 7168  }
 0x3a8   :  { %v545_v4 = vadd.f32 1e-05, %v544_v0  ;;  %v572_v9 = vsel %vm570_vm12, %v571_v63, %v569_v1 }
 0x3a9   :  { %v573_v10 = vadd.f32 1e-05, %v572_v9 }
 0x3aa   :  { %3692 = vrcp.f32 %v545_v4 }
 0x3ab   :  { %3694 = vrcp.f32 %v573_v10 }
 0x3b4   :  { %v3693_v11 = vpop.eup %3692 }
 0x3b5   :  { %v3695_v12 = vpop.eup %3694  ;;  %v548_v13 = vsel %vm4407_vm3, %v3693_v11, 0.0  ;;  %v549_v14 = vsel %vm4399_vm1, %v3693_v11, 0.0  ;;  %v550_v15 = vsel %vm4415_vm5, %v3693_v11, 0.0  ;;  %v551_v22 = vsel %vm4435_vm7, %v3693_v11, 0.0 }
 0x3b6   :  { %v576_v16 = vsel %vm4411_vm4, %v3695_v12, %v548_v13  ;;  %v577_v17 = vsel %vm4403_vm2, %v3695_v12, %v549_v14  ;;  %v578_v21 = vsel %vm4419_vm6, %v3695_v12, %v550_v15  ;;  %v579_v26 = vsel %vm4439_vm8, %v3695_v12, %v551_v22 }
 0x3b7   :  { %v580_v23 = vmul.f32 %v576_v16, %v4467_v54  ;;  %v581_v24 = vmul.f32 %v577_v17, %v4464_v53  ;;  %v582_v25 = vmul.f32 %v578_v21, %v4472_v57  ;;  %v583_v27 = vmul.f32 %v579_v26, %v4469_v56  ;;  %v702_v53 = vld [vmem:[%s4990_s5 + $0x10] sm:$0xff]  ;;  %v703_v54 = vld [vmem:[%s4990_s5 + $0x18] sm:$0xff]  ;;  %s3949_s5 = smov 64  }
 0x3b8   :  { %v3556_v57 = vpack.c.bf16 %v703_v54, %v702_v53  ;;  %v811_v56 = vld [vmem:[#allocation6 + $0x10] sm:$0xff]  ;;  %899 = vrot.lane.b32.xlu0 %v3021_v34, %s3949_s5 }
 0x3b9   :  { %3219 = vmatprep.mubr.msk.f32.mxu1 %vm445_vm0, %v580_v23  ;;  %v4572_v32 = vpack.c.bf16 %v812_v31, %v811_v56 }
 0x3ba   :  { %3220 = vmatmul.mubr.msk.f32.vlgmr.msra.gmra.mrb[8].mxu1 %vm445_vm0, %v581_v24 }
 0x3bb   :  { %3222 = vmatprep.mubr.msk.f32.mxu1 %vm445_vm0, %v582_v25  ;;  %3555 = vmatpush3.bf16.msra.mxu1 %v4516_v18  ;;  %v3946_v18 = vmov 0.0|0.0  }
 0x3bc   :  { %3557 = vmatprep.subr.bf16.mxu1 %v3556_v57  ;;  %3572 = vmatprep.subr.bf16.mxu0 %v3946_v18 }
 0x3bd   :  { %3574 = vmatpush3.bf16.msra.mxu0 %v4566_v30 }
 0x3be   :  { %3223 = vmatmul.mubr.msk.f32.gmra.mrb[10].mxu1 %vm445_vm0, %v583_v27  ;;  %3575 = vmatprep.subr.bf16.mxu0 %v3946_v18  ;;  %vm2540_vm0 = vcmask 1043456  }
 0x3bf   :  { %3559 = vmatpush3.bf16.msra.mxu1 %v3556_v57 }
 0x3c0   :  { %3560 = vmatprep.subr.bf16.mxu1 %v3946_v18 }
 0x3c1   :  { %3577 = vmatpush3.bf16.msra.mxu0 %v4572_v32 }
 0x3c2   :  { %3584 = vmatprep.subr.bf16.mxu0 %v3946_v18 }
 0x42a   :  { %v4608_v51 = vpop.permute.xlu0 %899 }
 0x48d   :  { %v3221_v36 = vpop.f32.mrb[8].mxu1 }
 0x48e   :  { %v683_v37 = vadd.f32 %v3221_v36, %v3011_v35  ;;  %v677_v38 = vpop.f32.mrb[9].mxu1 }
 0x48f   :  { %v678_v39 = vadd.f32 %v3011_v35, %v677_v38 }
 0x490   :  { %v697_v42 = vmax.f32 %v683_v37, 0.0 }
 0x491   :  { %v696_v40 = vmax.f32 %v678_v39, 0.0  ;;  %v3224_v41 = vpop.f32.mrb[10].mxu1 }
 0x492   :  { %v693_v44 = vadd.f32 %v3224_v41, %v3011_v35  ;;  %v687_v45 = vpop.f32.mrb[11].mxu1 }
 0x493   :  { %v688_v46 = vadd.f32 %v3011_v35, %v687_v45  ;;  %3233 = vmatprep.mubr.msk.f32.mxu1 %vm711_vm14, %v696_v40 }
 0x494   :  { %3234 = vmatmul.mubr.msk.f32.vlgmr.msra.gmra.mrb[12].mxu1 %vm711_vm14, %v697_v42  ;;  %v699_v49 = vmax.f32 %v693_v44, 0.0 }
 0x495   :  { %v698_v48 = vmax.f32 %v688_v46, 0.0  ;;  %3562 = vmatpush3.bf16.msra.mxu1 %v4566_v30 }
 0x496   :  { %3563 = vmatprep.subr.bf16.mxu1 %v3946_v18 }
 0x497   :  { %3236 = vmatprep.mubr.msk.f32.mxu1 %vm711_vm14, %v698_v48 }
 0x498   :  { %3237 = vmatmul.mubr.msk.f32.gmra.mrb[14].mxu1 %vm711_vm14, %v699_v49 }
 0x499   :  { %3565 = vmatpush3.bf16.msra.mxu1 %v4572_v32  ;;  %3247 = vmatprep.mubr.msk.f32.mxu1 %vm3947_vm13, %v3948_v33 }
 0x49a   :  { %3566 = vmatprep.subr.bf16.mxu1 %v3946_v18 }
 0x49c   :  { %3248 = vmatmul.mubr.f32.vlgmr.msra.gmra.mrb[16].mxu1 %v3948_v33 }
 0x49d   :  { %3568 = vmatpush3.bf16.msra.mxu1 %v4566_v30  ;;  %3258 = vmatprep.mubr.msk.f32.mxu1 %vm3947_vm13, %v3948_v33 }
 0x49e   :  { %3569 = vmatprep.subr.bf16.mxu1 %v3946_v18 }
 0x4a1   :  { %3571 = vmatpush3.bf16.msra.mxu1 %v4572_v32 }
 0x4a2   :  { %3578 = vmatprep.subr.bf16.mxu1 %v3946_v18 }
 0x567   :  { %v3235_v52 = vpop.f32.mrb[12].mxu1 }
 0x568   :  { %v4602_v58 = vadd.f32 %v3235_v52, %v3016_v50  ;;  %v790_v59 = vpop.f32.mrb[13].mxu1 }
 0x569   :  { %v4612_v0 = vadd.f32 %v3016_v50, %v790_v59 }
 0x56b   :  { %v3238_v60 = vpop.f32.mrb[14].mxu1 }
 0x56c   :  { %v4604_v61 = vadd.f32 %v3238_v60, %v3016_v50  ;;  %v800_v47 = vpop.f32.mrb[15].mxu1 }
 0x56d   :  { %v4606_v43 = vadd.f32 %v3016_v50, %v800_v47 }
 0x56f   :  { %v888_v55 = vpop.f32.mrb[16].mxu1 }
 0x570   :  { %v3249_v62 = vpop.f32.mrb[17].mxu1  ;;  %v902_v63 = vadd.f32 %v4608_v51, %v888_v55  ;;  %v892_v1 = vadd.f32 %v888_v55, %v4612_v0 }
 0x572   :  { %904 = vrot.lane.b32.xlu1 %v902_v63, %s3949_s5  ;;  %v893_v4 = vsub.f32 0.0, %v892_v1 }
 0x574   :  { %v894_v9 = vmul.f32 1.442695, %v893_v4 }
 0x576   :  { %3696 = vpow2.f32 %v894_v9 }
 0x580   :  { %v3697_v10 = vpop.eup %3696 }
 0x581   :  { %v896_v11 = vadd.f32 1.0, %v3697_v10 }
 0x583   :  { %3698 = vrcp.f32 %v896_v11 }
 0x58d   :  { %v3699_v12 = vpop.eup %3698 }
 0x58e   :  { %v914_v21 = vsub.f32 1.0, %v3699_v12  ;;  %v920_v23 = vmul.f32 0.0, %v3699_v12 }
 0x5e4   :  { %v905_v13 = vpop.permute.xlu1 %904 }
 0x5e5   :  { %v907_v14 = vmul.f32 %v3699_v12, %v905_v13 }
 0x5e7   :  { %909 = vrot.lane.b32.xlu1 %v907_v14, %s3949_s5 }
 0x659   :  { %v910_v15 = vpop.permute.xlu1 %909 }
 0x65a   :  { %v912_v16 = vadd.f32 %v910_v15, %v4612_v0 }
 0x65c   :  { %3700 = vtanh.f32 %v912_v16 }
 0x666   :  { %v3701_v17 = vpop.eup %3700 }
 0x667   :  { %916 = vrot.lane.b32.xlu1 %v3701_v17, %s3950_s6 }
 0x6d9   :  { %v917_v22 = vpop.permute.xlu1 %916 }
 0x6da   :  { %v919_v24 = vmul.f32 %v917_v22, %v914_v21 }
 0x6dc   :  { %v4618_v25 = vadd.f32 %v920_v23, %v919_v24 }
 0x6de   :  { %923 = vrot.lane.b32.xlu0 %v4618_v25, %s3950_s6  ;;  %v1026_v44 = vrot.slane %v4618_v25, 6 }
 0x750   :  { %v924_v26 = vpop.permute.xlu0 %923 }
 0x751   :  { %3259 = vmatmul.mubr.msk.f32.vlgmr.msra.gmra.mrb[18].mxu1 %vm711_vm14, %v924_v26 }
 0x752   :  { %3580 = vmatpush3.bf16.msra.mxu1 %v4566_v30  ;;  %3280 = vmatprep.mubr.msk.f32.mxu1 %vm3947_vm13, %v3948_v33 }
 0x753   :  { %3581 = vmatprep.subr.bf16.mxu1 %v3946_v18 }
 0x756   :  { %3583 = vmatpush3.bf16.msra.mxu1 %v4572_v32 }
 0x757   :  { %3590 = vmatprep.subr.bf16.mxu1 %v3946_v18 }
 0x824   :  { %v993_v27 = vpop.f32.mrb[18].mxu1 }
 0x825   :  { %v1007_v53 = vadd.f32 %v993_v27, %v4608_v51  ;;  %v3260_v54 = vpop.f32.mrb[19].mxu1  ;;  %v998_v28 = vrot.slane %v993_v27, 6 }
 0x827   :  { %v1009_v57 = vrot.slane %v1007_v53, 6  ;;  %v1000_v29 = vadd.f32 %v998_v28, %v4612_v0 }
 0x829   :  { %1010 = vrot.lane.b32.xlu1 %v1009_v57, %s3949_s5  ;;  %v1001_v56 = vsub.f32 0.0, %v1000_v29 }
 0x82b   :  { %v1002_v31 = vmul.f32 1.442695, %v1001_v56 }
 0x82d   :  { %3702 = vpow2.f32 %v1002_v31 }
 0x837   :  { %v3703_v34 = vpop.eup %3702 }
 0x838   :  { %v1004_v35 = vadd.f32 1.0, %v3703_v34 }
 0x83a   :  { %3704 = vrcp.f32 %v1004_v35 }
 0x844   :  { %v3705_v36 = vpop.eup %3704 }
 0x845   :  { %v1020_v42 = vsub.f32 1.0, %v3705_v36  ;;  %v1028_v48 = vmul.f32 %v3705_v36, %v1026_v44 }
 0x89b   :  { %v1011_v37 = vpop.permute.xlu1 %1010 }
 0x89c   :  { %v1013_v38 = vmul.f32 %v3705_v36, %v1011_v37 }
 0x89e   :  { %1015 = vrot.lane.b32.xlu0 %v1013_v38, %s3949_s5 }
 0x910   :  { %v1016_v39 = vpop.permute.xlu0 %1015 }
 0x911   :  { %v1018_v40 = vadd.f32 %v1016_v39, %v4612_v0 }
 0x913   :  { %3706 = vtanh.f32 %v1018_v40 }
 0x91d   :  { %v3707_v41 = vpop.eup %3706 }
 0x91e   :  { %1022 = vrot.lane.b32.xlu1 %v3707_v41, %s3950_s6 }
 0x990   :  { %v1023_v45 = vpop.permute.xlu1 %1022 }
 0x991   :  { %v1025_v46 = vmul.f32 %v1023_v45, %v1020_v42 }
 0x993   :  { %v1029_v49 = vadd.f32 %v1028_v48, %v1025_v46 }
 0x995   :  { %v1031_v50 = vrot.slane %v1029_v49, 2  ;;  %v1135_v21 = vrot.slane %v1029_v49, 6  ;;  %v2539_v27 = vsel %vm2538_vm15, %v4618_v25, %v1029_v49 }
 0x997   :  { %1032 = vrot.lane.b32.xlu0 %v1031_v50, %s3950_s6 }
 0xa09   :  { %v1033_v52 = vpop.permute.xlu0 %1032 }
 0xa0a   :  { %3270 = vmatmul.mubr.msk.f32.vlgmr.msra.gmra.mrb[8].mxu0 %vm711_vm14, %v1033_v52 }
 0xa0b   :  { %3586 = vmatpush3.bf16.msra.mxu0 %v4566_v30  ;;  %3291 = vmatprep.mubr.msk.f32.mxu0 %vm3947_vm13, %v3948_v33 }
 0xa0c   :  { %3587 = vmatprep.subr.bf16.mxu0 %v3946_v18 }
 0xa0f   :  { %3589 = vmatpush3.bf16.msra.mxu0 %v4572_v32 }
 0xa10   :  { %3596 = vmatprep.subr.bf16.mxu0 %v3946_v18 }
 0xadd   :  { %v1102_v59 = vpop.f32.mrb[8].mxu0 }
 0xade   :  { %v1116_v60 = vadd.f32 %v1102_v59, %v4608_v51  ;;  %v3271_v47 = vpop.f32.mrb[9].mxu0  ;;  %v1107_v62 = vrot.slane %v1102_v59, 4 }
 0xae0   :  { %v1118_v55 = vrot.slane %v1116_v60, 4  ;;  %v1109_v63 = vadd.f32 %v1107_v62, %v4612_v0 }
 0xae2   :  { %1119 = vrot.lane.b32.xlu1 %v1118_v55, %s3949_s5  ;;  %v1110_v1 = vsub.f32 0.0, %v1109_v63 }
 0xae4   :  { %v1111_v4 = vmul.f32 1.442695, %v1110_v1 }
 0xae6   :  { %3708 = vpow2.f32 %v1111_v4 }
 0xaf0   :  { %v3709_v9 = vpop.eup %3708 }
 0xaf1   :  { %v1113_v10 = vadd.f32 1.0, %v3709_v9 }
 0xaf3   :  { %3710 = vrcp.f32 %v1113_v10 }
 0xafd   :  { %v3711_v11 = vpop.eup %3710 }
 0xafe   :  { %v1129_v17 = vsub.f32 1.0, %v3711_v11  ;;  %v1137_v23 = vmul.f32 %v3711_v11, %v1135_v21 }
 0xb54   :  { %v1120_v12 = vpop.permute.xlu1 %1119 }
 0xb55   :  { %v1122_v13 = vmul.f32 %v3711_v11, %v1120_v12 }
 0xb57   :  { %1124 = vrot.lane.b32.xlu0 %v1122_v13, %s3949_s5 }
 0xbc9   :  { %v1125_v14 = vpop.permute.xlu0 %1124 }
 0xbca   :  { %v1127_v15 = vadd.f32 %v1125_v14, %v4612_v0 }
 0xbcc   :  { %3712 = vtanh.f32 %v1127_v15 }
 0xbd6   :  { %v3713_v16 = vpop.eup %3712 }
 0xbd7   :  { %1131 = vrot.lane.b32.xlu1 %v3713_v16, %s3950_s6 }
 0xc49   :  { %v1132_v22 = vpop.permute.xlu1 %1131 }
 0xc4a   :  { %v1134_v24 = vmul.f32 %v1132_v22, %v1129_v17 }
 0xc4c   :  { %v1138_v26 = vadd.f32 %v1137_v23, %v1134_v24 }
 0xc4e   :  { %v1140_v53 = vrot.slane %v1138_v26, 4  ;;  %v2541_v54 = vsel %vm2540_vm0, %v2539_v27, %v1138_v26  ;;  %v1244_v48 = vrot.slane %v1138_v26, 6 }
 0xc50   :  { %1141 = vrot.lane.b32.xlu0 %v1140_v53, %s3950_s6 }
 0xcc2   :  { %v1142_v57 = vpop.permute.xlu0 %1141 }
 0xcc3   :  { %3281 = vmatmul.mubr.msk.f32.vlgmr.msra.gmra.mrb[20].mxu1 %vm711_vm14, %v1142_v57 }
 0xcc4   :  { %3592 = vmatpush3.bf16.msra.mxu1 %v4566_v30  ;;  %3302 = vmatprep.mubr.msk.f32.mxu1 %vm3947_vm13, %v3948_v33 }
 0xcc5   :  { %3593 = vmatprep.subr.bf16.mxu1 %v3946_v18 }
 0xcc8   :  { %3595 = vmatpush3.bf16.msra.mxu1 %v4572_v32 }
 0xcc9   :  { %3602 = vmatprep.subr.bf16.mxu1 %v3946_v18 }
 0xd96   :  { %v1211_v25 = vpop.f32.mrb[20].mxu1 }
 0xd97   :  { %v1225_v28 = vadd.f32 %v1211_v25, %v4608_v51  ;;  %v3282_v29 = vpop.f32.mrb[21].mxu1  ;;  %v1216_v31 = vrot.slane %v1211_v25, 2 }
 0xd99   :  { %v1227_v56 = vrot.slane %v1225_v28, 2  ;;  %v1218_v34 = vadd.f32 %v1216_v31, %v4612_v0 }
 0xd9b   :  { %1228 = vrot.lane.b32.xlu1 %v1227_v56, %s3949_s5  ;;  %v1219_v35 = vsub.f32 0.0, %v1218_v34 }
 0xd9d   :  { %v1220_v36 = vmul.f32 1.442695, %v1219_v35 }
 0xd9f   :  { %3714 = vpow2.f32 %v1220_v36 }
 0xda9   :  { %v3715_v37 = vpop.eup %3714 }
 0xdaa   :  { %v1222_v38 = vadd.f32 1.0, %v3715_v37 }
 0xdac   :  { %3716 = vrcp.f32 %v1222_v38 }
 0xdb6   :  { %v3717_v39 = vpop.eup %3716 }
 0xdb7   :  { %v1238_v46 = vsub.f32 1.0, %v3717_v39  ;;  %v1246_v50 = vmul.f32 %v3717_v39, %v1244_v48 }
 0xe0d   :  { %v1229_v40 = vpop.permute.xlu1 %1228 }
 0xe0e   :  { %v1231_v41 = vmul.f32 %v3717_v39, %v1229_v40 }
 0xe10   :  { %1233 = vrot.lane.b32.xlu0 %v1231_v41, %s3949_s5 }
 0xe82   :  { %v1234_v42 = vpop.permute.xlu0 %1233 }
 0xe83   :  { %v1236_v44 = vadd.f32 %v1234_v42, %v4612_v0 }
 0xe85   :  { %3718 = vtanh.f32 %v1236_v44 }
 0xe8f   :  { %v3719_v45 = vpop.eup %3718 }
 0xe90   :  { %1240 = vrot.lane.b32.xlu1 %v3719_v45, %s3950_s6 }
 0xf02   :  { %v1241_v49 = vpop.permute.xlu1 %1240 }
 0xf03   :  { %v1243_v52 = vmul.f32 %v1241_v49, %v1238_v46 }
 0xf05   :  { %v1247_v59 = vadd.f32 %v1246_v50, %v1243_v52 }
 0xf07   :  { %v1249_v60 = vrot.slane %v1247_v59, 6  ;;  %v4668_v47 = vsel %vm2542_vm9, %v2541_v54, %v1247_v59 }
 0xf09   :  { %1250 = vrot.lane.b32.xlu0 %v1249_v60, %s3950_s6 }
 0xf7b   :  { %v1251_v55 = vpop.permute.xlu0 %1250 }
 0xf7c   :  { %3292 = vmatmul.mubr.msk.f32.vlgmr.msra.gmra.mrb[10].mxu0 %vm711_vm14, %v1251_v55 }
 0xf7d   :  { %3598 = vmatpush3.bf16.msra.mxu0 %v4566_v30  ;;  %3313 = vmatprep.mubr.msk.f32.mxu0 %vm3947_vm13, %v3948_v33 }
 0xf7e   :  { %3599 = vmatprep.subr.bf16.mxu0 %v3946_v18 }
 0xf81   :  { %3601 = vmatpush3.bf16.msra.mxu0 %v4572_v32 }
 0xf82   :  { %3608 = vmatprep.subr.bf16.mxu0 %v3946_v18 }
0x104f   :  { %v1320_v0 = vpop.f32.mrb[10].mxu0 }
0x1050   :  { %v1331_v62 = vadd.f32 %v1320_v0, %v4608_v51  ;;  %v3293_v63 = vpop.f32.mrb[11].mxu0  ;;  %v1324_v1 = vadd.f32 %v1320_v0, %v4602_v58 }
0x1052   :  { %1333 = vrot.lane.b32.xlu1 %v1331_v62, %s3949_s5  ;;  %v1325_v4 = vsub.f32 0.0, %v1324_v1 }
0x1054   :  { %v1326_v9 = vmul.f32 1.442695, %v1325_v4 }
0x1056   :  { %3720 = vpow2.f32 %v1326_v9 }
0x1060   :  { %v3721_v10 = vpop.eup %3720 }
0x1061   :  { %v1328_v11 = vadd.f32 1.0, %v3721_v10 }
0x1063   :  { %3722 = vrcp.f32 %v1328_v11 }
0x106d   :  { %v3723_v12 = vpop.eup %3722 }
0x106e   :  { %v1343_v21 = vsub.f32 1.0, %v3723_v12  ;;  %v1350_v23 = vmul.f32 %v3723_v12, %v1249_v60 }
0x10c4   :  { %v1334_v13 = vpop.permute.xlu1 %1333 }
0x10c5   :  { %v1336_v14 = vmul.f32 %v3723_v12, %v1334_v13 }
0x10c7   :  { %1338 = vrot.lane.b32.xlu0 %v1336_v14, %s3949_s5 }
0x1139   :  { %v1339_v15 = vpop.permute.xlu0 %1338 }
0x113a   :  { %v1341_v16 = vadd.f32 %v1339_v15, %v4602_v58 }
0x113c   :  { %3724 = vtanh.f32 %v1341_v16 }
0x1146   :  { %v3725_v17 = vpop.eup %3724 }
0x1147   :  { %1345 = vrot.lane.b32.xlu1 %v3725_v17, %s3950_s6 }
0x11b9   :  { %v1346_v22 = vpop.permute.xlu1 %1345 }
0x11ba   :  { %v1348_v24 = vmul.f32 %v1346_v22, %v1343_v21 }
0x11bc   :  { %v4684_v26 = vadd.f32 %v1350_v23, %v1348_v24 }
0x11be   :  { %1353 = vrot.lane.b32.xlu0 %v4684_v26, %s3950_s6  ;;  %v1456_v44 = vrot.slane %v4684_v26, 6 }
0x1230   :  { %v1354_v27 = vpop.permute.xlu0 %1353 }
0x1231   :  { %3303 = vmatmul.mubr.msk.f32.vlgmr.msra.gmra.mrb[22].mxu1 %vm711_vm14, %v1354_v27 }
0x1232   :  { %3604 = vmatpush3.bf16.msra.mxu1 %v4566_v30  ;;  %3324 = vmatprep.mubr.msk.f32.mxu1 %vm3947_vm13, %v3948_v33 }
0x1233   :  { %3605 = vmatprep.subr.bf16.mxu1 %v3946_v18 }
0x1236   :  { %3607 = vmatpush3.bf16.msra.mxu1 %v4572_v32 }
0x1237   :  { %3614 = vmatprep.subr.bf16.mxu1 %v3946_v18 }
0x1304   :  { %v1423_v53 = vpop.f32.mrb[22].mxu1 }
0x1305   :  { %v1437_v54 = vadd.f32 %v1423_v53, %v4608_v51  ;;  %v3304_v57 = vpop.f32.mrb[23].mxu1  ;;  %v1428_v28 = vrot.slane %v1423_v53, 6 }
0x1307   :  { %v1439_v25 = vrot.slane %v1437_v54, 6  ;;  %v1430_v29 = vadd.f32 %v1428_v28, %v4602_v58 }
0x1309   :  { %1440 = vrot.lane.b32.xlu1 %v1439_v25, %s3949_s5  ;;  %v1431_v56 = vsub.f32 0.0, %v1430_v29 }
0x130b   :  { %v1432_v31 = vmul.f32 1.442695, %v1431_v56 }
0x130d   :  { %3726 = vpow2.f32 %v1432_v31 }
0x1317   :  { %v3727_v34 = vpop.eup %3726 }
0x1318   :  { %v1434_v35 = vadd.f32 1.0, %v3727_v34 }
0x131a   :  { %3728 = vrcp.f32 %v1434_v35 }
0x1324   :  { %v3729_v36 = vpop.eup %3728 }
0x1325   :  { %v1450_v42 = vsub.f32 1.0, %v3729_v36  ;;  %v1458_v48 = vmul.f32 %v3729_v36, %v1456_v44 }
0x137b   :  { %v1441_v37 = vpop.permute.xlu1 %1440 }
0x137c   :  { %v1443_v38 = vmul.f32 %v3729_v36, %v1441_v37 }
0x137e   :  { %1445 = vrot.lane.b32.xlu0 %v1443_v38, %s3949_s5 }
0x13f0   :  { %v1446_v39 = vpop.permute.xlu0 %1445 }
0x13f1   :  { %v1448_v40 = vadd.f32 %v1446_v39, %v4602_v58 }
0x13f3   :  { %3730 = vtanh.f32 %v1448_v40 }
0x13fd   :  { %v3731_v41 = vpop.eup %3730 }
0x13fe   :  { %1452 = vrot.lane.b32.xlu1 %v3731_v41, %s3950_s6 }
0x1470   :  { %v1453_v45 = vpop.permute.xlu1 %1452 }
0x1471   :  { %v1455_v46 = vmul.f32 %v1453_v45, %v1450_v42 }
0x1473   :  { %v1459_v49 = vadd.f32 %v1458_v48, %v1455_v46 }
0x1475   :  { %v1461_v50 = vrot.slane %v1459_v49, 2  ;;  %v1565_v21 = vrot.slane %v1459_v49, 6  ;;  %v2544_v53 = vsel %vm2538_vm15, %v4684_v26, %v1459_v49 }
0x1477   :  { %1462 = vrot.lane.b32.xlu0 %v1461_v50, %s3950_s6 }
0x14e9   :  { %v1463_v52 = vpop.permute.xlu0 %1462 }
0x14ea   :  { %3314 = vmatmul.mubr.msk.f32.vlgmr.msra.gmra.mrb[12].mxu0 %vm711_vm14, %v1463_v52 }
0x14eb   :  { %3610 = vmatpush3.bf16.msra.mxu0 %v4566_v30  ;;  %3335 = vmatprep.mubr.msk.f32.mxu0 %vm3947_vm13, %v3948_v33 }
0x14ec   :  { %3611 = vmatprep.subr.bf16.mxu0 %v3946_v18 }
0x14ef   :  { %3613 = vmatpush3.bf16.msra.mxu0 %v4572_v32 }
0x14f0   :  { %3620 = vmatprep.subr.bf16.mxu0 %v3946_v18 }
0x15bd   :  { %v1532_v59 = vpop.f32.mrb[12].mxu0 }
0x15be   :  { %v1546_v60 = vadd.f32 %v1532_v59, %v4608_v51  ;;  %v3315_v55 = vpop.f32.mrb[13].mxu0  ;;  %v1537_v62 = vrot.slane %v1532_v59, 4 }
0x15c0   :  { %v1548_v0 = vrot.slane %v1546_v60, 4  ;;  %v1539_v63 = vadd.f32 %v1537_v62, %v4602_v58 }
0x15c2   :  { %1549 = vrot.lane.b32.xlu1 %v1548_v0, %s3949_s5  ;;  %v1540_v1 = vsub.f32 0.0, %v1539_v63 }
0x15c4   :  { %v1541_v4 = vmul.f32 1.442695, %v1540_v1 }
0x15c6   :  { %3732 = vpow2.f32 %v1541_v4 }
0x15d0   :  { %v3733_v9 = vpop.eup %3732 }
0x15d1   :  { %v1543_v10 = vadd.f32 1.0, %v3733_v9 }
0x15d3   :  { %3734 = vrcp.f32 %v1543_v10 }
0x15dd   :  { %v3735_v11 = vpop.eup %3734 }
0x15de   :  { %v1559_v17 = vsub.f32 1.0, %v3735_v11  ;;  %v1567_v23 = vmul.f32 %v3735_v11, %v1565_v21 }
0x1634   :  { %v1550_v12 = vpop.permute.xlu1 %1549 }
0x1635   :  { %v1552_v13 = vmul.f32 %v3735_v11, %v1550_v12 }
0x1637   :  { %1554 = vrot.lane.b32.xlu0 %v1552_v13, %s3949_s5 }
0x16a9   :  { %v1555_v14 = vpop.permute.xlu0 %1554 }
0x16aa   :  { %v1557_v15 = vadd.f32 %v1555_v14, %v4602_v58 }
0x16ac   :  { %3736 = vtanh.f32 %v1557_v15 }
0x16b6   :  { %v3737_v16 = vpop.eup %3736 }
0x16b7   :  { %1561 = vrot.lane.b32.xlu1 %v3737_v16, %s3950_s6 }
0x1729   :  { %v1562_v22 = vpop.permute.xlu1 %1561 }
0x172a   :  { %v1564_v24 = vmul.f32 %v1562_v22, %v1559_v17 }
0x172c   :  { %v1568_v27 = vadd.f32 %v1567_v23, %v1564_v24 }
0x172e   :  { %v1570_v54 = vrot.slane %v1568_v27, 4  ;;  %v2545_v57 = vsel %vm2540_vm0, %v2544_v53, %v1568_v27  ;;  %v1674_v48 = vrot.slane %v1568_v27, 6 }
0x1730   :  { %1571 = vrot.lane.b32.xlu0 %v1570_v54, %s3950_s6 }
0x17a2   :  { %v1572_v25 = vpop.permute.xlu0 %1571 }
0x17a3   :  { %3325 = vmatmul.mubr.msk.f32.vlgmr.msra.gmra.mrb[24].mxu1 %vm711_vm14, %v1572_v25 }
0x17a4   :  { %3616 = vmatpush3.bf16.msra.mxu1 %v4566_v30  ;;  %3346 = vmatprep.mubr.msk.f32.mxu1 %vm3947_vm13, %v3948_v33 }
0x17a5   :  { %3617 = vmatprep.subr.bf16.mxu1 %v3946_v18 }
0x17a8   :  { %3619 = vmatpush3.bf16.msra.mxu1 %v4572_v32 }
0x17a9   :  { %3626 = vmatprep.subr.bf16.mxu1 %v3946_v18 }
0x1876   :  { %v1641_v26 = vpop.f32.mrb[24].mxu1 }
0x1877   :  { %v1655_v28 = vadd.f32 %v1641_v26, %v4608_v51  ;;  %v3326_v29 = vpop.f32.mrb[25].mxu1  ;;  %v1646_v31 = vrot.slane %v1641_v26, 2 }
0x1879   :  { %v1657_v56 = vrot.slane %v1655_v28, 2  ;;  %v1648_v34 = vadd.f32 %v1646_v31, %v4602_v58 }
0x187b   :  { %1658 = vrot.lane.b32.xlu1 %v1657_v56, %s3949_s5  ;;  %v1649_v35 = vsub.f32 0.0, %v1648_v34 }
0x187d   :  { %v1650_v36 = vmul.f32 1.442695, %v1649_v35 }
0x187f   :  { %3738 = vpow2.f32 %v1650_v36 }
0x1889   :  { %v3739_v37 = vpop.eup %3738 }
0x188a   :  { %v1652_v38 = vadd.f32 1.0, %v3739_v37 }
0x188c   :  { %3740 = vrcp.f32 %v1652_v38 }
0x1896   :  { %v3741_v39 = vpop.eup %3740 }
0x1897   :  { %v1668_v46 = vsub.f32 1.0, %v3741_v39  ;;  %v1676_v50 = vmul.f32 %v3741_v39, %v1674_v48 }
0x18ed   :  { %v1659_v40 = vpop.permute.xlu1 %1658 }
0x18ee   :  { %v1661_v41 = vmul.f32 %v3741_v39, %v1659_v40 }
0x18f0   :  { %1663 = vrot.lane.b32.xlu0 %v1661_v41, %s3949_s5 }
0x1962   :  { %v1664_v42 = vpop.permute.xlu0 %1663 }
0x1963   :  { %v1666_v44 = vadd.f32 %v1664_v42, %v4602_v58 }
0x1965   :  { %3742 = vtanh.f32 %v1666_v44 }
0x196f   :  { %v3743_v45 = vpop.eup %3742 }
0x1970   :  { %1670 = vrot.lane.b32.xlu1 %v3743_v45, %s3950_s6 }
0x19e2   :  { %v1671_v49 = vpop.permute.xlu1 %1670 }
0x19e3   :  { %v1673_v52 = vmul.f32 %v1671_v49, %v1668_v46 }
0x19e5   :  { %v1677_v59 = vadd.f32 %v1676_v50, %v1673_v52 }
0x19e7   :  { %v1679_v60 = vrot.slane %v1677_v59, 6  ;;  %v4734_v55 = vsel %vm2542_vm9, %v2545_v57, %v1677_v59 }
0x19e9   :  { %1680 = vrot.lane.b32.xlu0 %v1679_v60, %s3950_s6 }
0x1a5b   :  { %v1681_v0 = vpop.permute.xlu0 %1680 }
0x1a5c   :  { %3336 = vmatmul.mubr.msk.f32.vlgmr.msra.gmra.mrb[14].mxu0 %vm711_vm14, %v1681_v0 }
0x1a5d   :  { %3622 = vmatpush3.bf16.msra.mxu0 %v4566_v30  ;;  %3357 = vmatprep.mubr.msk.f32.mxu0 %vm3947_vm13, %v3948_v33 }
0x1a5e   :  { %3623 = vmatprep.subr.bf16.mxu0 %v3946_v18 }
0x1a61   :  { %3625 = vmatpush3.bf16.msra.mxu0 %v4572_v32 }
0x1a62   :  { %3632 = vmatprep.subr.bf16.mxu0 %v3946_v18 }
0x1b2f   :  { %v1750_v58 = vpop.f32.mrb[14].mxu0 }
0x1b30   :  { %v1761_v62 = vadd.f32 %v1750_v58, %v4608_v51  ;;  %v3337_v63 = vpop.f32.mrb[15].mxu0  ;;  %v1754_v1 = vadd.f32 %v1750_v58, %v4606_v43 }
0x1b32   :  { %1763 = vrot.lane.b32.xlu1 %v1761_v62, %s3949_s5  ;;  %v1755_v4 = vsub.f32 0.0, %v1754_v1 }
0x1b34   :  { %v1756_v9 = vmul.f32 1.442695, %v1755_v4 }
0x1b36   :  { %3744 = vpow2.f32 %v1756_v9 }
0x1b40   :  { %v3745_v10 = vpop.eup %3744 }
0x1b41   :  { %v1758_v11 = vadd.f32 1.0, %v3745_v10 }
0x1b43   :  { %3746 = vrcp.f32 %v1758_v11 }
0x1b4d   :  { %v3747_v12 = vpop.eup %3746 }
0x1b4e   :  { %v1773_v21 = vsub.f32 1.0, %v3747_v12  ;;  %v1780_v23 = vmul.f32 %v3747_v12, %v1679_v60 }
0x1ba4   :  { %v1764_v13 = vpop.permute.xlu1 %1763 }
0x1ba5   :  { %v1766_v14 = vmul.f32 %v3747_v12, %v1764_v13 }
0x1ba7   :  { %1768 = vrot.lane.b32.xlu0 %v1766_v14, %s3949_s5 }
0x1c19   :  { %v1769_v15 = vpop.permute.xlu0 %1768 }
0x1c1a   :  { %v1771_v16 = vadd.f32 %v1769_v15, %v4606_v43 }
0x1c1c   :  { %3748 = vtanh.f32 %v1771_v16 }
0x1c26   :  { %v3749_v17 = vpop.eup %3748 }
0x1c27   :  { %1775 = vrot.lane.b32.xlu1 %v3749_v17, %s3950_s6 }
0x1c99   :  { %v1776_v22 = vpop.permute.xlu1 %1775 }
0x1c9a   :  { %v1778_v24 = vmul.f32 %v1776_v22, %v1773_v21 }
0x1c9c   :  { %v4750_v27 = vadd.f32 %v1780_v23, %v1778_v24 }
0x1c9e   :  { %1783 = vrot.lane.b32.xlu0 %v4750_v27, %s3950_s6  ;;  %v1886_v44 = vrot.slane %v4750_v27, 6 }
0x1d10   :  { %v1784_v53 = vpop.permute.xlu0 %1783 }
0x1d11   :  { %3347 = vmatmul.mubr.msk.f32.vlgmr.msra.gmra.mrb[26].mxu1 %vm711_vm14, %v1784_v53 }
0x1d12   :  { %3628 = vmatpush3.bf16.msra.mxu1 %v4566_v30  ;;  %3368 = vmatprep.mubr.msk.f32.mxu1 %vm3947_vm13, %v3948_v33 }
0x1d13   :  { %3629 = vmatprep.subr.bf16.mxu1 %v3946_v18 }
0x1d16   :  { %3631 = vmatpush3.bf16.msra.mxu1 %v4572_v32 }
0x1d17   :  { %3638 = vmatprep.subr.bf16.mxu1 %v3946_v18 }
0x1de4   :  { %v1853_v54 = vpop.f32.mrb[26].mxu1 }
0x1de5   :  { %v1867_v57 = vadd.f32 %v1853_v54, %v4608_v51  ;;  %v3348_v25 = vpop.f32.mrb[27].mxu1  ;;  %v1858_v28 = vrot.slane %v1853_v54, 6 }
0x1de7   :  { %v1869_v26 = vrot.slane %v1867_v57, 6  ;;  %v1860_v29 = vadd.f32 %v1858_v28, %v4606_v43 }
0x1de9   :  { %1870 = vrot.lane.b32.xlu1 %v1869_v26, %s3949_s5  ;;  %v1861_v56 = vsub.f32 0.0, %v1860_v29 }
0x1deb   :  { %v1862_v31 = vmul.f32 1.442695, %v1861_v56 }
0x1ded   :  { %3750 = vpow2.f32 %v1862_v31 }
0x1df7   :  { %v3751_v34 = vpop.eup %3750 }
0x1df8   :  { %v1864_v35 = vadd.f32 1.0, %v3751_v34 }
0x1dfa   :  { %3752 = vrcp.f32 %v1864_v35 }
0x1e04   :  { %v3753_v36 = vpop.eup %3752 }
0x1e05   :  { %v1880_v42 = vsub.f32 1.0, %v3753_v36  ;;  %v1888_v48 = vmul.f32 %v3753_v36, %v1886_v44 }
0x1e5b   :  { %v1871_v37 = vpop.permute.xlu1 %1870 }
0x1e5c   :  { %v1873_v38 = vmul.f32 %v3753_v36, %v1871_v37 }
0x1e5e   :  { %1875 = vrot.lane.b32.xlu0 %v1873_v38, %s3949_s5 }
0x1ed0   :  { %v1876_v39 = vpop.permute.xlu0 %1875 }
0x1ed1   :  { %v1878_v40 = vadd.f32 %v1876_v39, %v4606_v43 }
0x1ed3   :  { %3754 = vtanh.f32 %v1878_v40 }
0x1edd   :  { %v3755_v41 = vpop.eup %3754 }
0x1ede   :  { %1882 = vrot.lane.b32.xlu1 %v3755_v41, %s3950_s6 }
0x1f50   :  { %v1883_v45 = vpop.permute.xlu1 %1882 }
0x1f51   :  { %v1885_v46 = vmul.f32 %v1883_v45, %v1880_v42 }
0x1f53   :  { %v1889_v49 = vadd.f32 %v1888_v48, %v1885_v46 }
0x1f55   :  { %v1891_v50 = vrot.slane %v1889_v49, 2  ;;  %v1995_v21 = vrot.slane %v1889_v49, 6  ;;  %v2547_v54 = vsel %vm2538_vm15, %v4750_v27, %v1889_v49 }
0x1f57   :  { %1892 = vrot.lane.b32.xlu0 %v1891_v50, %s3950_s6 }
0x1fc9   :  { %v1893_v52 = vpop.permute.xlu0 %1892 }
0x1fca   :  { %3358 = vmatmul.mubr.msk.f32.vlgmr.msra.gmra.mrb[16].mxu0 %vm711_vm14, %v1893_v52 }
0x1fcb   :  { %3634 = vmatpush3.bf16.msra.mxu0 %v4566_v30  ;;  %3379 = vmatprep.mubr.msk.f32.mxu0 %vm3947_vm13, %v3948_v33 }
0x1fcc   :  { %3635 = vmatprep.subr.bf16.mxu0 %v3946_v18 }
0x1fcf   :  { %3637 = vmatpush3.bf16.msra.mxu0 %v4572_v32 }
0x1fd0   :  { %3644 = vmatprep.subr.bf16.mxu0 %v3946_v18 }
0x209d   :  { %v1962_v59 = vpop.f32.mrb[16].mxu0 }
0x209e   :  { %v1976_v60 = vadd.f32 %v1962_v59, %v4608_v51  ;;  %v3359_v0 = vpop.f32.mrb[17].mxu0  ;;  %v1967_v62 = vrot.slane %v1962_v59, 4 }
0x20a0   :  { %v1978_v58 = vrot.slane %v1976_v60, 4  ;;  %v1969_v63 = vadd.f32 %v1967_v62, %v4606_v43 }
0x20a2   :  { %1979 = vrot.lane.b32.xlu1 %v1978_v58, %s3949_s5  ;;  %v1970_v1 = vsub.f32 0.0, %v1969_v63 }
0x20a4   :  { %v1971_v4 = vmul.f32 1.442695, %v1970_v1 }
0x20a6   :  { %3756 = vpow2.f32 %v1971_v4 }
0x20b0   :  { %v3757_v9 = vpop.eup %3756 }
0x20b1   :  { %v1973_v10 = vadd.f32 1.0, %v3757_v9 }
0x20b3   :  { %3758 = vrcp.f32 %v1973_v10 }
0x20bd   :  { %v3759_v11 = vpop.eup %3758 }
0x20be   :  { %v1989_v17 = vsub.f32 1.0, %v3759_v11  ;;  %v1997_v23 = vmul.f32 %v3759_v11, %v1995_v21 }
0x2114   :  { %v1980_v12 = vpop.permute.xlu1 %1979 }
0x2115   :  { %v1982_v13 = vmul.f32 %v3759_v11, %v1980_v12 }
0x2117   :  { %1984 = vrot.lane.b32.xlu0 %v1982_v13, %s3949_s5 }
0x2189   :  { %v1985_v14 = vpop.permute.xlu0 %1984 }
0x218a   :  { %v1987_v15 = vadd.f32 %v1985_v14, %v4606_v43 }
0x218c   :  { %3760 = vtanh.f32 %v1987_v15 }
0x2196   :  { %v3761_v16 = vpop.eup %3760 }
0x2197   :  { %1991 = vrot.lane.b32.xlu1 %v3761_v16, %s3950_s6 }
0x2209   :  { %v1992_v22 = vpop.permute.xlu1 %1991 }
0x220a   :  { %v1994_v24 = vmul.f32 %v1992_v22, %v1989_v17 }
0x220c   :  { %v1998_v53 = vadd.f32 %v1997_v23, %v1994_v24 }
0x220e   :  { %v2000_v57 = vrot.slane %v1998_v53, 4  ;;  %v2548_v25 = vsel %vm2540_vm0, %v2547_v54, %v1998_v53  ;;  %v2104_v48 = vrot.slane %v1998_v53, 6 }
0x2210   :  { %2001 = vrot.lane.b32.xlu0 %v2000_v57, %s3950_s6 }
0x2282   :  { %v2002_v26 = vpop.permute.xlu0 %2001 }
0x2283   :  { %3369 = vmatmul.mubr.msk.f32.vlgmr.msra.gmra.mrb[28].mxu1 %vm711_vm14, %v2002_v26 }
0x2284   :  { %3640 = vmatpush3.bf16.msra.mxu1 %v4566_v30  ;;  %3390 = vmatprep.mubr.msk.f32.mxu1 %vm3947_vm13, %v3948_v33 }
0x2285   :  { %3641 = vmatprep.subr.bf16.mxu1 %v3946_v18 }
0x2288   :  { %3643 = vmatpush3.bf16.msra.mxu1 %v4572_v32 }
0x2289   :  { %3650 = vmatprep.subr.bf16.mxu1 %v3946_v18 }
0x2356   :  { %v2071_v27 = vpop.f32.mrb[28].mxu1 }
0x2357   :  { %v2085_v28 = vadd.f32 %v2071_v27, %v4608_v51  ;;  %v3370_v29 = vpop.f32.mrb[29].mxu1  ;;  %v2076_v31 = vrot.slane %v2071_v27, 2 }
0x2359   :  { %v2087_v56 = vrot.slane %v2085_v28, 2  ;;  %v2078_v34 = vadd.f32 %v2076_v31, %v4606_v43 }
0x235b   :  { %2088 = vrot.lane.b32.xlu1 %v2087_v56, %s3949_s5  ;;  %v2079_v35 = vsub.f32 0.0, %v2078_v34 }
0x235d   :  { %v2080_v36 = vmul.f32 1.442695, %v2079_v35 }
0x235f   :  { %3762 = vpow2.f32 %v2080_v36 }
0x2369   :  { %v3763_v37 = vpop.eup %3762 }
0x236a   :  { %v2082_v38 = vadd.f32 1.0, %v3763_v37 }
0x236c   :  { %3764 = vrcp.f32 %v2082_v38 }
0x2376   :  { %v3765_v39 = vpop.eup %3764 }
0x2377   :  { %v2098_v46 = vsub.f32 1.0, %v3765_v39  ;;  %v2106_v50 = vmul.f32 %v3765_v39, %v2104_v48 }
0x23cd   :  { %v2089_v40 = vpop.permute.xlu1 %2088 }
0x23ce   :  { %v2091_v41 = vmul.f32 %v3765_v39, %v2089_v40 }
0x23d0   :  { %2093 = vrot.lane.b32.xlu0 %v2091_v41, %s3949_s5 }
0x2442   :  { %v2094_v42 = vpop.permute.xlu0 %2093 }
0x2443   :  { %v2096_v44 = vadd.f32 %v2094_v42, %v4606_v43 }
0x2445   :  { %3766 = vtanh.f32 %v2096_v44 }
0x244f   :  { %v3767_v45 = vpop.eup %3766 }
0x2450   :  { %2100 = vrot.lane.b32.xlu1 %v3767_v45, %s3950_s6 }
0x24c2   :  { %v2101_v49 = vpop.permute.xlu1 %2100 }
0x24c3   :  { %v2103_v52 = vmul.f32 %v2101_v49, %v2098_v46 }
0x24c5   :  { %v2107_v59 = vadd.f32 %v2106_v50, %v2103_v52 }
0x24c7   :  { %v2109_v60 = vrot.slane %v2107_v59, 6  ;;  %v4800_v0 = vsel %vm2542_vm9, %v2548_v25, %v2107_v59 }
0x24c9   :  { %2110 = vrot.lane.b32.xlu0 %v2109_v60, %s3950_s6 }
0x253b   :  { %v2111_v58 = vpop.permute.xlu0 %2110 }
0x253c   :  { %3380 = vmatmul.mubr.msk.f32.vlgmr.msra.gmra.mrb[18].mxu0 %vm711_vm14, %v2111_v58 }
0x253d   :  { %3646 = vmatpush3.bf16.msra.mxu0 %v4566_v30  ;;  %3401 = vmatprep.mubr.msk.f32.mxu0 %vm3947_vm13, %v3948_v33 }
0x253e   :  { %3647 = vmatprep.subr.bf16.mxu0 %v3946_v18 }
0x2541   :  { %3649 = vmatpush3.bf16.msra.mxu0 %v4572_v32 }
0x260f   :  { %v2180_v43 = vpop.f32.mrb[18].mxu0 }
0x2610   :  { %v2191_v62 = vadd.f32 %v2180_v43, %v4608_v51  ;;  %v3381_v63 = vpop.f32.mrb[19].mxu0  ;;  %v2184_v1 = vadd.f32 %v2180_v43, %v4604_v61 }
0x2612   :  { %2193 = vrot.lane.b32.xlu1 %v2191_v62, %s3949_s5  ;;  %v2185_v4 = vsub.f32 0.0, %v2184_v1 }
0x2614   :  { %v2186_v9 = vmul.f32 1.442695, %v2185_v4 }
0x2616   :  { %3768 = vpow2.f32 %v2186_v9 }
0x2620   :  { %v3769_v10 = vpop.eup %3768 }
0x2621   :  { %v2188_v11 = vadd.f32 1.0, %v3769_v10 }
0x2623   :  { %3770 = vrcp.f32 %v2188_v11 }
0x262d   :  { %v3771_v12 = vpop.eup %3770 }
0x262e   :  { %v2203_v21 = vsub.f32 1.0, %v3771_v12  ;;  %v2210_v23 = vmul.f32 %v3771_v12, %v2109_v60 }
0x2684   :  { %v2194_v13 = vpop.permute.xlu1 %2193 }
0x2685   :  { %v2196_v14 = vmul.f32 %v3771_v12, %v2194_v13 }
0x2687   :  { %2198 = vrot.lane.b32.xlu0 %v2196_v14, %s3949_s5 }
0x26f9   :  { %v2199_v15 = vpop.permute.xlu0 %2198 }
0x26fa   :  { %v2201_v16 = vadd.f32 %v2199_v15, %v4604_v61 }
0x26fc   :  { %3772 = vtanh.f32 %v2201_v16 }
0x2706   :  { %v3773_v17 = vpop.eup %3772 }
0x2707   :  { %2205 = vrot.lane.b32.xlu1 %v3773_v17, %s3950_s6 }
0x2779   :  { %v2206_v22 = vpop.permute.xlu1 %2205 }
0x277a   :  { %v2208_v24 = vmul.f32 %v2206_v22, %v2203_v21 }
0x277c   :  { %v4815_v53 = vadd.f32 %v2210_v23, %v2208_v24 }
0x277e   :  { %2213 = vrot.lane.b32.xlu0 %v4815_v53, %s3950_s6  ;;  %v2316_v41 = vrot.slane %v4815_v53, 6 }
0x27f0   :  { %v2214_v54 = vpop.permute.xlu0 %2213 }
0x27f1   :  { %3391 = vmatmul.mubr.msk.f32.vlgmr.msra.gmra.mrb[30].mxu1 %vm711_vm14, %v2214_v54 }
0x27f2   :  { %3652 = vmatpush3.bf16.msra.mxu1 %v4566_v30  ;;  %3412 = vmatprep.mubr.msk.f32.mxu1 %vm3947_vm13, %v3948_v33 }
0x27f3   :  { %3653 = vmatprep.subr.bf16.mxu1 %v3946_v18 }
0x27f6   :  { %3655 = vmatpush3.bf16.msra.mxu1 %v4572_v32 }
0x27f7   :  { %3664 = vmatprep.subr.bf16.mxu1 %v3946_v18 }
0x28c4   :  { %v2283_v57 = vpop.f32.mrb[30].mxu1 }
0x28c5   :  { %v2297_v25 = vadd.f32 %v2283_v57, %v4608_v51  ;;  %v3392_v26 = vpop.f32.mrb[31].mxu1  ;;  %v2288_v28 = vrot.slane %v2283_v57, 6 }
0x28c7   :  { %v2299_v27 = vrot.slane %v2297_v25, 6  ;;  %v2290_v29 = vadd.f32 %v2288_v28, %v4604_v61 }
0x28c9   :  { %2300 = vrot.lane.b32.xlu1 %v2299_v27, %s3949_s5  ;;  %v2291_v30 = vsub.f32 0.0, %v2290_v29 }
0x28cb   :  { %v2292_v56 = vmul.f32 1.442695, %v2291_v30 }
0x28cd   :  { %3774 = vpow2.f32 %v2292_v56 }
0x28d7   :  { %v3775_v31 = vpop.eup %3774 }
0x28d8   :  { %v2294_v34 = vadd.f32 1.0, %v3775_v31 }
0x28da   :  { %3776 = vrcp.f32 %v2294_v34 }
0x28e4   :  { %v3777_v35 = vpop.eup %3776 }
0x28e5   :  { %v2310_v40 = vsub.f32 1.0, %v3777_v35  ;;  %v2318_v45 = vmul.f32 %v3777_v35, %v2316_v41 }
0x293b   :  { %v2301_v32 = vpop.permute.xlu1 %2300 }
0x293c   :  { %v2303_v36 = vmul.f32 %v3777_v35, %v2301_v32 }
0x293e   :  { %2305 = vrot.lane.b32.xlu0 %v2303_v36, %s3949_s5 }
0x29b0   :  { %v2306_v37 = vpop.permute.xlu0 %2305 }
0x29b1   :  { %v2308_v38 = vadd.f32 %v2306_v37, %v4604_v61 }
0x29b3   :  { %3778 = vtanh.f32 %v2308_v38 }
0x29bd   :  { %v3779_v39 = vpop.eup %3778 }
0x29be   :  { %2312 = vrot.lane.b32.xlu1 %v3779_v39, %s3950_s6  ;;  %v2555_v39 = vld [vmem:[#allocation9 + $0x10] sm:$0xff] }
0x2a30   :  { %v2313_v42 = vpop.permute.xlu1 %2312 }
0x2a31   :  { %v2315_v44 = vmul.f32 %v2313_v42, %v2310_v40  ;;  %v2556_v40 = vld [vmem:[#allocation9 + $0x18] sm:$0xff] }
0x2a32   :  { %v3660_v42 = vpack.c.bf16 %v2556_v40, %v2555_v39 }
0x2a33   :  { %v2319_v46 = vadd.f32 %v2318_v45, %v2315_v44 }
0x2a35   :  { %v2321_v48 = vrot.slane %v2319_v46, 2  ;;  %v2425_v16 = vrot.slane %v2319_v46, 6  ;;  %v2550_v24 = vsel %vm2538_vm15, %v4815_v53, %v2319_v46 }
0x2a37   :  { %2322 = vrot.lane.b32.xlu0 %v2321_v48, %s3950_s6 }
0x2aa9   :  { %v2323_v49 = vpop.permute.xlu0 %2322 }
0x2aaa   :  { %3402 = vmatmul.mubr.msk.f32.vlgmr.msra.gmra.mrb[20].mxu0 %vm711_vm14, %v2323_v49 }
0x2b7d   :  { %v2392_v50 = vpop.f32.mrb[20].mxu0 }
0x2b7e   :  { %v2406_v52 = vadd.f32 %v2392_v50, %v4608_v51  ;;  %v3403_v59 = vpop.f32.mrb[21].mxu0  ;;  %v2397_v58 = vrot.slane %v2392_v50, 4 }
0x2b80   :  { %v2408_v60 = vrot.slane %v2406_v52, 4  ;;  %v2399_v43 = vadd.f32 %v2397_v58, %v4604_v61 }
0x2b82   :  { %2409 = vrot.lane.b32.xlu1 %v2408_v60, %s3949_s5  ;;  %v2400_v62 = vsub.f32 0.0, %v2399_v43 }
0x2b84   :  { %v2401_v63 = vmul.f32 1.442695, %v2400_v62 }
0x2b86   :  { %3780 = vpow2.f32 %v2401_v63 }
0x2b90   :  { %v3781_v1 = vpop.eup %3780 }
0x2b91   :  { %v2403_v4 = vadd.f32 1.0, %v3781_v1 }
0x2b93   :  { %3782 = vrcp.f32 %v2403_v4 }
0x2b9d   :  { %v3783_v9 = vpop.eup %3782 }
0x2b9e   :  { %v2419_v15 = vsub.f32 1.0, %v3783_v9  ;;  %v2427_v21 = vmul.f32 %v3783_v9, %v2425_v16 }
0x2bf4   :  { %v2410_v10 = vpop.permute.xlu1 %2409 }
0x2bf5   :  { %v2412_v11 = vmul.f32 %v3783_v9, %v2410_v10 }
0x2bf7   :  { %2414 = vrot.lane.b32.xlu0 %v2412_v11, %s3949_s5 }
0x2c69   :  { %v2415_v12 = vpop.permute.xlu0 %2414 }
0x2c6a   :  { %v2417_v13 = vadd.f32 %v2415_v12, %v4604_v61 }
0x2c6c   :  { %3784 = vtanh.f32 %v2417_v13 }
0x2c76   :  { %v3785_v14 = vpop.eup %3784 }
0x2c77   :  { %2421 = vrot.lane.b32.xlu1 %v3785_v14, %s3950_s6 }
0x2ce9   :  { %v2422_v17 = vpop.permute.xlu1 %2421 }
0x2cea   :  { %v2424_v22 = vmul.f32 %v2422_v17, %v2419_v15 }
0x2cec   :  { %v2428_v23 = vadd.f32 %v2427_v21, %v2424_v22 }
0x2cee   :  { %v2430_v54 = vrot.slane %v2428_v23, 4  ;;  %v2551_v57 = vsel %vm2540_vm0, %v2550_v24, %v2428_v23 }
0x2cf0   :  { %2431 = vrot.lane.b32.xlu0 %v2430_v54, %s3950_s6 }
0x2d62   :  { %v2432_v25 = vpop.permute.xlu0 %2431 }
0x2d63   :  { %3413 = vmatmul.mubr.msk.f32.vlgmr.msra.gmra.mrb[32].mxu1 %vm711_vm14, %v2432_v25 }
0x2d64   :  { %3437 = vmatprep.mubr.msk.f32.mxu1 %vm3947_vm13, %v3948_v33  ;;  %v2553_v33 = vld [vmem:[#allocation9] sm:$0xff] }
0x2e36   :  { %v2501_v26 = vpop.f32.mrb[32].mxu1 }
0x2e37   :  { %v2515_v27 = vadd.f32 %v2501_v26, %v4608_v51  ;;  %v3414_v28 = vpop.f32.mrb[33].mxu1  ;;  %v2506_v30 = vrot.slane %v2501_v26, 2  ;;  %v2554_v51 = vld [vmem:[#allocation9 + $0x8] sm:$0xff] }
0x2e38   :  { %v3656_v38 = vpack.c.bf16 %v2554_v51, %v2553_v33 }
0x2e39   :  { %v2517_v29 = vrot.slane %v2515_v27, 2  ;;  %v2508_v53 = vadd.f32 %v2506_v30, %v4604_v61 }
0x2e3a   :  { %3657 = vmatprep.subr.bf16.mxu0 %v3656_v38 }
0x2e3b   :  { %2518 = vrot.lane.b32.xlu1 %v2517_v29, %s3949_s5  ;;  %v2509_v56 = vsub.f32 0.0, %v2508_v53  ;;  %3659 = vmatpush3.bf16.msra.mxu0 %v3656_v38  ;;  %v3952_v53 = vmov 0  }
0x2e3c   :  { %3661 = vmatprep.subr.bf16.mxu0 %v3660_v42  ;;  %3687 = vset.pattern.permute.xlu0 %v3952_v53 }
0x2e3d   :  { %v2510_v31 = vmul.f32 1.442695, %v2509_v56  ;;  %3686 = vset.pattern.permute.xlu1 %v3952_v53 }
0x2e3f   :  { %3786 = vpow2.f32 %v2510_v31  ;;  %3663 = vmatpush3.bf16.msra.mxu0 %v3660_v42 }
0x2e49   :  { %v3787_v34 = vpop.eup %3786 }
0x2e4a   :  { %v2512_v35 = vadd.f32 1.0, %v3787_v34  ;;  %v3043_v34 = vld [vmem:[#allocation2] ss:$0 sm:$0xff] }
0x2e4c   :  { %3788 = vrcp.f32 %v2512_v35 }
0x2e56   :  { %v3789_v32 = vpop.eup %3788 }
0x2e57   :  { %v2528_v46 = vsub.f32 1.0, %v3789_v32 }
0x2ead   :  { %v2519_v36 = vpop.permute.xlu1 %2518 }
0x2eae   :  { %v2521_v37 = vmul.f32 %v3789_v32, %v2519_v36 }
0x2eb0   :  { %2523 = vrot.lane.b32.xlu0 %v2521_v37, %s3949_s5 }
0x2eb4   :  { %2568 = vrot.lane.b32.xlu0 %v4668_v47, %s3950_s6  ;;  %v3042_v47 = vld [vmem:[%s4996_s11] ss:$0 sm:$0xff] }
0x2eb8   :  { %2572 = vrot.lane.b32.xlu0 %v4800_v0, %s3950_s6 }
0x2ebc   :  { %2679 = vrot.lane.b32.xlu0 %v3042_v47, %s3951_s25 }
0x2f22   :  { %v2524_v41 = vpop.permute.xlu0 %2523 }
0x2f23   :  { %v2526_v44 = vadd.f32 %v2524_v41, %v4604_v61  ;;  %v2534_v61 = vrot.slane %v2428_v23, 6 }
0x2f25   :  { %3790 = vtanh.f32 %v2526_v44  ;;  %v2536_v49 = vmul.f32 %v3789_v32, %v2534_v61 }
0x2f26   :  { %v2569_v45 = vpop.permute.xlu0 %2568 }
0x2f27   :  { %3423 = vmatprep.mubr.msk.f32.mxu0 %vm711_vm14, %v2569_v45 }
0x2f2a   :  { %v2573_v60 = vpop.permute.xlu0 %2572 }
0x2f2e   :  { %v2680_v9 = vpop.permute.xlu0 %2679 }
0x2f2f   :  { %v3791_v0 = vpop.eup %3790 }
0x2f30   :  { %2530 = vrot.lane.b32.xlu1 %v3791_v0, %s3950_s6 }
0x2f34   :  { %2570 = vrot.lane.b32.xlu1 %v4734_v55, %s3950_s6  ;;  %v3037_v55 = vld [vmem:[%s4995_s10] ss:$0 sm:$0xff] }
0x2fa2   :  { %v2531_v48 = vpop.permute.xlu1 %2530 }
0x2fa3   :  { %v2533_v50 = vmul.f32 %v2531_v48, %v2528_v46 }
0x2fa5   :  { %v2537_v52 = vadd.f32 %v2536_v49, %v2533_v50 }
0x2fa6   :  { %v2571_v59 = vpop.permute.xlu1 %2570 }
0x2fa7   :  { %3424 = vmatmul.mubr.msk.f32.vlgmr.msra.gmra.mrb[22].mxu0 %vm711_vm14, %v2571_v59  ;;  %v2552_v58 = vsel %vm2542_vm9, %v2551_v57, %v2537_v52 }
0x2fa8   :  { %2574 = vrot.lane.b32.xlu1 %v2552_v58, %s3950_s6  ;;  %3426 = vmatprep.mubr.msk.f32.mxu0 %vm711_vm14, %v2573_v60 }
0x301a   :  { %v2575_v43 = vpop.permute.xlu1 %2574 }
0x301b   :  { %3427 = vmatmul.mubr.msk.f32.gmra.mrb[24].mxu0 %vm711_vm14, %v2575_v43 }
0x307a   :  { %v3425_v62 = vpop.f32.mrb[22].mxu0 }
0x307b   :  { %v4872_v63 = vadd.f32 %v3425_v62, %v3037_v55  ;;  %v2650_v1 = vpop.f32.mrb[23].mxu0 }
0x307c   :  { %v4874_v4 = vadd.f32 %v3037_v55, %v2650_v1 }
0x307d   :  { %3792 = vtanh.f32 %v4872_v63 }
0x307e   :  { %3794 = vtanh.f32 %v4874_v4 }
0x3087   :  { %v3793_v10 = vpop.eup %3792 }
0x3088   :  { %v3795_v11 = vpop.eup %3794  ;;  %v2683_v12 = vmul.f32 %v3793_v10, %v2680_v9 }
0x3089   :  { %v2682_v13 = vmul.f32 %v3795_v11, %v2680_v9 }
0x308a   :  { %2692 = vrot.lane.b32.xlu0 %v2683_v12, %s3950_s6 }
0x308b   :  { %2690 = vrot.lane.b32.xlu1 %v2682_v13, %s3950_s6 }
0x30ee   :  { %v3428_v14 = vpop.f32.mrb[24].mxu0 }
0x30ef   :  { %v4880_v15 = vadd.f32 %v3428_v14, %v3037_v55  ;;  %v2660_v16 = vpop.f32.mrb[25].mxu0 }
0x30f0   :  { %v4882_v17 = vadd.f32 %v3037_v55, %v2660_v16 }
0x30f1   :  { %3796 = vtanh.f32 %v4880_v15 }
0x30f2   :  { %3798 = vtanh.f32 %v4882_v17 }
0x30fb   :  { %v3797_v21 = vpop.eup %3796 }
0x30fc   :  { %v3799_v22 = vpop.eup %3798  ;;  %v2685_v23 = vmul.f32 %v3797_v21, %v2680_v9  ;;  %v2693_v54 = vpop.permute.xlu0 %2692 }
0x30fd   :  { %v2684_v24 = vmul.f32 %v3799_v22, %v2680_v9  ;;  %v2705_v57 = vsel %vm711_vm14, %v2693_v54, 0.0  ;;  %v2691_v25 = vpop.permute.xlu1 %2690 }
0x30fe   :  { %2696 = vrot.lane.b32.xlu0 %v2685_v23, %s3950_s6  ;;  %v2702_v26 = vsel %vm711_vm14, %v2691_v25, 0.0 }
0x30ff   :  { %2694 = vrot.lane.b32.xlu1 %v2684_v24, %s3950_s6 }
0x311d   :  { %2706 = vadd.xlane.f32.xlu0 %v2705_v57 }
0x3123   :  { %2703 = vadd.xlane.f32.xlu1 %v2702_v26 }
0x3170   :  { %v2697_v29 = vpop.permute.xlu0 %2696 }
0x3171   :  { %v2695_v27 = vpop.permute.xlu1 %2694  ;;  %v2711_v30 = vsel %vm711_vm14, %v2697_v29, 0.0 }
0x3172   :  { %v2708_v28 = vsel %vm711_vm14, %v2695_v27, 0.0 }
0x3173   :  { %2709 = vadd.xlane.f32.xlu0 %v2708_v28 }
0x3177   :  { %2712 = vadd.xlane.f32.xlu0 %v2711_v30 }
0x31aa   :  { %v2707_v56 = vpop.xlane.xlu0 %2706 }
0x31ab   :  { %v2722_v32 = vadd.f32 %v3043_v34, %v2707_v56 }
0x31ad   :  { %v2726_v38 = vsel %vm4399_vm1, %v2722_v32, -inf  ;;  %v2817_v39 = vsel %vm4403_vm2, %v2722_v32, -inf }
0x31ae   :  { %v2731_v0 = vsel %vm2729_vm10, %v2726_v38, -inf  ;;  %v2821_v46 = vsel %vm2729_vm10, %v2817_v39, -inf }
0x31b0   :  { %v2704_v31 = vpop.xlane.xlu1 %2703 }
0x31b1   :  { %v2721_v35 = vadd.f32 %v3043_v34, %v2704_v31 }
0x31b3   :  { %v2725_v33 = vsel %vm4407_vm3, %v2721_v35, -inf  ;;  %v2816_v51 = vsel %vm4411_vm4, %v2721_v35, -inf }
0x31b4   :  { %v2730_v45 = vsel %vm2729_vm10, %v2725_v33, -inf  ;;  %v2820_v47 = vsel %vm2729_vm10, %v2816_v51, -inf }
0x31b5   :  { %v2734_v60 = vmax.f32 %v2730_v45, %v2731_v0  ;;  %v2824_v58 = vmax.f32 %v2820_v47, %v2821_v46 }
0x3200   :  { %v2710_v36 = vpop.xlane.xlu0 %2709 }
0x3201   :  { %v2723_v37 = vadd.f32 %v3043_v34, %v2710_v36 }
0x3203   :  { %v2727_v41 = vsel %vm4415_vm5, %v2723_v37, -inf  ;;  %v2818_v42 = vsel %vm4419_vm6, %v2723_v37, -inf }
0x3204   :  { %v2713_v40 = vpop.xlane.xlu0 %2712  ;;  %v2732_v49 = vsel %vm2729_vm10, %v2727_v41, -inf  ;;  %v2822_v50 = vsel %vm2729_vm10, %v2818_v42, -inf }
0x3205   :  { %v2724_v44 = vadd.f32 %v3043_v34, %v2713_v40 }
0x3207   :  { %v2728_v61 = vsel %vm4435_vm7, %v2724_v44, -inf  ;;  %v2819_v48 = vsel %vm4439_vm8, %v2724_v44, -inf }
0x3208   :  { %v2733_v52 = vsel %vm2729_vm10, %v2728_v61, -inf  ;;  %v2823_v59 = vsel %vm2729_vm10, %v2819_v48, -inf }
0x3209   :  { %v2735_v43 = vmax.f32 %v2732_v49, %v2733_v52  ;;  %v2825_v55 = vmax.f32 %v2822_v50, %v2823_v59 }
0x320b   :  { %v2736_v62 = vmax.f32 %v2734_v60, %v2735_v43  ;;  %v2826_v1 = vmax.f32 %v2824_v58, %v2825_v55 }
0x320d   :  { %v2737_v9 = vrot.slane %v2736_v62, 4  ;;  %v2827_v10 = vrot.slane %v2826_v1, 4 }
0x320f   :  { %v2738_v11 = vmax.f32 %v2736_v62, %v2737_v9  ;;  %v2828_v12 = vmax.f32 %v2826_v1, %v2827_v10 }
0x3211   :  { %v2739_v13 = vrot.slane %v2738_v11, 2  ;;  %v2829_v14 = vrot.slane %v2828_v12, 2 }
0x3213   :  { %v2740_v16 = vmax.f32 %v2738_v11, %v2739_v13  ;;  %v2830_v21 = vmax.f32 %v2828_v12, %v2829_v14 }
0x3215   :  { %v2741_v22 = vrot.slane %v2740_v16, 1  ;;  %v2831_v23 = vrot.slane %v2830_v21, 1 }
0x3217   :  { %v2742_v24 = vmax.f32 %v2740_v16, %v2741_v22  ;;  %v2832_v54 = vmax.f32 %v2830_v21, %v2831_v23 }
0x3219   :  { %v2746_v57 = vsub.f32 %v2724_v44, %v2742_v24  ;;  %v2836_v25 = vsub.f32 %v2724_v44, %v2832_v54  ;;  %v2744_v26 = vsub.f32 %v2722_v32, %v2742_v24  ;;  %v2743_v27 = vsub.f32 %v2721_v35, %v2742_v24 }
0x321a   :  { %v2833_v28 = vsub.f32 %v2721_v35, %v2832_v54  ;;  %v2834_v29 = vsub.f32 %v2722_v32, %v2832_v54  ;;  %v2745_v31 = vsub.f32 %v2723_v37, %v2742_v24  ;;  %v2835_v36 = vsub.f32 %v2723_v37, %v2832_v54  ;;  %v2908_v54 = vld [vmem:[%s4998_s13] sm:$0xff] }
0x321b   :  { %v2753_v30 = vmul.f32 1.442695, %v2746_v57  ;;  %v2843_v53 = vmul.f32 1.442695, %v2836_v25  ;;  %v2749_v56 = vmul.f32 1.442695, %v2744_v26 }
0x321c   :  { %v2747_v34 = vmul.f32 1.442695, %v2743_v27  ;;  %v2837_v33 = vmul.f32 1.442695, %v2833_v28  ;;  %v2839_v51 = vmul.f32 1.442695, %v2834_v29 }
0x321d   :  { %3800 = vpow2.f32 %v2753_v30  ;;  %v2751_v38 = vmul.f32 1.442695, %v2745_v31  ;;  %v2841_v39 = vmul.f32 1.442695, %v2835_v36  ;;  %v2909_v57 = vld [vmem:[%s4998_s13 + $0x8] sm:$0xff]  ;;  %v2910_v25 = vld [vmem:[%s4998_s13 + $0x10] sm:$0xff] }
0x321e   :  { %3802 = vpow2.f32 %v2843_v53  ;;  %v3665_v26 = vpack.c.bf16 %v2909_v57, %v2908_v54  ;;  %v2911_v27 = vld [vmem:[%s4998_s13 + $0x18] sm:$0xff] }
0x321f   :  { %3804 = vpow2.f32 %v2749_v56  ;;  %v3668_v28 = vpack.c.bf16 %v2911_v27, %v2910_v25 }
0x3220   :  { %3806 = vpow2.f32 %v2747_v34  ;;  %3666 = vmatpush3.bf16.msra.mxu1 %v3665_v26 }
0x3221   :  { %3808 = vpow2.f32 %v2837_v33  ;;  %3667 = vmatprep.subr.bf16.mxu1 %v3946_v18 }
0x3222   :  { %3810 = vpow2.f32 %v2839_v51 }
0x3223   :  { %3812 = vpow2.f32 %v2751_v38 }
0x3224   :  { %3814 = vpow2.f32 %v2841_v39  ;;  %3669 = vmatpush3.bf16.msra.mxu1 %v3668_v28 }
0x3227   :  { %v3801_v35 = vpop.eup %3800 }
0x3228   :  { %v3803_v32 = vpop.eup %3802  ;;  %v2758_v59 = vsel %vm4435_vm7, %v3801_v35, 0.0 }
0x3229   :  { %v3805_v40 = vpop.eup %3804  ;;  %v2848_v43 = vsel %vm4439_vm8, %v3803_v32, 0.0  ;;  %v2764_v7 = vsel %vm2729_vm10, %v2758_v59, 0.0 }
0x322a   :  { %v3807_v41 = vpop.eup %3806  ;;  %v2756_v42 = vsel %vm4399_vm1, %v3805_v40, 0.0  ;;  %v2854_v19 = vsel %vm2729_vm10, %v2848_v43, 0.0  ;;  %vm2906_vm1 = vcmask 1040384  }
0x322b   :  { %v3809_v37 = vpop.eup %3808  ;;  %2779 = vperm.xlu0 %3687, %v2756_v42   ;;  %v2760_v44 = vsel %vm2729_vm10, %v2756_v42, 0.0  ;;  %v2755_v45 = vsel %vm4407_vm3, %v3807_v41, 0.0 }
0x322c   :  { %v3811_v47 = vpop.eup %3810  ;;  %2774 = vperm.xlu1 %3686, %v2755_v45   ;;  %v2759_v0 = vsel %vm2729_vm10, %v2755_v45, 0.0  ;;  %v2845_v46 = vsel %vm4411_vm4, %v3809_v37, 0.0 }
0x322d   :  { %v3813_v61 = vpop.eup %3812  ;;  %v2761_v48 = vadd.f32 %v2760_v44, %v2759_v0  ;;  %v2849_v49 = vsel %vm2729_vm10, %v2845_v46, 0.0  ;;  %v2846_v2 = vsel %vm4403_vm2, %v3811_v47, 0.0  ;;  %vm2992_vm2 = vcmask 74752  }
0x322e   :  { %v3815_v50 = vpop.eup %3814  ;;  %v2850_v52 = vsel %vm2729_vm10, %v2846_v2, 0.0  ;;  %v2757_v5 = vsel %vm4415_vm5, %v3813_v61, 0.0 }
0x322f   :  { %v2851_v60 = vadd.f32 %v2850_v52, %v2849_v49  ;;  %v2762_v6 = vsel %vm2729_vm10, %v2757_v5, 0.0  ;;  %v2847_v58 = vsel %vm4419_vm6, %v3815_v50, 0.0 }
0x3230   :  { %2864 = vperm.xlu1 %3686, %v2845_v46   ;;  %v2763_v3 = vadd.f32 %v2762_v6, %v2761_v48  ;;  %v2852_v55 = vsel %vm2729_vm10, %v2847_v58, 0.0 }
0x3231   :  { %v2853_v62 = vadd.f32 %v2852_v55, %v2851_v60 }
0x3232   :  { %v2765_v1 = vadd.f32 %v2764_v7, %v2763_v3 }
0x3233   :  { %v2855_v9 = vadd.f32 %v2854_v19, %v2853_v62 }
0x3234   :  { %2869 = vperm.xlu1 %3686, %v2846_v2   ;;  %v2766_v10 = vrot.slane %v2765_v1, 4 }
0x3235   :  { %v2856_v12 = vrot.slane %v2855_v9, 4 }
0x3236   :  { %v2767_v11 = vadd.f32 %v2766_v10, %v2765_v1 }
0x3237   :  { %v2857_v13 = vadd.f32 %v2856_v12, %v2855_v9 }
0x3238   :  { %2784 = vperm.xlu1 %3686, %v2757_v5   ;;  %v2768_v8 = vrot.slane %v2767_v11, 2 }
0x3239   :  { %v2858_v14 = vrot.slane %v2857_v13, 2 }
0x323a   :  { %v2769_v20 = vadd.f32 %v2768_v8, %v2767_v11  ;;  %v3044_v8 = vld [vmem:[%s4999_s14] ss:$0 sm:$0xff] }
0x323b   :  { %v2859_v16 = vadd.f32 %v2858_v14, %v2857_v13 }
0x323c   :  { %2874 = vperm.xlu1 %3686, %v2847_v58   ;;  %v2770_v21 = vrot.slane %v2769_v20, 1 }
0x323d   :  { %v2860_v23 = vrot.slane %v2859_v16, 1 }
0x323e   :  { %v2771_v22 = vadd.f32 %v2770_v21, %v2769_v20 }
0x323f   :  { %v2861_v24 = vadd.f32 %v2860_v23, %v2859_v16 }
0x3240   :  { %2789 = vperm.xlu1 %3686, %v2758_v59  }
0x3244   :  { %2879 = vperm.xlu1 %3686, %v2848_v43  }
0x3248   :  { %2811 = vperm.xlu1 %3686, %v2771_v22  }
0x324c   :  { %2901 = vperm.xlu1 %3686, %v2861_v24  }
0x32aa   :  { %v2780_v56 = vpop.permute.xlu0 %2779 }
0x32ab   :  { %v2775_v29 = vpop.permute.xlu1 %2774  ;;  %v2793_v34 = vmul.f32 %v2780_v56, %v4872_v63 }
0x32ac   :  { %v2792_v36 = vmul.f32 %v2775_v29, %v4874_v4 }
0x32ad   :  { %v2797_v38 = vsel %vm711_vm14, %v2793_v34, 0.0 }
0x32ae   :  { %v2796_v39 = vsel %vm711_vm14, %v2792_v36, 0.0 }
0x32af   :  { %v2865_v30 = vpop.permute.xlu1 %2864  ;;  %v2798_v41 = vadd.f32 %v2797_v38, %v2796_v39 }
0x32b0   :  { %v2882_v18 = vmul.f32 %v2865_v30, %v4874_v4 }
0x32b2   :  { %v2886_v47 = vsel %vm711_vm14, %v2882_v18, 0.0 }
0x32b3   :  { %v2870_v53 = vpop.permute.xlu1 %2869 }
0x32b4   :  { %v2883_v35 = vmul.f32 %v2870_v53, %v4872_v63 }
0x32b6   :  { %v2887_v37 = vsel %vm711_vm14, %v2883_v35, 0.0 }
0x32b7   :  { %v2785_v31 = vpop.permute.xlu1 %2784  ;;  %v2888_v63 = vadd.f32 %v2887_v37, %v2886_v47 }
0x32b8   :  { %v2794_v33 = vmul.f32 %v2785_v31, %v4882_v17 }
0x32ba   :  { %v2799_v32 = vsel %vm711_vm14, %v2794_v33, 0.0 }
0x32bb   :  { %v2875_v51 = vpop.permute.xlu1 %2874  ;;  %v2800_v45 = vadd.f32 %v2799_v32, %v2798_v41 }
0x32bc   :  { %v2884_v40 = vmul.f32 %v2875_v51, %v4882_v17 }
0x32be   :  { %v2889_v0 = vsel %vm711_vm14, %v2884_v40, 0.0 }
0x32bf   :  { %v2790_v42 = vpop.permute.xlu1 %2789  ;;  %v2890_v49 = vadd.f32 %v2889_v0, %v2888_v63 }
0x32c0   :  { %v2795_v44 = vmul.f32 %v2790_v42, %v4880_v15 }
0x32c2   :  { %v2801_v46 = vsel %vm711_vm14, %v2795_v44, 0.0 }
0x32c3   :  { %v2802_v61 = vadd.f32 %v2801_v46, %v2800_v45  ;;  %v2880_v4 = vpop.permute.xlu1 %2879 }
0x32c4   :  { %v2885_v48 = vmul.f32 %v2880_v4, %v4880_v15 }
0x32c5   :  { %v2803_v17 = vrot.slane %v2802_v61, 4 }
0x32c6   :  { %v2891_v2 = vsel %vm711_vm14, %v2885_v48, 0.0 }
0x32c7   :  { %v2804_v50 = vadd.f32 %v2803_v17, %v2802_v61  ;;  %v2892_v52 = vadd.f32 %v2891_v2, %v2890_v49  ;;  %v2812_v5 = vpop.permute.xlu1 %2811 }
0x32c8   :  { %3816 = vrcp.f32 %v2812_v5 }
0x32c9   :  { %v2805_v59 = vrot.slane %v2804_v50, 2  ;;  %v2893_v60 = vrot.slane %v2892_v52, 4 }
0x32cb   :  { %v2894_v6 = vadd.f32 %v2893_v60, %v2892_v52  ;;  %v2902_v58 = vpop.permute.xlu1 %2901  ;;  %v2806_v43 = vadd.f32 %v2805_v59, %v2804_v50 }
0x32cc   :  { %3818 = vrcp.f32 %v2902_v58 }
0x32cd   :  { %v2895_v3 = vrot.slane %v2894_v6, 2  ;;  %v2807_v62 = vrot.slane %v2806_v43, 1 }
0x32cf   :  { %v2896_v55 = vadd.f32 %v2895_v3, %v2894_v6  ;;  %v2808_v15 = vadd.f32 %v2807_v62, %v2806_v43 }
0x32d1   :  { %v2897_v7 = vrot.slane %v2896_v55, 1 }
0x32d2   :  { %v3817_v1 = vpop.eup %3816 }
0x32d3   :  { %v2898_v19 = vadd.f32 %v2897_v7, %v2896_v55  ;;  %v2815_v10 = vmul.f32 %v3817_v1, %v2808_v15 }
0x32d6   :  { %v3819_v9 = vpop.eup %3818 }
0x32d7   :  { %v2905_v11 = vmul.f32 %v3819_v9, %v2898_v19 }
0x32d9   :  { %v2907_v12 = vsel %vm2906_vm1, %v2815_v10, %v2905_v11 }
0x32da   :  { %3438 = vmatmul.mubr.msk.f32.vlgmr.msra.gmra.mrb[34].mxu1 %vm711_vm14, %v2907_v12 }
0x33ad   :  { %v2988_v13 = vpop.f32.mrb[34].mxu1 }
0x33ae   :  { %v2989_v20 = vadd.f32 %v3044_v8, %v2988_v13  ;;  %v3439_v14 = vpop.f32.mrb[35].mxu1 }
0x33b0   :  { %2993 = vst.msk [vmem:[#allocation11] sm:$0x3] %vm2992_vm2, %v2989_v20 }
0x33b1   :  { %3919 = shalt.err (!%p3916_p8)
}
0x33b2   :  { %s3920_s12 = scalar_lea.hbm %s5000_s15, 32 }
0x33b3   :  { %p3921_p9 = scmp.ne.s32.totalorder %s5000_s15, %s3920_s12  ;;  %p3924_p10 = scmp.lt.u32.totalorder %s3920_s12, %s5000_s15 }
0x33b5   :  { %p3926_p11 = pnand %p3924_p10, %p3921_p9 }
0x33b7   :  { %3929 = shalt.err (!%p3926_p11)
}
0x33b8   :  { %3003 = dma.vmem_to_hbm [thread:$0]  %s3001_s9, 32, %s5000_s15, [#allocation5]  }
0x33b9   :  { %3936 = dma.done.wait [#allocation5], 32  }
0x33ba   :  { %3937 = vsyncadd [#allocation5], 4294967264 }
0x33bb   :  { %3007 = vsyncpa [#allocation4], 1 }
0x33bc   :  { %3008 = vsyncpa [#allocation7], 1 }
0x33bd   :  { %3009 = vsyncpa [#allocation10], 1 }
0x33be   :  { %3010 = vsyncpa [#allocation5], 1 }

</bundles_post_ra>
